<compile_context>
chip_gen: v6e
topology: v6e:2x2x1
jax: 0.10.0
libtpu: 0.0.40
codegen_flags: <defaults>
</compile_context>

<pallas_src>
import functools

import jax
import jax.numpy as jnp
import numpy as np
from jax.experimental import pallas as pl
from jax.experimental.pallas import tpu as pltpu


# ----------------------------------------------------------------------------
# Pallas kernel: one grid step == `batch_per_block` batch elements.
# ----------------------------------------------------------------------------
def mhca_kernel(s_ref, y_ref,
                wS_ref, bS_ref,
                wY_ref, bY_ref,
                mcat_ref, ncat_ref,
                wU_ref, bU_ref,
                wt_ref,
                o_ref,
                *, num_heads, channels, seq_len, batch_per_block):
    f32 = jnp.float32
    bf16 = jnp.bfloat16
    C, H, L, NB = channels, num_heads, seq_len, batch_per_block

    s_flat = s_ref[...]                                    # [NB*L, 4C]  (f32)
    y_in = y_ref[...]                                      # [NB*L, CY]

    # ---- conv_S: MaxPool2d(2) -> Conv2d(1x1, BN folded) -> ReLU --------------
    # MaxPool over the four 2x2 sub-pixel lane blocks via two cyclic lane rolls
    # (XLU slot); lanes [0, C) then hold the max over all four offsets.  wS is
    # zero-padded to [4C, C] offline so no lane slice is needed before the MXU.
    t = jnp.maximum(s_flat, pltpu.roll(s_flat, shift=2 * C, axis=1))
    t = jnp.maximum(t, pltpu.roll(t, shift=C, axis=1))
    s_seq = jnp.maximum(
        jnp.dot(t.astype(bf16), wS_ref[...], preferred_element_type=f32)
        + bS_ref[...], 0.0)                                # [NB*L, C]

    # ---- conv_Y: Conv2d(1x1, BN folded) -> ReLU ------------------------------
    y_seq = jnp.maximum(
        jnp.dot(y_in.astype(bf16), wY_ref[...], preferred_element_type=f32)
        + bY_ref[...], 0.0)                                # [NB*L, C]

    s_bf = s_seq.astype(bf16)
    y_bf = y_seq.astype(bf16)

    # ---- MultiheadAttention(query=y, key=y, value=s), batch_first ------------
    # Per-head q/k and v/out projections pre-folded & lane-concatenated:
    #   ym_all[:, h*C:(h+1)*C] = y @ (wq_h wk_h^T / sqrt(hd))
    #   sv_all[:, h*C:(h+1)*C] = s @ (wv_h wo_h)
    ym_all = jnp.dot(y_bf, mcat_ref[...], preferred_element_type=f32)   # [NB*L, H*C]
    sv_all = jnp.dot(s_bf, ncat_ref[...], preferred_element_type=f32)   # [NB*L, H*C]
    ym_bf = ym_all.astype(bf16)
    sv_bf = sv_all.astype(bf16)

    attn_rows = []
    for b in range(NB):                                    # static unroll (NB in {1, B})
        r0 = b * L
        y_b = y_bf[r0:r0 + L, :]                           # [L, C]
        # Stack the head lane-blocks vertically: [L, H*C] -> [H*L, C].
        ym_stack = jnp.concatenate(
            [ym_bf[r0:r0 + L, h * C:(h + 1) * C] for h in range(H)], axis=0)
        sv_stack = jnp.concatenate(
            [sv_bf[r0:r0 + L, h * C:(h + 1) * C] for h in range(H)], axis=0)
        # All-head logits in ONE matmul; key-side transpose happens once here.
        logits = jax.lax.dot_general(
            ym_stack, y_b, (((1,), (1,)), ((), ())),
            preferred_element_type=f32)                    # [H*L, L]
        logits = logits - jnp.max(logits, axis=-1, keepdims=True)
        e = jnp.exp(logits)
        p = (e * pl.reciprocal(jnp.sum(e, axis=-1, keepdims=True),
                               approx=True)).astype(bf16)  # [H*L, L]
        # Re-stack the probabilities head-major along lanes: [H*L, L] -> [L, H*L],
        # then ONE attention matmul with K = H*L = 256 (fills the MXU depth).
        p_hstack = jnp.concatenate(
            [p[h * L:(h + 1) * L, :] for h in range(H)], axis=1)
        attn_rows.append(jnp.dot(p_hstack, sv_stack,
                                 preferred_element_type=f32))           # [L, C]
    attn = attn_rows[0] if NB == 1 else jnp.concatenate(attn_rows, axis=0)

    # ---- upsample: Conv2d(1x1, BN folded) -> Sigmoid -> ConvTranspose2d(2,2) -
    u = jnp.dot(attn.astype(bf16), wU_ref[...], preferred_element_type=f32) + bU_ref[...]
    u = pl.reciprocal(1.0 + jnp.exp(-u), approx=True)      # sigmoid (EUP slot)
    # ConvTranspose2d(k=2, s=2) as ONE [C, 4C] matmul, fused with the final
    # torch.mul(y, s_enc): a single lane-dense unmasked [NB*L, 4C] store.
    up = jnp.dot(u.astype(bf16), wt_ref[...], preferred_element_type=f32)
    o_ref[...] = (up * s_flat).astype(o_ref.dtype)


# ----------------------------------------------------------------------------
# One-time constant parameter transform: fold BN scale, attention 1/sqrt(hd),
# per-head weight products; lane-concat per-head matrices and the
# ConvTranspose taps; zero-pad wS for the roll-based maxpool; cast the folded
# weights (f32 folds first, bf16 cast last).
# ----------------------------------------------------------------------------
def prepare_kernel_params(p, num_heads):
    f32, bf16 = jnp.float32, jnp.bfloat16
    C = p["wS"].shape[1]
    hd = C // num_heads
    scale = 1.0 / float(hd) ** 0.5

    wS_f = p["wS"] * p["bnS"][0][None, :]
    wY_f = p["wY"] * p["bnY"][0][None, :]
    wU_f = p["wu"] * p["bnU"][0][None, :]
    bS = p["bnS"][1][None, :].astype(f32)
    bY = p["bnY"][1][None, :].astype(f32)
    bU = p["bnU"][1][None, :].astype(f32)

    # Zero-pad wS to [4C, C] so the in-kernel roll-maxpool needs no lane slice.
    wS_pad = jnp.zeros((4 * C, C), f32).at[:C].set(wS_f)

    # Per-head folded attention matrices, lane-concatenated (exact refactor).
    M_cat = jnp.concatenate(
        [(p["wq"][:, h * hd:(h + 1) * hd] * scale) @ p["wk"][:, h * hd:(h + 1) * hd].T
         for h in range(num_heads)], axis=1)               # [C, H*C]
    N_cat = jnp.concatenate(
        [p["wv"][:, h * hd:(h + 1) * hd] @ p["wo"][h * hd:(h + 1) * hd, :]
         for h in range(num_heads)], axis=1)               # [C, H*C]

    # ConvTranspose2d(2,2): one [C, 4C] weight, column block index = di*2+dj.
    wt_cat = jnp.concatenate([p["wt_full"][:, :, di, dj]
                              for di in range(2) for dj in range(2)], axis=1)

    return dict(wS=wS_pad.astype(bf16), bS=bS,
                wY=wY_f.astype(bf16), bY=bY,
                M=M_cat.astype(bf16), N=N_cat.astype(bf16),
                wU=wU_f.astype(bf16), bU=bU,
                wt=wt_cat.astype(bf16))


def _tensorcores_per_chip():
    # Best-effort: v7x has 2 TensorCores per chip; v5e/v6e have 1.
    try:
        kind = jax.devices()[0].device_kind.lower()
    except Exception:
        return 1
    return 2 if ("v7" in kind or "7x" in kind) else 1


# ----------------------------------------------------------------------------
# Wrapper: layout plumbing (pixel-unshuffle to lane-dense [B*L, 4C]) + pallas_call
# ----------------------------------------------------------------------------
def multi_head_cross_attention(s_nchw, y_nchw, kp, num_heads, batch_per_block=None):
    B, C, H, W = s_nchw.shape
    _, CY, Hy, Wy = y_nchw.shape
    assert H == 2 * Hy and W == 2 * Wy and kp["wS"].shape == (4 * C, C)
    L = Hy * Wy
    C4 = 4 * C

    if batch_per_block is None:
        # Fold the batch into one grid step on single-TC chips (v5e/v6e);
        # keep a "parallel" per-batch grid on 2-TC chips (v7x).
        batch_per_block = 1 if (_tensorcores_per_chip() >= 2 and B > 1) else B
    nb = batch_per_block
    assert B % nb == 0

    # Pixel-unshuffle the skip into a lane-dense [B*L, 4C] layout:
    #   s_flat[b*L + i*Wy + j, (di*2+dj)*C + c] = s[b, c, 2i+di, 2j+dj]
    s_flat = jnp.transpose(s_nchw.reshape(B, C, Hy, 2, Wy, 2),
                           (0, 2, 4, 3, 5, 1)).reshape(B * L, C4)
    y_flat = jnp.transpose(y_nchw, (0, 2, 3, 1)).reshape(B * L, CY)

    def wspec(arr):
        return pl.BlockSpec(arr.shape, lambda i: (0, 0))

    kernel = functools.partial(mhca_kernel, num_heads=num_heads, channels=C,
                               seq_len=L, batch_per_block=nb)

    out = pl.pallas_call(
        kernel,
        out_shape=jax.ShapeDtypeStruct((B * L, C4), jnp.float32),
        grid=(B // nb,),
        in_specs=[
            pl.BlockSpec((nb * L, C4), lambda i: (i, 0)),   # s_flat
            pl.BlockSpec((nb * L, CY), lambda i: (i, 0)),   # y_flat
            wspec(kp["wS"]), wspec(kp["bS"]),
            wspec(kp["wY"]), wspec(kp["bY"]),
            wspec(kp["M"]), wspec(kp["N"]),
            wspec(kp["wU"]), wspec(kp["bU"]),
            wspec(kp["wt"]),
        ],
        out_specs=pl.BlockSpec((nb * L, C4), lambda i: (i, 0)),
        compiler_params=pltpu.CompilerParams(
            dimension_semantics=("parallel",),
            vmem_limit_bytes=32 * 1024 * 1024),
    )(s_flat, y_flat,
      kp["wS"], kp["bS"], kp["wY"], kp["bY"],
      kp["M"], kp["N"], kp["wU"], kp["bU"], kp["wt"])

    # Undo the pixel-unshuffle back to NCHW.
    out = out.reshape(B, Hy, Wy, 2, 2, C)
    out = jnp.transpose(out, (0, 5, 1, 3, 2, 4)).reshape(B, C, H, W)
    return out


# ----------------------------------------------------------------------------
# Pure-JAX reference (unfused torch semantics, f32) for a correctness check
# ----------------------------------------------------------------------------
def reference(s_nchw, y_nchw, p, num_heads):
    B, C, H, W = s_nchw.shape
    Hy, Wy = H // 2, W // 2
    s_nhwc = jnp.transpose(s_nchw, (0, 2, 3, 1))
    sp = s_nhwc.reshape(B, Hy, 2, Wy, 2, C).max(axis=(2, 4))
    s_seq = sp.reshape(B, Hy * Wy, C) @ p["wS"]
    s_seq = jax.nn.relu(s_seq * p["bnS"][0] + p["bnS"][1])
    y_nhwc = jnp.transpose(y_nchw, (0, 2, 3, 1))
    CY = y_nhwc.shape[-1]
    y_seq = y_nhwc.reshape(B, Hy * Wy, CY) @ p["wY"]
    y_seq = jax.nn.relu(y_seq * p["bnY"][0] + p["bnY"][1])
    q, k, v = y_seq @ p["wq"], y_seq @ p["wk"], s_seq @ p["wv"]
    hd = C // num_heads
    qh = q.reshape(B, -1, num_heads, hd).transpose(0, 2, 1, 3)
    kh = k.reshape(B, -1, num_heads, hd).transpose(0, 2, 1, 3)
    vh = v.reshape(B, -1, num_heads, hd).transpose(0, 2, 1, 3)
    logits = jnp.einsum("bhqd,bhkd->bhqk", qh, kh) / jnp.sqrt(hd).astype(jnp.float32)
    pr = jax.nn.softmax(logits, axis=-1)
    attn = jnp.einsum("bhqk,bhkd->bhqd", pr, vh).transpose(0, 2, 1, 3).reshape(B, -1, C)
    attn = attn @ p["wo"]
    u = attn @ p["wu"]
    u = jax.nn.sigmoid(u * p["bnU"][0] + p["bnU"][1]).reshape(B, Hy, Wy, C)
    wt = p["wt_full"]                                    # [Cin, Cout, 2, 2]
    out = jnp.zeros((B, H, W, C), jnp.float32)
    for di in range(2):
        for dj in range(2):
            out = out.at[:, di::2, dj::2, :].set(
                jnp.einsum("bhwi,io->bhwo", u, wt[:, :, di, dj]))
    out = out * s_nhwc
    return jnp.transpose(out, (0, 3, 1, 2))


# ----------------------------------------------------------------------------
# Deterministic synthetic parameters + run
# ----------------------------------------------------------------------------
def make_params(key, C, CY):
    ks = jax.random.split(key, 8)
    init = lambda k, shape: 0.1 * jax.random.normal(k, shape, jnp.float32)
    eps = 1e-5
    # BN (inference): scale = gamma/sqrt(var+eps), shift = beta - mean*scale
    bn_default = jnp.stack([jnp.full((C,), 1.0 / np.sqrt(1.0 + eps), jnp.float32),
                            jnp.zeros((C,), jnp.float32)])
    in_proj = init(ks[2], (3 * C, C))                    # torch in_proj_weight [3E, E]
    out_proj = init(ks[3], (C, C))                       # torch out_proj.weight [E, E]
    wt_full = init(ks[5], (C, C, 2, 2))                  # ConvTranspose2d weight [Cin,Cout,2,2]
    params = {
        "wS": init(ks[0], (C, C, 1, 1))[:, :, 0, 0].T,   # Conv2d weight -> [Cin, Cout]
        "bnS": bn_default,
        "wY": init(ks[1], (C, CY, 1, 1))[:, :, 0, 0].T,  # [CY, C]
        "bnY": bn_default,
        "wq": in_proj[:C].T,
        "wk": in_proj[C:2 * C].T,
        "wv": in_proj[2 * C:].T,
        "wo": out_proj.T,
        "wu": init(ks[4], (C, C, 1, 1))[:, :, 0, 0].T,   # xavier-init'd 1x1 conv (synthetic)
        "bnU": bn_default,
        "wt_full": wt_full,
    }
    return params


if __name__ == "__main__":
    B = 2
    embed_dim = channel_S = 32
    channel_Y = 16
    num_heads = 4
    H = W = 16          # spatial size of s (skip connection)
    Hy = Wy = 8         # spatial size of y (decoder feature), = H/2 so seq lens match

    key = jax.random.PRNGKey(0)
    k_s, k_y, k_p = jax.random.split(key, 3)
    s = jax.random.normal(k_s, (B, channel_S, H, W), jnp.float32)    # NCHW
    y = jax.random.normal(k_y, (B, channel_Y, Hy, Wy), jnp.float32)  # NCHW
    params = make_params(k_p, channel_S, channel_Y)
    kparams = prepare_kernel_params(params, num_heads)

    ref = jax.block_until_ready(reference(s, y, params, num_heads))

    # Auto-selected path (B folded on 1-TC chips; per-batch parallel grid on
    # 2-TC chips), plus both forced paths so either choice is validated.
    out = None
    for nb in (None, 1, B):
        o = jax.block_until_ready(
            multi_head_cross_attention(s, y, kparams, num_heads, batch_per_block=nb))
        np.testing.assert_allclose(np.asarray(o), np.asarray(ref), rtol=2e-2, atol=2e-2)
        if nb is None:
            out = o

    assert out.shape == (B, channel_S, H, W)
    print("KERNEL_OK")
</pallas_src>

<mosaic_0001>
module attributes {stable_mosaic.version = 11 : i64} {
  func.func @mhca_kernel(%arg0: i32, %arg1: memref<128x128xf32, #tpu.memory_space<vmem>>, %arg2: memref<128x16xf32, #tpu.memory_space<vmem>>, %arg3: memref<128x32xbf16, #tpu.memory_space<vmem>>, %arg4: memref<1x32xf32, #tpu.memory_space<vmem>>, %arg5: memref<16x32xbf16, #tpu.memory_space<vmem>>, %arg6: memref<1x32xf32, #tpu.memory_space<vmem>>, %arg7: memref<32x128xbf16, #tpu.memory_space<vmem>>, %arg8: memref<32x128xbf16, #tpu.memory_space<vmem>>, %arg9: memref<32x32xbf16, #tpu.memory_space<vmem>>, %arg10: memref<1x32xf32, #tpu.memory_space<vmem>>, %arg11: memref<32x128xbf16, #tpu.memory_space<vmem>>, %arg12: memref<128x128xf32, #tpu.memory_space<vmem>>) attributes {dimension_semantics = [#tpu.dimension_semantics<parallel>], iteration_bounds = array<i64: 1>, scalar_prefetch = 0 : i64, scratch_operands = 0 : i64, tpu.core_type = #tpu.core_type<tc>, window_params = [{transform_indices = @transform_0, window_bounds = array<i64: 128, 128>}, {transform_indices = @transform_1, window_bounds = array<i64: 128, 16>}, {pipeline_mode = #tpu.pipeline_mode<synchronous>, transform_indices = @transform_2, window_bounds = array<i64: 128, 32>}, {pipeline_mode = #tpu.pipeline_mode<synchronous>, transform_indices = @transform_3, window_bounds = array<i64: 1, 32>}, {pipeline_mode = #tpu.pipeline_mode<synchronous>, transform_indices = @transform_4, window_bounds = array<i64: 16, 32>}, {pipeline_mode = #tpu.pipeline_mode<synchronous>, transform_indices = @transform_5, window_bounds = array<i64: 1, 32>}, {pipeline_mode = #tpu.pipeline_mode<synchronous>, transform_indices = @transform_6, window_bounds = array<i64: 32, 128>}, {pipeline_mode = #tpu.pipeline_mode<synchronous>, transform_indices = @transform_7, window_bounds = array<i64: 32, 128>}, {pipeline_mode = #tpu.pipeline_mode<synchronous>, transform_indices = @transform_8, window_bounds = array<i64: 32, 32>}, {pipeline_mode = #tpu.pipeline_mode<synchronous>, transform_indices = @transform_9, window_bounds = array<i64: 1, 32>}, {pipeline_mode = #tpu.pipeline_mode<synchronous>, transform_indices = @transform_10, window_bounds = array<i64: 32, 128>}, {transform_indices = @transform_11, window_bounds = array<i64: 128, 128>}]} {
    %c0 = arith.constant 0 : index
    %c0_0 = arith.constant 0 : index
    %0 = vector.load %arg1[%c0, %c0_0] : memref<128x128xf32, #tpu.memory_space<vmem>>, vector<128x128xf32>
    %c0_1 = arith.constant 0 : index
    %c0_2 = arith.constant 0 : index
    %1 = vector.load %arg2[%c0_1, %c0_2] : memref<128x16xf32, #tpu.memory_space<vmem>>, vector<128x16xf32>
    %c64_i32 = arith.constant 64 : i32
    %2 = tpu.dynamic_rotate %0 by %c64_i32 dim 1 : vector<128x128xf32>, i32 -> vector<128x128xf32>
    %3 = arith.maximumf %0, %2 : vector<128x128xf32>
    %c32_i32 = arith.constant 32 : i32
    %4 = tpu.dynamic_rotate %3 by %c32_i32 dim 1 : vector<128x128xf32>, i32 -> vector<128x128xf32>
    %5 = arith.maximumf %3, %4 : vector<128x128xf32>
    %6 = arith.truncf %5 : vector<128x128xf32> to vector<128x128xbf16>
    %c0_3 = arith.constant 0 : index
    %c0_4 = arith.constant 0 : index
    %7 = vector.load %arg3[%c0_3, %c0_4] : memref<128x32xbf16, #tpu.memory_space<vmem>>, vector<128x32xbf16>
    %cst = arith.constant dense<0.000000e+00> : vector<128x32xf32>
    %8 = tpu.matmul %6, %7, %cst {dimension_numbers = #tpu.dot_dimension_numbers<[1], [0], [0], [1], [0, 0, 1, 1], [], []>} : vector<128x128xbf16>, vector<128x32xbf16>, vector<128x32xf32> -> vector<128x32xf32>
    %c0_5 = arith.constant 0 : index
    %c0_6 = arith.constant 0 : index
    %9 = vector.load %arg4[%c0_5, %c0_6] : memref<1x32xf32, #tpu.memory_space<vmem>>, vector<1x32xf32>
    %10 = vector.broadcast %9 : vector<1x32xf32> to vector<128x32xf32>
    %11 = arith.addf %8, %10 : vector<128x32xf32>
    %cst_7 = arith.constant 0.000000e+00 : f32
    %12 = vector.broadcast %cst_7 : f32 to vector<128x32xf32>
    %13 = arith.maximumf %11, %12 : vector<128x32xf32>
    %14 = arith.truncf %1 : vector<128x16xf32> to vector<128x16xbf16>
    %c0_8 = arith.constant 0 : index
    %c0_9 = arith.constant 0 : index
    %15 = vector.load %arg5[%c0_8, %c0_9] : memref<16x32xbf16, #tpu.memory_space<vmem>>, vector<16x32xbf16>
    %cst_10 = arith.constant dense<0.000000e+00> : vector<128x32xf32>
    %16 = tpu.matmul %14, %15, %cst_10 {dimension_numbers = #tpu.dot_dimension_numbers<[1], [0], [0], [1], [0, 0, 1, 1], [], []>} : vector<128x16xbf16>, vector<16x32xbf16>, vector<128x32xf32> -> vector<128x32xf32>
    %c0_11 = arith.constant 0 : index
    %c0_12 = arith.constant 0 : index
    %17 = vector.load %arg6[%c0_11, %c0_12] : memref<1x32xf32, #tpu.memory_space<vmem>>, vector<1x32xf32>
    %18 = vector.broadcast %17 : vector<1x32xf32> to vector<128x32xf32>
    %19 = arith.addf %16, %18 : vector<128x32xf32>
    %cst_13 = arith.constant 0.000000e+00 : f32
    %20 = vector.broadcast %cst_13 : f32 to vector<128x32xf32>
    %21 = arith.maximumf %19, %20 : vector<128x32xf32>
    %22 = arith.truncf %13 : vector<128x32xf32> to vector<128x32xbf16>
    %23 = arith.truncf %21 : vector<128x32xf32> to vector<128x32xbf16>
    %c0_14 = arith.constant 0 : index
    %c0_15 = arith.constant 0 : index
    %24 = vector.load %arg7[%c0_14, %c0_15] : memref<32x128xbf16, #tpu.memory_space<vmem>>, vector<32x128xbf16>
    %cst_16 = arith.constant dense<0.000000e+00> : vector<128x128xf32>
    %25 = tpu.matmul %23, %24, %cst_16 {dimension_numbers = #tpu.dot_dimension_numbers<[1], [0], [0], [1], [0, 0, 1, 1], [], []>} : vector<128x32xbf16>, vector<32x128xbf16>, vector<128x128xf32> -> vector<128x128xf32>
    %c0_17 = arith.constant 0 : index
    %c0_18 = arith.constant 0 : index
    %26 = vector.load %arg8[%c0_17, %c0_18] : memref<32x128xbf16, #tpu.memory_space<vmem>>, vector<32x128xbf16>
    %cst_19 = arith.constant dense<0.000000e+00> : vector<128x128xf32>
    %27 = tpu.matmul %22, %26, %cst_19 {dimension_numbers = #tpu.dot_dimension_numbers<[1], [0], [0], [1], [0, 0, 1, 1], [], []>} : vector<128x32xbf16>, vector<32x128xbf16>, vector<128x128xf32> -> vector<128x128xf32>
    %28 = arith.truncf %25 : vector<128x128xf32> to vector<128x128xbf16>
    %29 = arith.truncf %27 : vector<128x128xf32> to vector<128x128xbf16>
    %30 = vector.extract_strided_slice %23 {offsets = [0, 0], sizes = [64, 32], strides = [1, 1]} : vector<128x32xbf16> to vector<64x32xbf16>
    %31 = vector.extract_strided_slice %28 {offsets = [0, 0], sizes = [64, 32], strides = [1, 1]} : vector<128x128xbf16> to vector<64x32xbf16>
    %32 = vector.extract_strided_slice %28 {offsets = [0, 32], sizes = [64, 32], strides = [1, 1]} : vector<128x128xbf16> to vector<64x32xbf16>
    %33 = vector.extract_strided_slice %28 {offsets = [0, 64], sizes = [64, 32], strides = [1, 1]} : vector<128x128xbf16> to vector<64x32xbf16>
    %34 = vector.extract_strided_slice %28 {offsets = [0, 96], sizes = [64, 32], strides = [1, 1]} : vector<128x128xbf16> to vector<64x32xbf16>
    %35 = tpu.concatenate %31, %32, %33, %34 in 0 : vector<64x32xbf16>, vector<64x32xbf16>, vector<64x32xbf16>, vector<64x32xbf16> -> vector<256x32xbf16>
    %36 = vector.extract_strided_slice %29 {offsets = [0, 0], sizes = [64, 32], strides = [1, 1]} : vector<128x128xbf16> to vector<64x32xbf16>
    %37 = vector.extract_strided_slice %29 {offsets = [0, 32], sizes = [64, 32], strides = [1, 1]} : vector<128x128xbf16> to vector<64x32xbf16>
    %38 = vector.extract_strided_slice %29 {offsets = [0, 64], sizes = [64, 32], strides = [1, 1]} : vector<128x128xbf16> to vector<64x32xbf16>
    %39 = vector.extract_strided_slice %29 {offsets = [0, 96], sizes = [64, 32], strides = [1, 1]} : vector<128x128xbf16> to vector<64x32xbf16>
    %40 = tpu.concatenate %36, %37, %38, %39 in 0 : vector<64x32xbf16>, vector<64x32xbf16>, vector<64x32xbf16>, vector<64x32xbf16> -> vector<256x32xbf16>
    %cst_20 = arith.constant dense<0.000000e+00> : vector<256x64xf32>
    %41 = tpu.matmul %35, %30, %cst_20 {dimension_numbers = #tpu.dot_dimension_numbers<[1], [1], [0], [0], [0, 0, 1, 0], [], []>} : vector<256x32xbf16>, vector<64x32xbf16>, vector<256x64xf32> -> vector<256x64xf32>
    %cst_21 = arith.constant dense<0xFF800000> : vector<256xf32>
    %42 = vector.multi_reduction <maximumf>, %41, %cst_21 [1] : vector<256x64xf32> to vector<256xf32>
    %43 = vector.shape_cast %42 : vector<256xf32> to vector<256x1xf32>
    %44 = vector.broadcast %43 : vector<256x1xf32> to vector<256x64xf32>
    %45 = arith.subf %41, %44 : vector<256x64xf32>
    %46 = math.exp %45 : vector<256x64xf32>
    %cst_22 = arith.constant dense<0.000000e+00> : vector<256xf32>
    %47 = vector.multi_reduction <add>, %46, %cst_22 [1] : vector<256x64xf32> to vector<256xf32>
    %48 = vector.shape_cast %47 : vector<256xf32> to vector<256x1xf32>
    %49 = tpu.reciprocal %48 {approx = true} : vector<256x1xf32> -> vector<256x1xf32>
    %50 = vector.broadcast %49 : vector<256x1xf32> to vector<256x64xf32>
    %51 = arith.mulf %46, %50 : vector<256x64xf32>
    %52 = arith.truncf %51 : vector<256x64xf32> to vector<256x64xbf16>
    %53 = vector.extract_strided_slice %52 {offsets = [0, 0], sizes = [64, 64], strides = [1, 1]} : vector<256x64xbf16> to vector<64x64xbf16>
    %54 = vector.extract_strided_slice %52 {offsets = [64, 0], sizes = [64, 64], strides = [1, 1]} : vector<256x64xbf16> to vector<64x64xbf16>
    %55 = vector.extract_strided_slice %52 {offsets = [128, 0], sizes = [64, 64], strides = [1, 1]} : vector<256x64xbf16> to vector<64x64xbf16>
    %56 = vector.extract_strided_slice %52 {offsets = [192, 0], sizes = [64, 64], strides = [1, 1]} : vector<256x64xbf16> to vector<64x64xbf16>
    %57 = tpu.concatenate %53, %54, %55, %56 in 1 : vector<64x64xbf16>, vector<64x64xbf16>, vector<64x64xbf16>, vector<64x64xbf16> -> vector<64x256xbf16>
    %cst_23 = arith.constant dense<0.000000e+00> : vector<64x32xf32>
    %58 = tpu.matmul %57, %40, %cst_23 {dimension_numbers = #tpu.dot_dimension_numbers<[1], [0], [0], [1], [0, 0, 1, 1], [], []>} : vector<64x256xbf16>, vector<256x32xbf16>, vector<64x32xf32> -> vector<64x32xf32>
    %59 = vector.extract_strided_slice %23 {offsets = [64, 0], sizes = [64, 32], strides = [1, 1]} : vector<128x32xbf16> to vector<64x32xbf16>
    %60 = vector.extract_strided_slice %28 {offsets = [64, 0], sizes = [64, 32], strides = [1, 1]} : vector<128x128xbf16> to vector<64x32xbf16>
    %61 = vector.extract_strided_slice %28 {offsets = [64, 32], sizes = [64, 32], strides = [1, 1]} : vector<128x128xbf16> to vector<64x32xbf16>
    %62 = vector.extract_strided_slice %28 {offsets = [64, 64], sizes = [64, 32], strides = [1, 1]} : vector<128x128xbf16> to vector<64x32xbf16>
    %63 = vector.extract_strided_slice %28 {offsets = [64, 96], sizes = [64, 32], strides = [1, 1]} : vector<128x128xbf16> to vector<64x32xbf16>
    %64 = tpu.concatenate %60, %61, %62, %63 in 0 : vector<64x32xbf16>, vector<64x32xbf16>, vector<64x32xbf16>, vector<64x32xbf16> -> vector<256x32xbf16>
    %65 = vector.extract_strided_slice %29 {offsets = [64, 0], sizes = [64, 32], strides = [1, 1]} : vector<128x128xbf16> to vector<64x32xbf16>
    %66 = vector.extract_strided_slice %29 {offsets = [64, 32], sizes = [64, 32], strides = [1, 1]} : vector<128x128xbf16> to vector<64x32xbf16>
    %67 = vector.extract_strided_slice %29 {offsets = [64, 64], sizes = [64, 32], strides = [1, 1]} : vector<128x128xbf16> to vector<64x32xbf16>
    %68 = vector.extract_strided_slice %29 {offsets = [64, 96], sizes = [64, 32], strides = [1, 1]} : vector<128x128xbf16> to vector<64x32xbf16>
    %69 = tpu.concatenate %65, %66, %67, %68 in 0 : vector<64x32xbf16>, vector<64x32xbf16>, vector<64x32xbf16>, vector<64x32xbf16> -> vector<256x32xbf16>
    %cst_24 = arith.constant dense<0.000000e+00> : vector<256x64xf32>
    %70 = tpu.matmul %64, %59, %cst_24 {dimension_numbers = #tpu.dot_dimension_numbers<[1], [1], [0], [0], [0, 0, 1, 0], [], []>} : vector<256x32xbf16>, vector<64x32xbf16>, vector<256x64xf32> -> vector<256x64xf32>
    %cst_25 = arith.constant dense<0xFF800000> : vector<256xf32>
    %71 = vector.multi_reduction <maximumf>, %70, %cst_25 [1] : vector<256x64xf32> to vector<256xf32>
    %72 = vector.shape_cast %71 : vector<256xf32> to vector<256x1xf32>
    %73 = vector.broadcast %72 : vector<256x1xf32> to vector<256x64xf32>
    %74 = arith.subf %70, %73 : vector<256x64xf32>
    %75 = math.exp %74 : vector<256x64xf32>
    %cst_26 = arith.constant dense<0.000000e+00> : vector<256xf32>
    %76 = vector.multi_reduction <add>, %75, %cst_26 [1] : vector<256x64xf32> to vector<256xf32>
    %77 = vector.shape_cast %76 : vector<256xf32> to vector<256x1xf32>
    %78 = tpu.reciprocal %77 {approx = true} : vector<256x1xf32> -> vector<256x1xf32>
    %79 = vector.broadcast %78 : vector<256x1xf32> to vector<256x64xf32>
    %80 = arith.mulf %75, %79 : vector<256x64xf32>
    %81 = arith.truncf %80 : vector<256x64xf32> to vector<256x64xbf16>
    %82 = vector.extract_strided_slice %81 {offsets = [0, 0], sizes = [64, 64], strides = [1, 1]} : vector<256x64xbf16> to vector<64x64xbf16>
    %83 = vector.extract_strided_slice %81 {offsets = [64, 0], sizes = [64, 64], strides = [1, 1]} : vector<256x64xbf16> to vector<64x64xbf16>
    %84 = vector.extract_strided_slice %81 {offsets = [128, 0], sizes = [64, 64], strides = [1, 1]} : vector<256x64xbf16> to vector<64x64xbf16>
    %85 = vector.extract_strided_slice %81 {offsets = [192, 0], sizes = [64, 64], strides = [1, 1]} : vector<256x64xbf16> to vector<64x64xbf16>
    %86 = tpu.concatenate %82, %83, %84, %85 in 1 : vector<64x64xbf16>, vector<64x64xbf16>, vector<64x64xbf16>, vector<64x64xbf16> -> vector<64x256xbf16>
    %cst_27 = arith.constant dense<0.000000e+00> : vector<64x32xf32>
    %87 = tpu.matmul %86, %69, %cst_27 {dimension_numbers = #tpu.dot_dimension_numbers<[1], [0], [0], [1], [0, 0, 1, 1], [], []>} : vector<64x256xbf16>, vector<256x32xbf16>, vector<64x32xf32> -> vector<64x32xf32>
    %88 = tpu.concatenate %58, %87 in 0 : vector<64x32xf32>, vector<64x32xf32> -> vector<128x32xf32>
    %89 = arith.truncf %88 : vector<128x32xf32> to vector<128x32xbf16>
    %c0_28 = arith.constant 0 : index
    %c0_29 = arith.constant 0 : index
    %90 = vector.load %arg9[%c0_28, %c0_29] : memref<32x32xbf16, #tpu.memory_space<vmem>>, vector<32x32xbf16>
    %cst_30 = arith.constant dense<0.000000e+00> : vector<128x32xf32>
    %91 = tpu.matmul %89, %90, %cst_30 {dimension_numbers = #tpu.dot_dimension_numbers<[1], [0], [0], [1], [0, 0, 1, 1], [], []>} : vector<128x32xbf16>, vector<32x32xbf16>, vector<128x32xf32> -> vector<128x32xf32>
    %c0_31 = arith.constant 0 : index
    %c0_32 = arith.constant 0 : index
    %92 = vector.load %arg10[%c0_31, %c0_32] : memref<1x32xf32, #tpu.memory_space<vmem>>, vector<1x32xf32>
    %93 = vector.broadcast %92 : vector<1x32xf32> to vector<128x32xf32>
    %94 = arith.addf %91, %93 : vector<128x32xf32>
    %cst_33 = arith.constant 0.000000e+00 : f32
    %95 = vector.broadcast %cst_33 : f32 to vector<128x32xf32>
    %96 = arith.subf %95, %94 : vector<128x32xf32>
    %97 = math.exp %96 : vector<128x32xf32>
    %cst_34 = arith.constant 1.000000e+00 : f32
    %98 = vector.broadcast %cst_34 : f32 to vector<128x32xf32>
    %99 = arith.addf %98, %97 : vector<128x32xf32>
    %100 = tpu.reciprocal %99 {approx = true} : vector<128x32xf32> -> vector<128x32xf32>
    %101 = arith.truncf %100 : vector<128x32xf32> to vector<128x32xbf16>
    %c0_35 = arith.constant 0 : index
    %c0_36 = arith.constant 0 : index
    %102 = vector.load %arg11[%c0_35, %c0_36] : memref<32x128xbf16, #tpu.memory_space<vmem>>, vector<32x128xbf16>
    %cst_37 = arith.constant dense<0.000000e+00> : vector<128x128xf32>
    %103 = tpu.matmul %101, %102, %cst_37 {dimension_numbers = #tpu.dot_dimension_numbers<[1], [0], [0], [1], [0, 0, 1, 1], [], []>} : vector<128x32xbf16>, vector<32x128xbf16>, vector<128x128xf32> -> vector<128x128xf32>
    %104 = arith.mulf %103, %0 : vector<128x128xf32>
    %c0_38 = arith.constant 0 : index
    %c0_39 = arith.constant 0 : index
    %105 = vector.load %arg12[%c0_38, %c0_39] : memref<128x128xf32, #tpu.memory_space<vmem>>, vector<128x128xf32>
    tpu.vector_store %arg12[%c0_38, %c0_39], %104 {strides = array<i32>} : memref<128x128xf32, #tpu.memory_space<vmem>>, vector<128x128xf32>,
    return
  }
  func.func @transform_0(%arg0: i32) -> (i32, i32) {
    %c0_i32 = arith.constant 0 : i32
    %c0_i32_0 = arith.constant 0 : i32
    return %arg0, %c0_i32 : i32, i32
  }
  func.func @transform_1(%arg0: i32) -> (i32, i32) {
    %c0_i32 = arith.constant 0 : i32
    %c0_i32_0 = arith.constant 0 : i32
    return %arg0, %c0_i32 : i32, i32
  }
  func.func @transform_2(%arg0: i32) -> (i32, i32) {
    %c0_i32 = arith.constant 0 : i32
    %c0_i32_0 = arith.constant 0 : i32
    %c0_i32_1 = arith.constant 0 : i32
    return %c0_i32, %c0_i32_0 : i32, i32
  }
  func.func @transform_3(%arg0: i32) -> (i32, i32) {
    %c0_i32 = arith.constant 0 : i32
    %c0_i32_0 = arith.constant 0 : i32
    %c0_i32_1 = arith.constant 0 : i32
    return %c0_i32, %c0_i32_0 : i32, i32
  }
  func.func @transform_4(%arg0: i32) -> (i32, i32) {
    %c0_i32 = arith.constant 0 : i32
    %c0_i32_0 = arith.constant 0 : i32
    %c0_i32_1 = arith.constant 0 : i32
    return %c0_i32, %c0_i32_0 : i32, i32
  }
  func.func @transform_5(%arg0: i32) -> (i32, i32) {
    %c0_i32 = arith.constant 0 : i32
    %c0_i32_0 = arith.constant 0 : i32
    %c0_i32_1 = arith.constant 0 : i32
    return %c0_i32, %c0_i32_0 : i32, i32
  }
  func.func @transform_6(%arg0: i32) -> (i32, i32) {
    %c0_i32 = arith.constant 0 : i32
    %c0_i32_0 = arith.constant 0 : i32
    %c0_i32_1 = arith.constant 0 : i32
    return %c0_i32, %c0_i32_0 : i32, i32
  }
  func.func @transform_7(%arg0: i32) -> (i32, i32) {
    %c0_i32 = arith.constant 0 : i32
    %c0_i32_0 = arith.constant 0 : i32
    %c0_i32_1 = arith.constant 0 : i32
    return %c0_i32, %c0_i32_0 : i32, i32
  }
  func.func @transform_8(%arg0: i32) -> (i32, i32) {
    %c0_i32 = arith.constant 0 : i32
    %c0_i32_0 = arith.constant 0 : i32
    %c0_i32_1 = arith.constant 0 : i32
    return %c0_i32, %c0_i32_0 : i32, i32
  }
  func.func @transform_9(%arg0: i32) -> (i32, i32) {
    %c0_i32 = arith.constant 0 : i32
    %c0_i32_0 = arith.constant 0 : i32
    %c0_i32_1 = arith.constant 0 : i32
    return %c0_i32, %c0_i32_0 : i32, i32
  }
  func.func @transform_10(%arg0: i32) -> (i32, i32) {
    %c0_i32 = arith.constant 0 : i32
    %c0_i32_0 = arith.constant 0 : i32
    %c0_i32_1 = arith.constant 0 : i32
    return %c0_i32, %c0_i32_0 : i32, i32
  }
  func.func @transform_11(%arg0: i32) -> (i32, i32) {
    %c0_i32 = arith.constant 0 : i32
    %c0_i32_0 = arith.constant 0 : i32
    return %arg0, %c0_i32 : i32, i32
  }
}

</mosaic_0001>

<bundles_post_ra>
// kernel: tpu_custom_call.1
= control target key start
LH: loop header
LB: loop body
LE: loop exit
PB: predicated region body
PF: predicated region fallthrough
CT: control target
= control target key end

     0   :  { %vm383_vm0 = vcmask 130048   ;;  %s3746_s30 = smov 64   ;;  %s5242_s0 = inlined_call_operand.vmem [shape: f32[128,128], index: 0, kind: input, shape index: {}]   ;;  %s5243_s1 = inlined_call_operand.vmem [shape: f32[128,16], index: 1, kind: input, shape index: {}]   ;;  %s5244_s2 = inlined_call_operand.vmem [shape: bf16[128,32], index: 2, kind: input, shape index: {}]   ;;  %s5245_s3 = inlined_call_operand.vmem [shape: f32[1,32], index: 3, kind: input, shape index: {}]   ;;  %s5246_s4 = inlined_call_operand.vmem [shape: bf16[16,32], index: 4, kind: input, shape index: {}]   ;;  %s5247_s5 = inlined_call_operand.vmem [shape: f32[1,32], index: 5, kind: input, shape index: {}]   ;;  %s5248_s6 = inlined_call_operand.vmem [shape: bf16[32,128], index: 6, kind: input, shape index: {}]   ;;  %s5249_s7 = inlined_call_operand.vmem [shape: bf16[32,128], index: 7, kind: input, shape index: {}]   ;;  %s5250_s8 = inlined_call_operand.vmem [shape: bf16[32,32], index: 8, kind: input, shape index: {}]   ;;  %s5251_s9 = inlined_call_operand.vmem [shape: f32[1,32], index: 9, kind: input, shape index: {}]   ;;  %s5252_s10 = inlined_call_operand.vmem [shape: bf16[32,128], index: 10, kind: input, shape index: {}]   ;;  %s5253_s11 = inlined_call_operand.hbm [shape: f32[128,128], index: 11, kind: output, shape index: {}]  }
   0x1   :  { %v3371_v0 = vld [vmem:[%s5246_s4] sm:$0xff]   ;;  %v57_v2 = vld [vmem:[%s5243_s1 + $0x8] sm:$0xff]  ;;  %v58_v3 = vld [vmem:[%s5243_s1 + $0x10] sm:$0xff] }
   0x2   :  { %v56_v1 = vld [vmem:[%s5243_s1] sm:$0xff]  ;;  %3095 = vmatprep.subr.bf16.mxu1 %v3371_v0  ;;  %v59_v5 = vld [vmem:[%s5243_s1 + $0x18] sm:$0xff]  ;;  %v61_v7 = vld [vmem:[%s5243_s1 + $0x28] sm:$0xff] }
   0x3   :  { %v360_v4 = vpack.c.bf16 %v57_v2, %v56_v1  ;;  %v60_v6 = vld [vmem:[%s5243_s1 + $0x20] sm:$0xff]  ;;  %3096 = vmatpush3.bf16.msra.mxu1 %v3371_v0  ;;  %v361_v8 = vpack.c.bf16 %v59_v5, %v58_v3  ;;  %v41_v11 = vld [vmem:[%s5242_s0 + $0x8] sm:$0xff]  ;;  %v3845_v12 = vld [vmem:[%s5242_s0 + $0x10] sm:$0xff] }
   0x4   :  { %v362_v9 = vpack.c.bf16 %v61_v7, %v60_v6  ;;  %v3836_v10 = vld [vmem:[%s5242_s0] sm:$0xff]  ;;  %v3850_v13 = vld [vmem:[%s5242_s0 + $0x18] sm:$0xff]  ;;  %v45_v16 = vld [vmem:[%s5242_s0 + $0x28] sm:$0xff] }
   0x5   :  { %3097 = vmatprep.mubr.msk.bf16.mxu1 %vm383_vm0, %v360_v4  ;;  %v3291_v14 = vpack.i.bf16 %v41_v11, %v3836_v10  ;;  %v44_v15 = vld [vmem:[%s5242_s0 + $0x20] sm:$0xff]  ;;  %v3862_v17 = vld [vmem:[%s5242_s0 + $0x30] sm:$0xff]  ;;  %v3868_v19 = vld [vmem:[%s5242_s0 + $0x38] sm:$0xff]  ;;  %v3296_v22 = vpack.i.bf16 %v3850_v13, %v3845_v12 }
   0x6   :  { %3098 = vmatmul.mubr.msk.bf16.vlgmr.msra.gmra.mxu1 %vm383_vm0, %v361_v8  ;;  %v3301_v18 = vpack.i.bf16 %v45_v16, %v44_v15  ;;  %v62_v20 = vld [vmem:[%s5243_s1 + $0x30] sm:$0xff]  ;;  %v63_v21 = vld [vmem:[%s5243_s1 + $0x38] sm:$0xff]  ;;  %v3372_v23 = vld [vmem:[%s5248_s6 + $0x8] sm:$0xff]   ;;  %v3306_v24 = vpack.i.bf16 %v3868_v19, %v3862_v17 }
   0x7   :  { %3101 = vmatprep.mubr.msk.bf16.mxu1 %vm383_vm0, %v362_v9  ;;  %3292 = vrot.lane.b32.xlu0 %v3291_v14, %s3746_s30  ;;  %v64_v25 = vld [vmem:[%s5243_s1 + $0x40] sm:$0xff]  ;;  %v65_v26 = vld [vmem:[%s5243_s1 + $0x48] sm:$0xff]  ;;  %v363_v27 = vpack.c.bf16 %v63_v21, %v62_v20  ;;  %v66_v30 = vld [vmem:[%s5243_s1 + $0x50] sm:$0xff] }
   0x8   :  { %3302 = vrot.lane.b32.xlu1 %v3301_v18, %s3746_s30  ;;  %3113 = vmatprep.subr.bf16.mxu1 %v3372_v23  ;;  %v3373_v28 = vld [vmem:[%s5248_s6] sm:$0xff]   ;;  %v364_v29 = vpack.c.bf16 %v65_v26, %v64_v25  ;;  %v67_v31 = vld [vmem:[%s5243_s1 + $0x58] sm:$0xff]  ;;  %v69_v33 = vld [vmem:[%s5243_s1 + $0x68] sm:$0xff] }
   0x9   :  { %3114 = vmatpush3.bf16.msra.mxu1 %v3372_v23  ;;  %v68_v32 = vld [vmem:[%s5243_s1 + $0x60] sm:$0xff]  ;;  %v365_v34 = vpack.c.bf16 %v67_v31, %v66_v30 }
   0xa   :  { %3115 = vmatprep.subr.bf16.mxu1 %v3373_v28  ;;  %v366_v35 = vpack.c.bf16 %v69_v33, %v68_v32 }
   0xb   :  { %3297 = vrot.lane.b32.xlu0 %v3296_v22, %s3746_s30 }
   0xc   :  { %3307 = vrot.lane.b32.xlu1 %v3306_v24, %s3746_s30 }
   0xd   :  { %3116 = vmatpush3.bf16.msra.mxu1 %v3373_v28 }
   0xe   :  { %3102 = vmatmul.mubr.msk.bf16.gmra.mxu1 %vm383_vm0, %v363_v27 }
   0xf   :  { %3105 = vmatprep.mubr.msk.bf16.mxu1 %vm383_vm0, %v364_v29 }
  0x10   :  { %16 = vsyncpa [#allocation3], 0  ;;  %v70_v36 = vld [vmem:[%s5243_s1 + $0x70] sm:$0xff]  ;;  %v71_v37 = vld [vmem:[%s5243_s1 + $0x78] sm:$0xff]  ;;  %s3747_s21 = smov 32   ;;  %vm553_vm1 = vcmask 261120  }
  0x11   :  { %v367_v38 = vpack.c.bf16 %v71_v37, %v70_v36  ;;  %v3374_v39 = vld [vmem:[%s5244_s2 + $0x38] sm:$0xff]   ;;  %v3375_v40 = vld [vmem:[%s5244_s2 + $0x30] sm:$0xff]   ;;  %v3376_v41 = vld [vmem:[%s5244_s2 + $0x28] sm:$0xff]   ;;  %vm1105_vm2 = vcmask 523264   ;;  %s3749_s12 = smov [#allocation2]  }
  0x12   :  { %3063 = vmatprep.subr.bf16.mxu0 %v3374_v39  ;;  %v3377_v46 = vld [vmem:[%s5244_s2 + $0x20] sm:$0xff]   ;;  %v3378_v58 = vld [vmem:[%s5244_s2 + $0x18] sm:$0xff]   ;;  %v3379_v3 = vld [vmem:[%s5244_s2 + $0x10] sm:$0xff]  }
  0x13   :  { %3064 = vmatpush3.bf16.msra.mxu0 %v3374_v39  ;;  %v3380_v5 = vld [vmem:[%s5244_s2 + $0x8] sm:$0xff]   ;;  %v3381_v6 = vld [vmem:[%s5244_s2] sm:$0xff]   ;;  %s3748_s2 = smov 96  }
  0x14   :  { %3065 = vmatprep.subr.bf16.mxu0 %v3375_v40  ;;  %v3980_v9 = vld [vmem:[%s5247_s5] ss:$0 sm:$0xff] }
  0x16   :  { %3106 = vmatmul.mubr.msk.bf16.gmra.mxu1 %vm383_vm0, %v365_v34 }
  0x17   :  { %3109 = vmatprep.mubr.msk.bf16.mxu1 %vm383_vm0, %v366_v35  ;;  %3066 = vmatpush3.bf16.msra.mxu0 %v3375_v40 }
  0x18   :  { %3067 = vmatprep.subr.bf16.mxu0 %v3376_v41 }
  0x1b   :  { %3068 = vmatpush3.bf16.msra.mxu0 %v3376_v41 }
  0x1c   :  { %3069 = vmatprep.subr.bf16.mxu0 %v3377_v46 }
  0x1e   :  { %3110 = vmatmul.mubr.msk.bf16.gmra.mxu1 %vm383_vm0, %v367_v38 }
  0x1f   :  { %3070 = vmatpush3.bf16.msra.mxu0 %v3377_v46 }
  0x20   :  { %3071 = vmatprep.subr.bf16.mxu0 %v3378_v58 }
  0x23   :  { %3072 = vmatpush3.bf16.msra.mxu0 %v3378_v58 }
  0x24   :  { %3073 = vmatprep.subr.bf16.mxu0 %v3379_v3 }
  0x27   :  { %3074 = vmatpush3.bf16.msra.mxu0 %v3379_v3 }
  0x28   :  { %3075 = vmatprep.subr.bf16.mxu0 %v3380_v5 }
  0x2b   :  { %3076 = vmatpush3.bf16.msra.mxu0 %v3380_v5 }
  0x2c   :  { %3077 = vmatprep.subr.bf16.mxu0 %v3381_v6 }
  0x2f   :  { %3078 = vmatpush3.bf16.msra.mxu0 %v3381_v6 }
  0x79   :  { %v3293_v42 = vpop.permute.xlu0 %3292 }
  0x7a   :  { %v3295_v43 = vunpack.i.h.bf16 %v3293_v42  ;;  %v3294_v44 = vunpack.i.l.bf16 %v3293_v42  ;;  %v3303_v45 = vpop.permute.xlu1 %3302 }
  0x7b   :  { %v3305_v47 = vunpack.i.h.bf16 %v3303_v45  ;;  %v3304_v48 = vunpack.i.l.bf16 %v3303_v45 }
  0x7c   :  { %v3932_v49 = vmax.f32 %v41_v11, %v3295_v43  ;;  %v3935_v50 = vmax.f32 %v3836_v10, %v3294_v44 }
  0x7d   :  { %v3298_v51 = vpop.permute.xlu0 %3297  ;;  %v3937_v52 = vmax.f32 %v45_v16, %v3305_v47  ;;  %v3939_v53 = vmax.f32 %v44_v15, %v3304_v48 }
  0x7e   :  { %v3300_v54 = vunpack.i.h.bf16 %v3298_v51  ;;  %v3299_v55 = vunpack.i.l.bf16 %v3298_v51  ;;  %v3311_v56 = vpack.i.bf16 %v3932_v49, %v3935_v50  ;;  %v3308_v57 = vpop.permute.xlu1 %3307 }
  0x7f   :  { %v3310_v59 = vunpack.i.h.bf16 %v3308_v57  ;;  %v3309_v60 = vunpack.i.l.bf16 %v3308_v57  ;;  %v3321_v63 = vpack.i.bf16 %v3937_v52, %v3939_v53 }
  0x80   :  { %v3947_v61 = vmax.f32 %v3850_v13, %v3300_v54  ;;  %v3950_v62 = vmax.f32 %v3845_v12, %v3299_v55  ;;  %3312 = vrot.lane.b32.xlu0 %v3311_v56, %s3747_s21 }
  0x81   :  { %v3956_v0 = vmax.f32 %v3868_v19, %v3310_v59  ;;  %v3959_v1 = vmax.f32 %v3862_v17, %v3309_v60 }
  0x82   :  { %v3316_v2 = vpack.i.bf16 %v3947_v61, %v3950_v62 }
  0x83   :  { %v3326_v4 = vpack.i.bf16 %v3956_v0, %v3959_v1 }
  0x84   :  { %3317 = vrot.lane.b32.xlu1 %v3316_v2, %s3747_s21  ;;  %3322 = vrot.lane.b32.xlu0 %v3321_v63, %s3747_s21 }
  0x88   :  { %3327 = vrot.lane.b32.xlu1 %v3326_v4, %s3747_s21 }
  0xc6   :  { %v3099_v7 = vpop.f32.mrf.mxu1 }
  0xc7   :  { %v451_v13 = vadd.f32 %v3099_v7, %v3980_v9 }
  0xc8   :  { %v442_v8 = vpop.f32.mrf.mxu1 }
  0xc9   :  { %v443_v11 = vadd.f32 %v3980_v9, %v442_v8  ;;  %v507_v20 = vmax.f32 %v451_v13, 0.0 }
  0xca   :  { %v3100_v10 = vpop.f32.mrf.mxu1 }
  0xcb   :  { %v454_v12 = vadd.f32 %v3100_v10, %v3980_v9  ;;  %v505_v18 = vmax.f32 %v443_v11, 0.0 }
  0xcc   :  { %v445_v14 = vpop.f32.mrf.mxu1 }
  0xcd   :  { %v446_v15 = vadd.f32 %v3980_v9, %v445_v14  ;;  %v508_v16 = vmax.f32 %v454_v12, 0.0 }
  0xce   :  { %v3103_v17 = vpop.f32.mrf.mxu1 }
  0xcf   :  { %v506_v19 = vmax.f32 %v446_v15, 0.0  ;;  %v467_v23 = vadd.f32 %v3103_v17, %v3980_v9  ;;  %v530_v24 = vpack.c.bf16 %v508_v16, %v507_v20 }
  0xd0   :  { %v458_v21 = vpop.f32.mrf.mxu1 }
  0xd1   :  { %v529_v22 = vpack.c.bf16 %v506_v19, %v505_v18  ;;  %v459_v26 = vadd.f32 %v3980_v9, %v458_v21  ;;  %v511_v29 = vmax.f32 %v467_v23, 0.0  ;;  %v558_v10 = vsel %vm553_vm1, %v530_v24, 0 }
  0xd2   :  { %v3104_v25 = vpop.f32.mrf.mxu1 }
  0xd3   :  { %v470_v27 = vadd.f32 %v3104_v25, %v3980_v9  ;;  %3117 = vmatprep.mubr.msk.bf16.mxu1 %vm553_vm1, %v529_v22  ;;  %v509_v33 = vmax.f32 %v459_v26, 0.0  ;;  %v555_v12 = vsel %vm553_vm1, %v529_v22, 0 }
  0xd4   :  { %v461_v28 = vpop.f32.mrf.mxu1  ;;  %3118 = vmatmul.mubr.msk.bf16.vlgmr.msra.gmra.mxu1 %vm553_vm1, %v530_v24 }
  0xd5   :  { %v512_v30 = vmax.f32 %v470_v27, 0.0  ;;  %v462_v31 = vadd.f32 %v3980_v9, %v461_v28 }
  0xd6   :  { %v3107_v32 = vpop.f32.mrf.mxu1 }
  0xd7   :  { %v532_v34 = vpack.c.bf16 %v512_v30, %v511_v29  ;;  %v510_v35 = vmax.f32 %v462_v31, 0.0  ;;  %v483_v36 = vadd.f32 %v3107_v32, %v3980_v9 }
  0xd8   :  { %v474_v37 = vpop.f32.mrf.mxu1 }
  0xd9   :  { %v531_v38 = vpack.c.bf16 %v510_v35, %v509_v33  ;;  %3277 = vmatprep.subr.msk.bf16.mxu1 %vm553_vm1, %v532_v34  ;;  %v564_v39 = vsel %vm553_vm1, %v532_v34, 0  ;;  %v475_v40 = vadd.f32 %v3980_v9, %v474_v37  ;;  %v515_v43 = vmax.f32 %v483_v36, 0.0 }
  0xda   :  { %3154 = vmatpush3.bf16.xpose.msra.mxu1 %v564_v39  ;;  %v3108_v41 = vpop.f32.mrf.mxu1 }
  0xdb   :  { %3121 = vmatprep.mubr.msk.bf16.mxu1 %vm553_vm1, %v531_v38  ;;  %3278 = vmatprep.subr.msk.bf16.mxu1 %vm553_vm1, %v531_v38  ;;  %v486_v42 = vadd.f32 %v3108_v41, %v3980_v9  ;;  %v513_v45 = vmax.f32 %v475_v40, 0.0  ;;  %v561_v57 = vsel %vm553_vm1, %v531_v38, 0  ;;  %v50_v40 = vld [vmem:[%s5242_s0 + $0x50] sm:$0xff]  ;;  %v51_v41 = vld [vmem:[%s5242_s0 + $0x58] sm:$0xff] }
  0xdc   :  { %3122 = vmatmul.mubr.msk.bf16.gmra.mxu1 %vm553_vm1, %v532_v34  ;;  %v477_v44 = vpop.f32.mrf.mxu1 }
  0xdd   :  { %v516_v46 = vmax.f32 %v486_v42, 0.0  ;;  %v478_v47 = vadd.f32 %v3980_v9, %v477_v44  ;;  %v48_v42 = vld [vmem:[%s5242_s0 + $0x40] sm:$0xff]  ;;  %v3336_v44 = vpack.i.bf16 %v51_v41, %v50_v40 }
  0xde   :  { %v3111_v48 = vpop.f32.mrf.mxu1 }
  0xdf   :  { %v514_v51 = vmax.f32 %v478_v47, 0.0  ;;  %v4001_v54 = vpack.c.bf16 %v516_v46, %v515_v43  ;;  %v499_v55 = vadd.f32 %v3111_v48, %v3980_v9  ;;  %v49_v43 = vld [vmem:[%s5242_s0 + $0x48] sm:$0xff]  ;;  %v55_v46 = vld [vmem:[%s5242_s0 + $0x78] sm:$0xff]  ;;  %v4073_v48 = vld [vmem:[%s5242_s0 + $0x60] sm:$0xff] }
  0xe0   :  { %v490_v56 = vpop.f32.mrf.mxu1  ;;  %v3331_v47 = vpack.i.bf16 %v49_v43, %v48_v42 }
  0xe1   :  { %5270 = vst [vmem:[#allocation5_spill] sm:$0xff] %v4001_v54  ;;  %v4005_v58 = vpack.c.bf16 %v514_v51, %v513_v45  ;;  %v491_v59 = vadd.f32 %v3980_v9, %v490_v56  ;;  %v519_v2 = vmax.f32 %v499_v55, 0.0  ;;  %v4064_v45 = vld [vmem:[%s5242_s0 + $0x70] sm:$0xff]  ;;  %v4078_v51 = vld [vmem:[%s5242_s0 + $0x68] sm:$0xff] }
  0xe2   :  { %3156 = vmatpush3.bf16.xpose.msra.mxu1 %v561_v57  ;;  %v3112_v60 = vpop.f32.mrf.mxu1  ;;  %v3346_v55 = vpack.i.bf16 %v55_v46, %v4064_v45  ;;  %v3341_v56 = vpack.i.bf16 %v4078_v51, %v4073_v48 }
  0xe3   :  { %5271 = vst [vmem:[#allocation6_spill] sm:$0xff] %v4005_v58  ;;  %3279 = vmatprep.subr.msk.bf16.mxu1 %vm553_vm1, %v530_v24  ;;  %v502_v63 = vadd.f32 %v3112_v60, %v3980_v9  ;;  %3125 = vmatprep.mubr.msk.bf16.mxu1 %vm553_vm1, %v4005_v58  ;;  %v517_v4 = vmax.f32 %v491_v59, 0.0 }
  0xe4   :  { %v493_v3 = vpop.f32.mrf.mxu1  ;;  %3126 = vmatmul.mubr.msk.bf16.gmra.mxu1 %vm553_vm1, %v4001_v54 }
  0xe5   :  { %v520_v5 = vmax.f32 %v502_v63, 0.0  ;;  %v494_v6 = vadd.f32 %v3980_v9, %v493_v3 }
  0xe7   :  { %v518_v7 = vmax.f32 %v494_v6, 0.0  ;;  %v4015_v8 = vpack.c.bf16 %v520_v5, %v519_v2 }
  0xe9   :  { %v4018_v11 = vpack.c.bf16 %v518_v7, %v517_v4 }
  0xea   :  { %3158 = vmatpush3.bf16.xpose.msra.mxu1 %v558_v10  ;;  %v3382_v10 = vld [vmem:[%s5249_s7 + $0x8] sm:$0xff]  }
  0xeb   :  { %5272 = vst [vmem:[#allocation7_spill] sm:$0xff] %v4018_v11  ;;  %3280 = vmatprep.subr.msk.bf16.mxu1 %vm553_vm1, %v529_v22  ;;  %3129 = vmatprep.mubr.msk.bf16.mxu1 %vm553_vm1, %v4018_v11 }
  0xec   :  { %3130 = vmatmul.mubr.msk.bf16.gmra.mxu1 %vm553_vm1, %v4015_v8  ;;  %3133 = vmatprep.subr.bf16.mxu0 %v3382_v10 }
  0xf2   :  { %3160 = vmatpush3.bf16.xpose.msra.mxu1 %v555_v12  ;;  %v3313_v9 = vpop.permute.xlu0 %3312 }
  0xf3   :  { %v3315_v13 = vunpack.i.h.bf16 %v3313_v9  ;;  %v3314_v14 = vunpack.i.l.bf16 %v3313_v9 }
  0xf5   :  { %v152_v15 = vmax.f32 %v3935_v50, %v3314_v14  ;;  %v153_v16 = vmax.f32 %v3932_v49, %v3315_v13 }
  0xf6   :  { %v3318_v17 = vpop.permute.xlu1 %3317  ;;  %v3323_v18 = vpop.permute.xlu0 %3322 }
  0xf7   :  { %v3320_v19 = vunpack.i.h.bf16 %v3318_v17  ;;  %v3319_v20 = vunpack.i.l.bf16 %v3318_v17  ;;  %v168_v21 = vpack.c.bf16 %v153_v16, %v152_v15  ;;  %v3325_v23 = vunpack.i.h.bf16 %v3323_v18 }
  0xf8   :  { %v3324_v24 = vunpack.i.l.bf16 %v3323_v18 }
  0xf9   :  { %v155_v25 = vmax.f32 %v3947_v61, %v3320_v19  ;;  %v154_v26 = vmax.f32 %v3950_v62, %v3319_v20  ;;  %3079 = vmatprep.mubr.bf16.mxu0 %v168_v21  ;;  %v157_v22 = vmax.f32 %v3937_v52, %v3325_v23 }
  0xfa   :  { %v156_v27 = vmax.f32 %v3939_v53, %v3324_v24  ;;  %v3328_v28 = vpop.permute.xlu1 %3327 }
  0xfb   :  { %v169_v50 = vpack.c.bf16 %v155_v25, %v154_v26  ;;  %v3330_v29 = vunpack.i.h.bf16 %v3328_v28  ;;  %v3329_v49 = vunpack.i.l.bf16 %v3328_v28 }
  0xfc   :  { %v170_v30 = vpack.c.bf16 %v157_v22, %v156_v27 }
  0xfd   :  { %3080 = vmatmul.mubr.bf16.vlgmr.msra.gmra.mxu0 %v169_v50  ;;  %v159_v31 = vmax.f32 %v3956_v0, %v3330_v29  ;;  %v158_v32 = vmax.f32 %v3959_v1, %v3329_v49 }
  0xfe   :  { %3083 = vmatprep.mubr.bf16.mxu0 %v170_v30  ;;  %3134 = vmatpush3.bf16.msra.mxu0 %v3382_v10  ;;  %v3383_v30 = vld [vmem:[%s5249_s7] sm:$0xff]  }
  0xff   :  { %v171_v33 = vpack.c.bf16 %v159_v31, %v158_v32  ;;  %3135 = vmatprep.subr.bf16.mxu0 %v3383_v30 }
 0x102   :  { %3136 = vmatpush3.bf16.msra.mxu0 %v3383_v30 }
 0x105   :  { %3084 = vmatmul.mubr.bf16.gmra.mxu0 %v171_v33 }
 0x194   :  { %v3119_v61 = vpop.f32.mrf.mxu1 }
 0x196   :  { %v612_v62 = vpop.f32.mrf.mxu1 }
 0x198   :  { %v3120_v34 = vpop.f32.mrf.mxu1 }
 0x199   :  { %v813_v35 = vpack.c.bf16 %v3120_v34, %v3119_v61 }
 0x19a   :  { %v615_v52 = vpop.f32.mrf.mxu1 }
 0x19b   :  { %v812_v36 = vpack.c.bf16 %v615_v52, %v612_v62  ;;  %834 = vrot.lane.b32.xlu1 %v813_v35, %s3748_s2 }
 0x19c   :  { %v3123_v53 = vpop.f32.mrf.mxu1 }
 0x19d   :  { %3161 = vmatprep.mubr.msk.bf16.mxu1 %vm553_vm1, %v812_v36  ;;  %832 = vrot.lane.b32.xlu0 %v812_v36, %s3748_s2 }
 0x19e   :  { %v628_v0 = vpop.f32.mrf.mxu1  ;;  %3162 = vmatmul.mubr.msk.bf16.vlgmr.msra.gmra.mxu1 %vm553_vm1, %v813_v35 }
 0x1a0   :  { %v3124_v1 = vpop.f32.mrf.mxu1 }
 0x1a1   :  { %v815_v37 = vpack.c.bf16 %v3124_v1, %v3123_v53 }
 0x1a2   :  { %v631_v38 = vpop.f32.mrf.mxu1 }
 0x1a3   :  { %v814_v39 = vpack.c.bf16 %v631_v38, %v628_v0  ;;  %838 = vrot.lane.b32.xlu1 %v815_v37, %s3748_s2 }
 0x1a4   :  { %v3127_v57 = vpop.f32.mrf.mxu1 }
 0x1a5   :  { %3165 = vmatprep.mubr.msk.bf16.mxu1 %vm553_vm1, %v814_v39  ;;  %836 = vrot.lane.b32.xlu0 %v814_v39, %s3748_s2 }
 0x1a6   :  { %3166 = vmatmul.mubr.msk.bf16.gmra.mxu1 %vm553_vm1, %v815_v37  ;;  %v644_v59 = vpop.f32.mrf.mxu1 }
 0x1a7   :  { %842 = vrot.lane.b32.xlu1 %v813_v35, %s3746_s30 }
 0x1a8   :  { %v3128_v60 = vpop.f32.mrf.mxu1 }
 0x1a9   :  { %840 = vrot.lane.b32.xlu0 %v812_v36, %s3746_s30  ;;  %v4087_v63 = vpack.c.bf16 %v3128_v60, %v3127_v57 }
 0x1aa   :  { %v647_v2 = vpop.f32.mrf.mxu1 }
 0x1ab   :  { %846 = vrot.lane.b32.xlu1 %v815_v37, %s3746_s30  ;;  %v4089_v3 = vpack.c.bf16 %v647_v2, %v644_v59 }
 0x1ac   :  { %v3131_v4 = vpop.f32.mrf.mxu1 }
 0x1ad   :  { %844 = vrot.lane.b32.xlu0 %v814_v39, %s3746_s30 }
 0x1ae   :  { %v4091_v5 = vpop.f32.mrf.mxu1 }
 0x1af   :  { %850 = vrot.lane.b32.xlu1 %v813_v35, %s3747_s21 }
 0x1b0   :  { %v3132_v6 = vpop.f32.mrf.mxu1 }
 0x1b1   :  { %848 = vrot.lane.b32.xlu0 %v812_v36, %s3747_s21  ;;  %v4093_v7 = vpack.c.bf16 %v3132_v6, %v3131_v4 }
 0x1b3   :  { %854 = vrot.lane.b32.xlu1 %v815_v37, %s3747_s21 }
 0x1b5   :  { %852 = vrot.lane.b32.xlu0 %v814_v39, %s3747_s21 }
 0x1b7   :  { %3337 = vrot.lane.b32.xlu1 %v3336_v44, %s3746_s30 }
 0x1b9   :  { %3332 = vrot.lane.b32.xlu0 %v3331_v47, %s3746_s30 }
 0x1bb   :  { %3347 = vrot.lane.b32.xlu1 %v3346_v55, %s3746_s30 }
 0x1bd   :  { %3342 = vrot.lane.b32.xlu0 %v3341_v56, %s3746_s30  ;;  %v3081_v6 = vpop.f32.mrf.mxu0 }
 0x1bf   :  { %v281_v10 = vpop.f32.mrf.mxu0 }
 0x20d   :  { %v835_v9 = vpop.permute.xlu1 %834 }
 0x20f   :  { %v833_v12 = vpop.permute.xlu0 %832 }
 0x210   :  { %3169 = vmatprep.mubr.msk.bf16.mxu1 %vm553_vm1, %v833_v12  ;;  %v3082_v12 = vpop.f32.mrf.mxu0 }
 0x211   :  { %3170 = vmatmul.mubr.msk.bf16.gmra.mxu1 %vm553_vm1, %v835_v9 }
 0x212   :  { %v284_v9 = vpop.f32.mrf.mxu0 }
 0x215   :  { %v839_v13 = vpop.permute.xlu1 %838 }
 0x217   :  { %v837_v14 = vpop.permute.xlu0 %836 }
 0x218   :  { %3173 = vmatprep.mubr.msk.bf16.mxu1 %vm553_vm1, %v837_v14 }
 0x219   :  { %v843_v15 = vpop.permute.xlu1 %842  ;;  %3174 = vmatmul.mubr.msk.bf16.gmra.mxu1 %vm553_vm1, %v839_v13 }
 0x21b   :  { %v841_v16 = vpop.permute.xlu0 %840 }
 0x21c   :  { %3177 = vmatprep.mubr.msk.bf16.mxu1 %vm553_vm1, %v841_v16 }
 0x21d   :  { %v847_v17 = vpop.permute.xlu1 %846 }
 0x21f   :  { %v845_v18 = vpop.permute.xlu0 %844 }
 0x221   :  { %v851_v19 = vpop.permute.xlu1 %850  ;;  %3178 = vmatmul.mubr.msk.bf16.gmra.mxu1 %vm553_vm1, %v843_v15 }
 0x222   :  { %3181 = vmatprep.mubr.msk.bf16.mxu1 %vm553_vm1, %v845_v18 }
 0x223   :  { %v849_v20 = vpop.permute.xlu0 %848 }
 0x225   :  { %v855_v21 = vpop.permute.xlu1 %854 }
 0x227   :  { %v853_v23 = vpop.permute.xlu0 %852 }
 0x229   :  { %v3338_v24 = vpop.permute.xlu1 %3337  ;;  %3182 = vmatmul.mubr.msk.bf16.gmra.mxu1 %vm553_vm1, %v847_v17  ;;  %v3085_v17 = vpop.f32.mrf.mxu0 }
 0x22a   :  { %v3340_v25 = vunpack.i.h.bf16 %v3338_v24  ;;  %v3339_v26 = vunpack.i.l.bf16 %v3338_v24  ;;  %3185 = vmatprep.mubr.msk.bf16.mxu1 %vm553_vm1, %v849_v20 }
 0x22b   :  { %v3333_v22 = vpop.permute.xlu0 %3332 }
 0x22c   :  { %v4107_v27 = vmax.f32 %v51_v41, %v3340_v25  ;;  %v4109_v28 = vmax.f32 %v50_v40, %v3339_v26  ;;  %v3335_v50 = vunpack.i.h.bf16 %v3333_v22  ;;  %v3334_v29 = vunpack.i.l.bf16 %v3333_v22  ;;  %v4138_v40 = vpop.f32.mrf.mxu1  ;;  %v4179_v22 = vld [vmem:[%s5245_s3] ss:$0 sm:$0xff] }
 0x22d   :  { %v3348_v49 = vpop.permute.xlu1 %3347 }
 0x22e   :  { %v4114_v31 = vmax.f32 %v49_v43, %v3335_v50  ;;  %v4116_v32 = vmax.f32 %v48_v42, %v3334_v29  ;;  %v3350_v33 = vunpack.i.h.bf16 %v3348_v49  ;;  %v3349_v61 = vunpack.i.l.bf16 %v3348_v49  ;;  %v297_v50 = vpop.f32.mrf.mxu0 }
 0x22f   :  { %v3343_v62 = vpop.permute.xlu0 %3342  ;;  %v3356_v34 = vpack.i.bf16 %v4107_v27, %v4109_v28 }
 0x230   :  { %v4120_v35 = vmax.f32 %v55_v46, %v3350_v33  ;;  %v4123_v52 = vmax.f32 %v4064_v45, %v3349_v61  ;;  %v3345_v36 = vunpack.i.h.bf16 %v3343_v62  ;;  %v3344_v53 = vunpack.i.l.bf16 %v3343_v62 }
 0x231   :  { %3357 = vrot.lane.b32.xlu1 %v3356_v34, %s3747_s21  ;;  %3186 = vmatmul.mubr.msk.bf16.gmra.mxu1 %vm553_vm1, %v851_v19  ;;  %v3351_v0 = vpack.i.bf16 %v4114_v31, %v4116_v32  ;;  %v3086_v34 = vpop.f32.mrf.mxu0 }
 0x232   :  { %v117_v1 = vmax.f32 %v4078_v51, %v3345_v36  ;;  %v116_v37 = vmax.f32 %v4073_v48, %v3344_v53  ;;  %3189 = vmatprep.mubr.msk.bf16.mxu1 %vm553_vm1, %v853_v23  ;;  %v3366_v38 = vpack.i.bf16 %v4120_v35, %v4123_v52 }
 0x233   :  { %3352 = vrot.lane.b32.xlu0 %v3351_v0, %s3747_s21 }
 0x234   :  { %v3361_v39 = vpack.i.bf16 %v117_v1, %v116_v37 }
 0x235   :  { %3367 = vrot.lane.b32.xlu1 %v3366_v38, %s3747_s21 }
 0x237   :  { %3362 = vrot.lane.b32.xlu0 %v3361_v39, %s3747_s21 }
 0x239   :  { %3190 = vmatmul.mubr.msk.bf16.gmra.mxu1 %vm553_vm1, %v855_v21 }
 0x25e   :  { %v4140_v41 = vpop.f32.mrf.mxu1 }
 0x25f   :  { %v1112_v42 = vsel %vm1105_vm2, %v4140_v41, -inf }
 0x260   :  { %v4144_v43 = vpop.f32.mrf.mxu1  ;;  %1113 = vmax.xlane.f32.xlu1 %v1112_v42  ;;  %v300_v42 = vpop.f32.mrf.mxu0 }
 0x261   :  { %v1106_v45 = vsel %vm1105_vm2, %v4144_v43, -inf }
 0x262   :  { %v4146_v44 = vpop.f32.mrf.mxu1 }
 0x263   :  { %v1115_v46 = vsel %vm1105_vm2, %v4146_v44, -inf }
 0x264   :  { %v4152_v47 = vpop.f32.mrf.mxu1  ;;  %1107 = vmax.xlane.f32.xlu1 %v1106_v45  ;;  %1116 = vmax.xlane.f32.xlu0 %v1115_v46 }
 0x265   :  { %v1109_v55 = vsel %vm1105_vm2, %v4152_v47, -inf }
 0x266   :  { %v4154_v48 = vpop.f32.mrf.mxu1 }
 0x267   :  { %v1124_v51 = vsel %vm1105_vm2, %v4154_v48, -inf }
 0x268   :  { %v4160_v56 = vpop.f32.mrf.mxu1  ;;  %1125 = vmax.xlane.f32.xlu1 %v1124_v51  ;;  %1110 = vmax.xlane.f32.xlu0 %v1109_v55  ;;  %v298_v51 = vadd.f32 %v4179_v22, %v297_v50  ;;  %v301_v55 = vadd.f32 %v4179_v22, %v300_v42 }
 0x269   :  { %v1118_v59 = vsel %vm1105_vm2, %v4160_v56, -inf }
 0x26a   :  { %v4162_v57 = vpop.f32.mrf.mxu1 }
 0x26b   :  { %v1127_v60 = vsel %vm1105_vm2, %v4162_v57, -inf }
 0x26c   :  { %v4168_v2 = vpop.f32.mrf.mxu1  ;;  %1119 = vmax.xlane.f32.xlu1 %v1118_v59  ;;  %1128 = vmax.xlane.f32.xlu0 %v1127_v60  ;;  %v349_v60 = vmax.f32 %v301_v55, 0.0 }
 0x26d   :  { %v1121_v4 = vsel %vm1105_vm2, %v4168_v2, -inf }
 0x270   :  { %1122 = vmax.xlane.f32.xlu0 %v1121_v4 }
 0x2a3   :  { %v3358_v13 = vpop.permute.xlu1 %3357 }
 0x2a4   :  { %v3360_v14 = vunpack.i.h.bf16 %v3358_v13  ;;  %v3359_v15 = vunpack.i.l.bf16 %v3358_v13 }
 0x2a5   :  { %v3353_v16 = vpop.permute.xlu0 %3352 }
 0x2a6   :  { %v3355_v18 = vunpack.i.h.bf16 %v3353_v16  ;;  %v3354_v19 = vunpack.i.l.bf16 %v3353_v16  ;;  %v163_v20 = vmax.f32 %v4107_v27, %v3360_v14  ;;  %v162_v21 = vmax.f32 %v4109_v28, %v3359_v15 }
 0x2a7   :  { %v3368_v25 = vpop.permute.xlu1 %3367 }
 0x2a8   :  { %v161_v23 = vmax.f32 %v4114_v31, %v3355_v18  ;;  %v160_v24 = vmax.f32 %v4116_v32, %v3354_v19  ;;  %v3370_v30 = vunpack.i.h.bf16 %v3368_v25  ;;  %v3369_v61 = vunpack.i.l.bf16 %v3368_v25 }
 0x2a9   :  { %v3363_v26 = vpop.permute.xlu0 %3362  ;;  %v173_v28 = vpack.c.bf16 %v163_v20, %v162_v21  ;;  %v282_v31 = vadd.f32 %v4179_v22, %v281_v10  ;;  %v285_v32 = vadd.f32 %v4179_v22, %v284_v9  ;;  %v306_v10 = vadd.f32 %v3085_v17, %v4179_v22 }
 0x2aa   :  { %v3365_v29 = vunpack.i.h.bf16 %v3363_v26  ;;  %v3364_v49 = vunpack.i.l.bf16 %v3363_v26  ;;  %v172_v33 = vpack.c.bf16 %v161_v23, %v160_v24  ;;  %v167_v53 = vmax.f32 %v4120_v35, %v3370_v30 }
 0x2ab   :  { %v166_v0 = vmax.f32 %v4123_v52, %v3369_v61  ;;  %v344_v38 = vmax.f32 %v282_v31, 0.0  ;;  %v345_v39 = vmax.f32 %v285_v32, 0.0  ;;  %v348_v52 = vmax.f32 %v298_v51, 0.0 }
 0x2ac   :  { %v165_v27 = vmax.f32 %v117_v1, %v3365_v29  ;;  %v164_v62 = vmax.f32 %v116_v37, %v3364_v49  ;;  %3087 = vmatprep.mubr.bf16.mxu0 %v172_v33  ;;  %v290_v1 = vadd.f32 %v3081_v6, %v4179_v22  ;;  %v293_v37 = vadd.f32 %v3082_v12, %v4179_v22 }
 0x2ad   :  { %3088 = vmatmul.mubr.bf16.gmra.mxu0 %v173_v28  ;;  %v175_v45 = vpack.c.bf16 %v167_v53, %v166_v0  ;;  %v521_v46 = vpack.c.bf16 %v345_v39, %v344_v38  ;;  %v309_v6 = vadd.f32 %v3086_v34, %v4179_v22  ;;  %v523_v9 = vpack.c.bf16 %v349_v60, %v348_v52 }
 0x2ae   :  { %v174_v36 = vpack.c.bf16 %v165_v27, %v164_v62  ;;  %v346_v35 = vmax.f32 %v290_v1, 0.0  ;;  %v347_v59 = vmax.f32 %v293_v37, 0.0  ;;  %v350_v12 = vmax.f32 %v306_v10, 0.0 }
 0x2af   :  { %v351_v13 = vmax.f32 %v309_v6, 0.0 }
 0x2b0   :  { %3091 = vmatprep.mubr.bf16.mxu0 %v174_v36  ;;  %v522_v4 = vpack.c.bf16 %v347_v59, %v346_v35 }
 0x2b1   :  { %v524_v14 = vpack.c.bf16 %v351_v13, %v350_v12 }
 0x2b5   :  { %3092 = vmatmul.mubr.bf16.gmra.mxu0 %v175_v45 }
 0x2b6   :  { %3137 = vmatprep.mubr.msk.bf16.mxu0 %vm553_vm1, %v521_v46 }
 0x2bd   :  { %3138 = vmatmul.mubr.msk.bf16.vlgmr.msra.gmra.mxu0 %vm553_vm1, %v522_v4 }
 0x2be   :  { %3141 = vmatprep.mubr.msk.bf16.mxu0 %vm553_vm1, %v523_v9 }
 0x2c5   :  { %3142 = vmatmul.mubr.msk.bf16.gmra.mxu0 %vm553_vm1, %v524_v14 }
 0x2d1   :  { %v4208_v46 = vpop.f32.mrf.mxu1 }
 0x2d3   :  { %v4215_v35 = vpop.f32.mrf.mxu1 }
 0x2d5   :  { %v4221_v4 = vpop.f32.mrf.mxu1 }
 0x2d7   :  { %v4229_v9 = vpop.f32.mrf.mxu1 }
 0x2d9   :  { %v4235_v12 = vpop.f32.mrf.mxu1 }
 0x2db   :  { %v4237_v13 = vpop.f32.mrf.mxu1 }
 0x2dd   :  { %v4239_v14 = vpop.f32.mrf.mxu1 }
 0x36d   :  { %v3089_v15 = vpop.f32.mrf.mxu0 }
 0x36e   :  { %v322_v17 = vadd.f32 %v3089_v15, %v4179_v22  ;;  %v4241_v15 = vpop.f32.mrf.mxu1 }
 0x36f   :  { %v313_v16 = vpop.f32.mrf.mxu0 }
 0x370   :  { %v314_v19 = vadd.f32 %v4179_v22, %v313_v16  ;;  %v354_v29 = vmax.f32 %v322_v17, 0.0  ;;  %v4243_v16 = vpop.f32.mrf.mxu1 }
 0x371   :  { %v3090_v18 = vpop.f32.mrf.mxu0 }
 0x372   :  { %v325_v20 = vadd.f32 %v3090_v18, %v4179_v22  ;;  %v352_v26 = vmax.f32 %v314_v19, 0.0  ;;  %v4245_v18 = vpop.f32.mrf.mxu1 }
 0x373   :  { %v316_v21 = vpop.f32.mrf.mxu0 }
 0x374   :  { %v317_v23 = vadd.f32 %v4179_v22, %v316_v21  ;;  %v355_v24 = vmax.f32 %v325_v20, 0.0  ;;  %v4247_v19 = vpop.f32.mrf.mxu1  ;;  %v1130_v20 = vsel %vm1105_vm2, %v4215_v35, -inf  ;;  %v1139_v21 = vsel %vm1105_vm2, %v4221_v4, -inf }
 0x375   :  { %v3093_v25 = vpop.f32.mrf.mxu0 }
 0x376   :  { %v353_v50 = vmax.f32 %v317_v23, 0.0  ;;  %v526_v33 = vpack.c.bf16 %v355_v24, %v354_v29  ;;  %v338_v28 = vadd.f32 %v3093_v25, %v4179_v22  ;;  %v4251_v17 = vpop.f32.mrf.mxu1  ;;  %v1136_v24 = vsel %vm1105_vm2, %v4208_v46, -inf }
 0x377   :  { %v329_v49 = vpop.f32.mrf.mxu0  ;;  %v1133_v25 = vsel %vm1105_vm2, %v4229_v9, -inf  ;;  %v1151_v29 = vsel %vm1105_vm2, %v4239_v14, -inf }
 0x378   :  { %v525_v30 = vpack.c.bf16 %v353_v50, %v352_v26  ;;  %v330_v27 = vadd.f32 %v4179_v22, %v329_v49  ;;  %v358_v38 = vmax.f32 %v338_v28, 0.0  ;;  %v4255_v23 = vpop.f32.mrf.mxu1  ;;  %v1148_v50 = vsel %vm1105_vm2, %v4235_v12, -inf }
 0x379   :  { %v3094_v61 = vpop.f32.mrf.mxu0 }
 0x37a   :  { %v341_v62 = vadd.f32 %v3094_v61, %v4179_v22  ;;  %3145 = vmatprep.mubr.msk.bf16.mxu0 %vm553_vm1, %v525_v30  ;;  %v356_v53 = vmax.f32 %v330_v27, 0.0  ;;  %v4261_v26 = vpop.f32.mrf.mxu1  ;;  %v1142_v30 = vsel %vm1105_vm2, %v4237_v13, -inf  ;;  %v1145_v61 = vsel %vm1105_vm2, %v4241_v15, -inf }
 0x37b   :  { %v332_v31 = vpop.f32.mrf.mxu0  ;;  %3146 = vmatmul.mubr.msk.bf16.gmra.mxu0 %vm553_vm1, %v526_v33  ;;  %v1114_v33 = vpop.xlane.xlu1 %1113 }
 0x37c   :  { %v333_v32 = vadd.f32 %v4179_v22, %v332_v31  ;;  %v359_v34 = vmax.f32 %v341_v62, 0.0  ;;  %v4267_v49 = vpop.f32.mrf.mxu1  ;;  %v1160_v62 = vsel %vm1105_vm2, %v4243_v16, -inf  ;;  %v1204_v28 = vsub.f32 %v4140_v41, %v1114_v33 }
 0x37d   :  { %v3139_v36 = vpop.f32.mrf.mxu0  ;;  %v1163_v31 = vsel %vm1105_vm2, %v4247_v19, -inf  ;;  %v1172_v41 = vsel %vm1105_vm2, %v4255_v23, -inf }
 0x37e   :  { %v357_v0 = vmax.f32 %v333_v32, 0.0  ;;  %v528_v1 = vpack.c.bf16 %v359_v34, %v358_v38  ;;  %v4273_v27 = vpop.f32.mrf.mxu1  ;;  %v1154_v34 = vsel %vm1105_vm2, %v4245_v18, -inf }
 0x37f   :  { %v749_v39 = vpop.f32.mrf.mxu0 }
 0x380   :  { %v527_v42 = vpack.c.bf16 %v357_v0, %v356_v53  ;;  %v4280_v32 = vpop.f32.mrf.mxu1  ;;  %v1238_v53 = vmul.f32 1.442695, %v1204_v28  ;;  %v1157_v0 = vsel %vm1105_vm2, %v4251_v17, -inf }
 0x381   :  { %v3140_v37 = vpop.f32.mrf.mxu0 }
 0x382   :  { %v4205_v45 = vpack.c.bf16 %v3140_v37, %v3139_v36  ;;  %3149 = vmatprep.mubr.msk.bf16.mxu0 %vm553_vm1, %v527_v42  ;;  %v1108_v36 = vpop.xlane.xlu1 %1107  ;;  %3388 = vpow2.f32 %v1238_v53  ;;  %v1175_v42 = vsel %vm1105_vm2, %v4267_v49, -inf }
 0x383   :  { %v752_v51 = vpop.f32.mrf.mxu0  ;;  %3150 = vmatmul.mubr.msk.bf16.gmra.mxu0 %vm553_vm1, %v528_v1  ;;  %v1202_v38 = vsub.f32 %v4144_v43, %v1108_v36  ;;  %v1169_v43 = vsel %vm1105_vm2, %v4273_v27, -inf  ;;  %v1117_v36 = vpop.xlane.xlu0 %1116 }
 0x384   :  { %v4211_v55 = vpack.c.bf16 %v752_v51, %v749_v39  ;;  %886 = vrot.lane.b32.xlu1 %v4205_v45, %s3747_s21  ;;  %v4287_v39 = vpop.f32.mrf.mxu1  ;;  %v1166_v51 = vsel %vm1105_vm2, %v4261_v26, -inf }
 0x385   :  { %v3143_v22 = vpop.f32.mrf.mxu0  ;;  %v1234_v1 = vmul.f32 1.442695, %v1202_v38 }
 0x386   :  { %v4293_v37 = vpop.f32.mrf.mxu1  ;;  %v4333_v53 = vpop.xlane.xlu1 %1125 }
 0x387   :  { %v765_v59 = vpop.f32.mrf.mxu0  ;;  %3390 = vpow2.f32 %v1234_v1 }
 0x388   :  { %862 = vrot.lane.b32.xlu1 %v4205_v45, %s3748_s2 }
 0x389   :  { %v3144_v52 = vpop.f32.mrf.mxu0 }
 0x38a   :  { %v4219_v60 = vpack.c.bf16 %v3144_v52, %v3143_v22  ;;  %v4299_v22 = vpop.f32.mrf.mxu1  ;;  %v1178_v52 = vsel %vm1105_vm2, %v4287_v39, -inf  ;;  %v1120_v38 = vpop.xlane.xlu1 %1119 }
 0x38b   :  { %v768_v10 = vpop.f32.mrf.mxu0 }
 0x38c   :  { %866 = vrot.lane.b32.xlu0 %v4219_v60, %s3748_s2  ;;  %890 = vrot.lane.b32.xlu1 %v4219_v60, %s3747_s21  ;;  %v4227_v6 = vpack.c.bf16 %v768_v10, %v765_v59  ;;  %v1184_v59 = vsel %vm1105_vm2, %v4280_v32, -inf  ;;  %v4305_v10 = vpop.f32.mrf.mxu1 }
 0x390   :  { %864 = vrot.lane.b32.xlu0 %v4227_v6, %s3748_s2  ;;  %888 = vrot.lane.b32.xlu1 %v4227_v6, %s3747_s21 }
 0x3af   :  { %1131 = vmax.xlane.f32.xlu0 %v1130_v20  ;;  %v1181_v20 = vsel %vm1105_vm2, %v4299_v22, -inf }
 0x3b3   :  { %1140 = vmax.xlane.f32.xlu0 %v1139_v21  ;;  %v1187_v21 = vsel %vm1105_vm2, %v4293_v37, -inf }
 0x3b4   :  { %1137 = vmax.xlane.f32.xlu1 %v1136_v24  ;;  %v4311_v24 = vpop.eup %3388 }
 0x3b5   :  { %5273 = vst [vmem:[#allocation8_spill] sm:$0xff] %v4311_v24 }
 0x3b7   :  { %1134 = vmax.xlane.f32.xlu0 %v1133_v25  ;;  %v4313_v25 = vpop.f32.mrf.mxu1 }
 0x3b8   :  { %1149 = vmax.xlane.f32.xlu1 %v1148_v50  ;;  %v1196_v50 = vsel %vm1105_vm2, %v4305_v10, -inf  ;;  %v1190_v33 = vsel %vm1105_vm2, %v4313_v25, -inf }
 0x3bb   :  { %1152 = vmax.xlane.f32.xlu0 %v1151_v29  ;;  %v1304_v29 = vsel %vm1105_vm2, %v4311_v24, 0.0 }
 0x3bc   :  { %1143 = vmax.xlane.f32.xlu1 %v1142_v30  ;;  %v4319_v30 = vpop.f32.mrf.mxu1 }
 0x3be   :  { %v4327_v28 = vpop.f32.mrf.mxu1 }
 0x3bf   :  { %1146 = vmax.xlane.f32.xlu0 %v1145_v61  ;;  %v4323_v61 = vpop.eup %3390 }
 0x3c0   :  { %1161 = vmax.xlane.f32.xlu1 %v1160_v62  ;;  %v1199_v62 = vsel %vm1105_vm2, %v4319_v30, -inf }
 0x3c3   :  { %1164 = vmax.xlane.f32.xlu0 %v1163_v31  ;;  %v1298_v31 = vsel %vm1105_vm2, %v4323_v61, 0.0 }
 0x3c4   :  { %1155 = vmax.xlane.f32.xlu1 %v1154_v34  ;;  %v1193_v34 = vsel %vm1105_vm2, %v4327_v28, -inf }
 0x3c7   :  { %1158 = vmax.xlane.f32.xlu0 %v1157_v0  ;;  %v1111_v0 = vpop.xlane.xlu0 %1110 }
 0x3c8   :  { %1173 = vmax.xlane.f32.xlu1 %v1172_v41 }
 0x3cb   :  { %1176 = vmax.xlane.f32.xlu0 %v1175_v42  ;;  %v4337_v41 = vpop.xlane.xlu0 %1128 }
 0x3cc   :  { %1167 = vmax.xlane.f32.xlu1 %v1166_v51 }
 0x3cf   :  { %1170 = vmax.xlane.f32.xlu0 %v1169_v43  ;;  %v1123_v1 = vpop.xlane.xlu0 %1122 }
 0x3d0   :  { %1185 = vmax.xlane.f32.xlu1 %v1184_v59 }
 0x3d3   :  { %1179 = vmax.xlane.f32.xlu0 %v1178_v52  ;;  %v1205_v52 = vsub.f32 %v4146_v44, %v1117_v36 }
 0x3d4   :  { %1182 = vmax.xlane.f32.xlu1 %v1181_v20  ;;  %v1206_v20 = vsub.f32 %v4160_v56, %v1120_v38 }
 0x3d7   :  { %1188 = vmax.xlane.f32.xlu0 %v1187_v21 }
 0x3d8   :  { %1197 = vmax.xlane.f32.xlu1 %v1196_v50 }
 0x3db   :  { %1305 = vadd.xlane.f32.xlu0 %v1304_v29  ;;  %v1240_v29 = vmul.f32 1.442695, %v1205_v52 }
 0x3dc   :  { %1191 = vmax.xlane.f32.xlu1 %v1190_v33  ;;  %v1203_v33 = vsub.f32 %v4152_v47, %v1111_v0 }
 0x3dd   :  { %3392 = vpow2.f32 %v1240_v29 }
 0x3df   :  { %1200 = vmax.xlane.f32.xlu0 %v1199_v62  ;;  %v1242_v62 = vmul.f32 1.442695, %v1206_v20 }
 0x3e0   :  { %1299 = vadd.xlane.f32.xlu1 %v1298_v31  ;;  %v1207_v31 = vsub.f32 %v4168_v2, %v1123_v1 }
 0x3e1   :  { %3394 = vpow2.f32 %v1242_v62 }
 0x3e2   :  { %v1244_v58 = vmul.f32 1.442695, %v1207_v31 }
 0x3e3   :  { %1194 = vmax.xlane.f32.xlu0 %v1193_v34  ;;  %v1236_v34 = vmul.f32 1.442695, %v1203_v33 }
 0x3e5   :  { %3396 = vpow2.f32 %v1236_v34 }
 0x3e6   :  { %3398 = vpow2.f32 %v1244_v58 }
 0x3ea   :  { %v4347_v44 = vpop.eup %3392 }
 0x3eb   :  { %v1307_v47 = vsel %vm1105_vm2, %v4347_v44, 0.0 }
 0x3ee   :  { %v4349_v56 = vpop.eup %3394 }
 0x3ef   :  { %5274 = vst [vmem:[#allocation9_spill] sm:$0xff] %v4349_v56  ;;  %v1310_v2 = vsel %vm1105_vm2, %v4349_v56, 0.0 }
 0x3f1   :  { %860 = vrot.lane.b32.xlu1 %v4211_v55, %s3748_s2 }
 0x3f2   :  { %v4353_v36 = vpop.eup %3396 }
 0x3f3   :  { %v4357_v0 = vpop.eup %3398  ;;  %v1301_v38 = vsel %vm1105_vm2, %v4353_v36, 0.0 }
 0x3f4   :  { %5275 = vst [vmem:[#allocation10_spill] sm:$0xff] %v4357_v0  ;;  %v1313_v58 = vsel %vm1105_vm2, %v4357_v0, 0.0 }
 0x3f5   :  { %878 = vrot.lane.b32.xlu1 %v4219_v60, %s3746_s30 }
 0x3f6   :  { %v887_v42 = vpop.permute.xlu1 %886 }
 0x3f9   :  { %884 = vrot.lane.b32.xlu0 %v4211_v55, %s3747_s21 }
 0x3fa   :  { %v863_v51 = vpop.permute.xlu1 %862 }
 0x3fe   :  { %v867_v43 = vpop.permute.xlu0 %866  ;;  %v891_v59 = vpop.permute.xlu1 %890 }
 0x3ff   :  { %2943 = vmatprep.subr.bf16.mxu0 %v891_v59 }
 0x400   :  { %2944 = vmatpush3.bf16.msra.mxu0 %v867_v43 }
 0x402   :  { %v865_v21 = vpop.permute.xlu0 %864  ;;  %v889_v50 = vpop.permute.xlu1 %888 }
 0x403   :  { %2945 = vmatprep.subr.bf16.mxu0 %v889_v50 }
 0x404   :  { %2946 = vmatpush3.bf16.msra.mxu0 %v865_v21 }
 0x405   :  { %2947 = vmatprep.subr.bf16.mxu0 %v887_v42 }
 0x408   :  { %2948 = vmatpush3.bf16.msra.mxu0 %v863_v51 }
 0x418   :  { %1308 = vadd.xlane.f32.xlu0 %v1307_v47 }
 0x419   :  { %1311 = vadd.xlane.f32.xlu1 %v1310_v2 }
 0x41c   :  { %1302 = vadd.xlane.f32.xlu0 %v1301_v38 }
 0x41d   :  { %1314 = vadd.xlane.f32.xlu1 %v1313_v58 }
 0x438   :  { %v1132_v42 = vpop.xlane.xlu0 %1131 }
 0x439   :  { %v1210_v51 = vsub.f32 %v4215_v35, %v1132_v42 }
 0x43b   :  { %v4363_v1 = vpop.f32.mrf.mxu0  ;;  %v1250_v33 = vmul.f32 1.442695, %v1210_v51 }
 0x43c   :  { %v1141_v43 = vpop.xlane.xlu0 %1140 }
 0x43d   :  { %v1213_v59 = vsub.f32 %v4221_v4, %v1141_v43  ;;  %v1138_v52 = vpop.xlane.xlu1 %1137  ;;  %v781_v20 = vpop.f32.mrf.mxu0 }
 0x43e   :  { %v1212_v21 = vsub.f32 %v4208_v46, %v1138_v52 }
 0x43f   :  { %v1256_v50 = vmul.f32 1.442695, %v1213_v59  ;;  %v4368_v29 = vpop.f32.mrf.mxu0 }
 0x440   :  { %v1254_v62 = vmul.f32 1.442695, %v1212_v21  ;;  %v1135_v31 = vpop.xlane.xlu0 %1134 }
 0x441   :  { %3400 = vpow2.f32 %v1256_v50  ;;  %v1211_v34 = vsub.f32 %v4229_v9, %v1135_v31  ;;  %v1150_v47 = vpop.xlane.xlu1 %1149  ;;  %v784_v2 = vpop.f32.mrf.mxu0 }
 0x442   :  { %3402 = vpow2.f32 %v1254_v62  ;;  %v1216_v35 = vsub.f32 %v4235_v12, %v1150_v47  ;;  %v4372_v38 = vpack.c.bf16 %v784_v2, %v781_v20 }
 0x443   :  { %v1252_v4 = vmul.f32 1.442695, %v1211_v34  ;;  %3404 = vpow2.f32 %v1250_v33 }
 0x444   :  { %5276 = vst [vmem:[#allocation11_spill] sm:$0xff] %v4372_v38  ;;  %v1262_v58 = vmul.f32 1.442695, %v1216_v35  ;;  %v1153_v46 = vpop.xlane.xlu0 %1152 }
 0x445   :  { %3406 = vpow2.f32 %v1252_v4  ;;  %v1217_v42 = vsub.f32 %v4239_v14, %v1153_v46  ;;  %v1144_v51 = vpop.xlane.xlu1 %1143 }
 0x446   :  { %v1214_v43 = vsub.f32 %v4237_v13, %v1144_v51  ;;  %3408 = vpow2.f32 %v1262_v58 }
 0x447   :  { %v1264_v59 = vmul.f32 1.442695, %v1217_v42 }
 0x448   :  { %v1258_v9 = vmul.f32 1.442695, %v1214_v43  ;;  %v1147_v52 = vpop.xlane.xlu0 %1146 }
 0x449   :  { %3410 = vpow2.f32 %v1264_v59  ;;  %v1215_v21 = vsub.f32 %v4241_v15, %v1147_v52  ;;  %v1162_v12 = vpop.xlane.xlu1 %1161 }
 0x44a   :  { %v1220_v20 = vsub.f32 %v4243_v16, %v1162_v12  ;;  %3412 = vpow2.f32 %v1258_v9 }
 0x44b   :  { %v1260_v50 = vmul.f32 1.442695, %v1215_v21 }
 0x44c   :  { %v1270_v33 = vmul.f32 1.442695, %v1220_v20  ;;  %v1165_v62 = vpop.xlane.xlu0 %1164 }
 0x44d   :  { %3414 = vpow2.f32 %v1260_v50  ;;  %v1221_v14 = vsub.f32 %v4247_v19, %v1165_v62  ;;  %v1156_v31 = vpop.xlane.xlu1 %1155 }
 0x44e   :  { %v4379_v34 = vpop.eup %3400  ;;  %v1218_v13 = vsub.f32 %v4245_v18, %v1156_v31  ;;  %3416 = vpow2.f32 %v1270_v33 }
 0x44f   :  { %v4382_v47 = vpop.eup %3402  ;;  %v1331_v15 = vsel %vm1105_vm2, %v4379_v34, 0.0  ;;  %v1272_v2 = vmul.f32 1.442695, %v1221_v14 }
 0x450   :  { %v1266_v16 = vmul.f32 1.442695, %v1218_v13  ;;  %1332 = vadd.xlane.f32.xlu0 %v1331_v15  ;;  %v1159_v35 = vpop.xlane.xlu0 %1158  ;;  %v1328_v4 = vsel %vm1105_vm2, %v4382_v47, 0.0  ;;  %v4388_v58 = vpop.eup %3404 }
 0x451   :  { %v1219_v19 = vsub.f32 %v4251_v17, %v1159_v35  ;;  %1329 = vadd.xlane.f32.xlu1 %v1328_v4  ;;  %v4391_v46 = vpop.xlane.xlu1 %1173  ;;  %v1322_v59 = vsel %vm1105_vm2, %v4388_v58, 0.0 }
 0x452   :  { %v4393_v18 = vpop.eup %3406  ;;  %3418 = vpow2.f32 %v1266_v16 }
 0x453   :  { %v1325_v42 = vsel %vm1105_vm2, %v4393_v18, 0.0  ;;  %3420 = vpow2.f32 %v1272_v2  ;;  %v1268_v51 = vmul.f32 1.442695, %v1219_v19  ;;  %v4401_v9 = vpop.eup %3408 }
 0x454   :  { %1326 = vadd.xlane.f32.xlu0 %v1325_v42  ;;  %v4397_v43 = vpop.xlane.xlu0 %1176  ;;  %v1340_v33 = vsel %vm1105_vm2, %v4401_v9, 0.0 }
 0x455   :  { %1323 = vadd.xlane.f32.xlu1 %v1322_v59  ;;  %v1168_v17 = vpop.xlane.xlu1 %1167  ;;  %3422 = vpow2.f32 %v1268_v51 }
 0x456   :  { %v4403_v52 = vpop.eup %3410  ;;  %v1222_v21 = vsub.f32 %v4261_v26, %v1168_v17 }
 0x457   :  { %v1343_v12 = vsel %vm1105_vm2, %v4403_v52, 0.0  ;;  %v4410_v62 = vpop.eup %3412 }
 0x458   :  { %v1274_v20 = vmul.f32 1.442695, %v1222_v21  ;;  %1344 = vadd.xlane.f32.xlu0 %v1343_v12  ;;  %v1171_v50 = vpop.xlane.xlu0 %1170  ;;  %v1334_v4 = vsel %vm1105_vm2, %v4410_v62, 0.0 }
 0x459   :  { %v1223_v14 = vsub.f32 %v4273_v27, %v1171_v50  ;;  %1341 = vadd.xlane.f32.xlu1 %v1340_v33  ;;  %v1186_v31 = vpop.xlane.xlu1 %1185 }
 0x45a   :  { %v4413_v13 = vpop.eup %3414  ;;  %3424 = vpow2.f32 %v1274_v20  ;;  %v1228_v26 = vsub.f32 %v4280_v32, %v1186_v31 }
 0x45b   :  { %v1276_v15 = vmul.f32 1.442695, %v1223_v14  ;;  %v1337_v2 = vsel %vm1105_vm2, %v4413_v13, 0.0  ;;  %v4420_v19 = vpop.eup %3416 }
 0x45c   :  { %v1286_v16 = vmul.f32 1.442695, %v1228_v26  ;;  %1338 = vadd.xlane.f32.xlu0 %v1337_v2  ;;  %v1180_v35 = vpop.xlane.xlu0 %1179  ;;  %v1352_v21 = vsel %vm1105_vm2, %v4420_v19, 0.0 }
 0x45d   :  { %3426 = vpow2.f32 %v1276_v15  ;;  %v1226_v27 = vsub.f32 %v4287_v39, %v1180_v35  ;;  %1335 = vadd.xlane.f32.xlu1 %v1334_v4  ;;  %v1183_v42 = vpop.xlane.xlu1 %1182 }
 0x45e   :  { %3428 = vpow2.f32 %v1286_v16  ;;  %v1227_v59 = vsub.f32 %v4299_v22, %v1183_v42 }
 0x45f   :  { %v4423_v51 = vpop.eup %3418  ;;  %v1282_v32 = vmul.f32 1.442695, %v1226_v27 }
 0x460   :  { %v1189_v17 = vpop.xlane.xlu0 %1188  ;;  %v1346_v12 = vsel %vm1105_vm2, %v4423_v51, 0.0  ;;  %v4430_v20 = vpop.eup %3420  ;;  %v1284_v14 = vmul.f32 1.442695, %v1227_v59 }
 0x461   :  { %3430 = vpow2.f32 %v1282_v32  ;;  %v1229_v39 = vsub.f32 %v4293_v37, %v1189_v17  ;;  %1353 = vadd.xlane.f32.xlu1 %v1352_v21  ;;  %1347 = vadd.xlane.f32.xlu0 %v1346_v12  ;;  %v1198_v50 = vpop.xlane.xlu1 %1197  ;;  %v1355_v15 = vsel %vm1105_vm2, %v4430_v20, 0.0 }
 0x462   :  { %v1232_v33 = vsub.f32 %v4305_v10, %v1198_v50  ;;  %v4438_v2 = vpop.eup %3422 }
 0x463   :  { %v1288_v31 = vmul.f32 1.442695, %v1229_v39  ;;  %v1349_v27 = vsel %vm1105_vm2, %v4438_v2, 0.0 }
 0x464   :  { %v1294_v22 = vmul.f32 1.442695, %v1232_v33  ;;  %v4434_v26 = vpop.xlane.xlu0 %1305 }
 0x465   :  { %3432 = vpow2.f32 %v1288_v31  ;;  %1356 = vadd.xlane.f32.xlu0 %v1355_v15  ;;  %v1192_v16 = vpop.xlane.xlu1 %1191 }
 0x466   :  { %3434 = vpow2.f32 %v1294_v22  ;;  %v1230_v37 = vsub.f32 %v4313_v25, %v1192_v16 }
 0x467   :  { %v4441_v35 = vpop.eup %3424  ;;  %3436 = vpow2.f32 %v1284_v14 }
 0x468   :  { %5277 = vst [vmem:[#allocation12_spill] sm:$0xff] %v4441_v35  ;;  %v1290_v10 = vmul.f32 1.442695, %v1230_v37  ;;  %v1201_v4 = vpop.xlane.xlu0 %1200  ;;  %v1358_v42 = vsel %vm1105_vm2, %v4441_v35, 0.0 }
 0x469   :  { %v1233_v32 = vsub.f32 %v4319_v30, %v1201_v4  ;;  %1350 = vadd.xlane.f32.xlu0 %v1349_v27  ;;  %1359 = vadd.xlane.f32.xlu1 %v1358_v42  ;;  %v4448_v59 = vpop.xlane.xlu1 %1299 }
 0x46a   :  { %v4450_v17 = vpop.eup %3426  ;;  %3438 = vpow2.f32 %v1290_v10 }
 0x46b   :  { %5278 = vst [vmem:[#allocation13_spill] sm:$0xff] %v4450_v17  ;;  %v4452_v25 = vpop.eup %3428  ;;  %v1296_v21 = vmul.f32 1.442695, %v1233_v32  ;;  %v1361_v12 = vsel %vm1105_vm2, %v4450_v17, 0.0 }
 0x46c   :  { %v1195_v39 = vpop.xlane.xlu0 %1194  ;;  %v1376_v50 = vsel %vm1105_vm2, %v4452_v25, 0.0 }
 0x46d   :  { %3440 = vpow2.f32 %v1296_v21  ;;  %v1231_v30 = vsub.f32 %v4327_v28, %v1195_v39  ;;  %1362 = vadd.xlane.f32.xlu0 %v1361_v12  ;;  %1377 = vadd.xlane.f32.xlu1 %v1376_v50  ;;  %v861_v33 = vpop.permute.xlu1 %860 }
 0x46e   :  { %v4459_v14 = vpop.eup %3430 }
 0x46f   :  { %v1292_v31 = vmul.f32 1.442695, %v1231_v30  ;;  %v1370_v22 = vsel %vm1105_vm2, %v4459_v14, 0.0  ;;  %v1224_v30 = vsub.f32 %v4255_v23, %v4391_v46 }
 0x470   :  { %v885_v15 = vpop.permute.xlu0 %884 }
 0x471   :  { %3442 = vpow2.f32 %v1292_v31  ;;  %2949 = vmatprep.subr.bf16.mxu0 %v885_v15  ;;  %1371 = vadd.xlane.f32.xlu1 %v1370_v22  ;;  %v879_v16 = vpop.permute.xlu1 %878  ;;  %v1278_v31 = vmul.f32 1.442695, %v1224_v30  ;;  %v1225_v22 = vsub.f32 %v4267_v49, %v4397_v43 }
 0x472   :  { %v4463_v37 = vpop.eup %3432  ;;  %2950 = vmatpush3.bf16.msra.mxu0 %v861_v33  ;;  %v1209_v33 = vsub.f32 %v4162_v57, %v4337_v41 }
 0x473   :  { %v4465_v10 = vpop.eup %3434  ;;  %2951 = vmatprep.subr.bf16.mxu0 %v879_v16  ;;  %v1379_v28 = vsel %vm1105_vm2, %v4463_v37, 0.0  ;;  %3444 = vpow2.f32 %v1278_v31  ;;  %v1208_v16 = vsub.f32 %v4154_v48, %v4333_v53 }
 0x474   :  { %v4469_v4 = vpop.eup %3436  ;;  %1380 = vadd.xlane.f32.xlu0 %v1379_v28  ;;  %v1388_v27 = vsel %vm1105_vm2, %v4465_v10, 0.0  ;;  %v1248_v15 = vmul.f32 1.442695, %v1209_v33  ;;  %v1280_v28 = vmul.f32 1.442695, %v1225_v22 }
 0x475   :  { %1389 = vadd.xlane.f32.xlu1 %v1388_v27  ;;  %v1373_v32 = vsel %vm1105_vm2, %v4469_v4, 0.0  ;;  %v1246_v27 = vmul.f32 1.442695, %v1208_v16 }
 0x476   :  { %2952 = vmatpush3.bf16.msra.mxu0 %v4219_v60  ;;  %3446 = vpow2.f32 %v1248_v15 }
 0x477   :  { %v4474_v42 = vpop.eup %3438  ;;  %3448 = vpow2.f32 %v1280_v28 }
 0x478   :  { %1374 = vadd.xlane.f32.xlu0 %v1373_v32  ;;  %v1382_v21 = vsel %vm1105_vm2, %v4474_v42, 0.0  ;;  %3450 = vpow2.f32 %v1246_v27 }
 0x479   :  { %1383 = vadd.xlane.f32.xlu1 %v1382_v21 }
 0x47a   :  { %v4480_v12 = vpop.eup %3440 }
 0x47b   :  { %v1391_v39 = vsel %vm1105_vm2, %v4480_v12, 0.0 }
 0x47c   :  { %1392 = vadd.xlane.f32.xlu0 %v1391_v39 }
 0x47e   :  { %v4484_v50 = vpop.eup %3442 }
 0x47f   :  { %v1385_v60 = vsel %vm1105_vm2, %v4484_v50, 0.0 }
 0x480   :  { %1386 = vadd.xlane.f32.xlu0 %v1385_v60  ;;  %v4500_v23 = vpop.eup %3444 }
 0x481   :  { %5279 = vst [vmem:[#allocation14_spill] sm:$0xff] %v4500_v23  ;;  %v1364_v46 = vsel %vm1105_vm2, %v4500_v23, 0.0 }
 0x483   :  { %v4504_v57 = vpop.eup %3446 }
 0x484   :  { %5280 = vst [vmem:[#allocation15_spill] sm:$0xff] %v4504_v57  ;;  %v4506_v41 = vpop.eup %3448  ;;  %v1319_v49 = vsel %vm1105_vm2, %v4504_v57, 0.0 }
 0x485   :  { %5281 = vst [vmem:[#allocation16_spill] sm:$0xff] %v4506_v41  ;;  %v1367_v48 = vsel %vm1105_vm2, %v4506_v41, 0.0  ;;  %v4512_v53 = vpop.eup %3450 }
 0x486   :  { %5282 = vst [vmem:[#allocation17_spill] sm:$0xff] %v4512_v53  ;;  %v1316_v43 = vsel %vm1105_vm2, %v4512_v53, 0.0 }
 0x48a   :  { %874 = vrot.lane.b32.xlu1 %v4205_v45, %s3746_s30 }
 0x496   :  { %876 = vrot.lane.b32.xlu0 %v4227_v6, %s3746_s30 }
 0x4a1   :  { %v4516_v32 = vpop.xlane.xlu0 %1308 }
 0x4a2   :  { %v4520_v21 = vpop.xlane.xlu1 %1311 }
 0x4a5   :  { %v4522_v39 = vpop.xlane.xlu0 %1302 }
 0x4a6   :  { %v4524_v60 = vpop.xlane.xlu1 %1314 }
 0x4ae   :  { %1365 = vadd.xlane.f32.xlu1 %v1364_v46 }
 0x4b2   :  { %1320 = vadd.xlane.f32.xlu1 %v1319_v49 }
 0x4b5   :  { %1368 = vadd.xlane.f32.xlu0 %v1367_v48 }
 0x4b9   :  { %1317 = vadd.xlane.f32.xlu0 %v1316_v43 }
 0x4cf   :  { %872 = vrot.lane.b32.xlu0 %v4211_v55, %s3746_s30 }
 0x4d9   :  { %v1333_v30 = vpop.xlane.xlu0 %1332 }
 0x4da   :  { %v1330_v33 = vpop.xlane.xlu1 %1329 }
 0x4dd   :  { %v1327_v31 = vpop.xlane.xlu0 %1326 }
 0x4de   :  { %v1324_v22 = vpop.xlane.xlu1 %1323 }
 0x4e1   :  { %v1345_v15 = vpop.xlane.xlu0 %1344 }
 0x4e2   :  { %v1342_v16 = vpop.xlane.xlu1 %1341 }
 0x4e5   :  { %v1339_v28 = vpop.xlane.xlu0 %1338 }
 0x4e6   :  { %v1336_v27 = vpop.xlane.xlu1 %1335 }
 0x4ea   :  { %v4526_v46 = vpop.xlane.xlu0 %1347  ;;  %v4528_v49 = vpop.xlane.xlu1 %1353 }
 0x4ee   :  { %v4530_v48 = vpop.xlane.xlu0 %1356 }
 0x4f2   :  { %v4532_v43 = vpop.xlane.xlu1 %1359  ;;  %v4534_v38 = vpop.xlane.xlu0 %1350 }
 0x4f6   :  { %v1378_v57 = vpop.xlane.xlu1 %1377  ;;  %v4536_v53 = vpop.xlane.xlu0 %1362 }
 0x4f7   :  { %3452 = vrcp.f32 %v1378_v57 }
 0x4fa   :  { %v1372_v23 = vpop.xlane.xlu1 %1371 }
 0x4fd   :  { %v1381_v56 = vpop.xlane.xlu0 %1380 }
 0x4fe   :  { %3454 = vrcp.f32 %v1381_v56  ;;  %v1390_v41 = vpop.xlane.xlu1 %1389 }
 0x4ff   :  { %3456 = vrcp.f32 %v1327_v31 }
 0x500   :  { %3458 = vrcp.f32 %v1372_v23 }
 0x501   :  { %3460 = vrcp.f32 %v1324_v22  ;;  %v1375_v54 = vpop.xlane.xlu0 %1374 }
 0x502   :  { %3462 = vrcp.f32 %v1375_v54  ;;  %v1384_v0 = vpop.xlane.xlu1 %1383 }
 0x503   :  { %3464 = vrcp.f32 %v1333_v30 }
 0x504   :  { %3466 = vrcp.f32 %v1330_v33  ;;  %v3453_v24 = vpop.eup %3452 }
 0x505   :  { %v1393_v35 = vpop.xlane.xlu0 %1392  ;;  %3468 = vrcp.f32 %v1339_v28  ;;  %v1452_v56 = vmul.f32 %v3453_v24, %v4452_v25 }
 0x506   :  { %3470 = vrcp.f32 %v1336_v27 }
 0x507   :  { %3472 = vrcp.f32 %v1384_v0  ;;  %v875_v0 = vpop.permute.xlu1 %874 }
 0x508   :  { %3474 = vrcp.f32 %v1393_v35 }
 0x509   :  { %v1387_v17 = vpop.xlane.xlu0 %1386 }
 0x50a   :  { %3476 = vrcp.f32 %v1387_v17 }
 0x50b   :  { %v3455_v57 = vpop.eup %3454  ;;  %3478 = vrcp.f32 %v1390_v41 }
 0x50c   :  { %v3457_v11 = vpop.eup %3456  ;;  %v1453_v23 = vmul.f32 %v3455_v57, %v4463_v37  ;;  %3480 = vrcp.f32 %v1345_v15 }
 0x50d   :  { %v3459_v31 = vpop.eup %3458  ;;  %v877_v54 = vpop.permute.xlu0 %876  ;;  %3482 = vrcp.f32 %v1342_v16  ;;  %v1435_v15 = vmul.f32 %v3457_v11, %v4393_v18 }
 0x50e   :  { %v3461_v30 = vpop.eup %3460  ;;  %2953 = vmatprep.subr.bf16.mxu0 %v877_v54  ;;  %v1471_v33 = vpack.c.bf16 %v1453_v23, %v1452_v56  ;;  %v1450_v35 = vmul.f32 %v3459_v31, %v4459_v14  ;;  %3484 = vrcp.f32 %v4534_v38 }
 0x50f   :  { %v3463_v22 = vpop.eup %3462  ;;  %2954 = vmatpush3.bf16.msra.mxu0 %v4227_v6  ;;  %v1434_v41 = vmul.f32 %v3461_v30, %v4388_v58  ;;  %3486 = vrcp.f32 %v4526_v46 }
 0x510   :  { %1492 = vrot.lane.b32.xlu0 %v1471_v33, %s3746_s30  ;;  %2955 = vmatprep.subr.bf16.mxu0 %v875_v0  ;;  %v1451_v24 = vmul.f32 %v3463_v22, %v4469_v4  ;;  %v3465_v17 = vpop.eup %3464  ;;  %3488 = vrcp.f32 %v4522_v39 }
 0x511   :  { %v3467_v25 = vpop.eup %3466  ;;  %v1437_v14 = vmul.f32 %v3465_v17, %v4379_v34  ;;  %v1462_v4 = vpack.c.bf16 %v1435_v15, %v1434_v41  ;;  %v4606_v17 = vpack.c.bf16 %v4368_v29, %v4363_v1  ;;  %3490 = vrcp.f32 %v4530_v48 }
 0x512   :  { %v1470_v37 = vpack.c.bf16 %v1451_v24, %v1450_v35  ;;  %v3469_v16 = vpop.eup %3468  ;;  %v1436_v27 = vmul.f32 %v3467_v25, %v4382_v47  ;;  %3492 = vrcp.f32 %v4448_v59 }
 0x513   :  { %2956 = vmatpush3.bf16.msra.mxu0 %v4205_v45  ;;  %v3471_v28 = vpop.eup %3470  ;;  %v1439_v30 = vmul.f32 %v3469_v16, %v4413_v13  ;;  %v4568_v13 = vpack.c.bf16 %v4138_v40, %v4091_v5  ;;  %3494 = vrcp.f32 %v4528_v49 }
 0x514   :  { %1490 = vrot.lane.b32.xlu1 %v1470_v37, %s3746_s30  ;;  %v3473_v6 = vpop.eup %3472  ;;  %v1463_v23 = vpack.c.bf16 %v1437_v14, %v1436_v27  ;;  %v1438_v54 = vmul.f32 %v3471_v28, %v4410_v62  ;;  %3496 = vrcp.f32 %v4516_v32 }
 0x515   :  { %v3475_v57 = vpop.eup %3474  ;;  %v1454_v58 = vmul.f32 %v3473_v6, %v4474_v42  ;;  %3498 = vrcp.f32 %v4536_v53 }
 0x516   :  { %v1457_v47 = vmul.f32 %v3475_v57, %v4480_v12  ;;  %v1464_v42 = vpack.c.bf16 %v1439_v30, %v1438_v54  ;;  %3500 = vrcp.f32 %v4434_v26  ;;  %v5283_v57 = vld [vmem:[#allocation7_spill] sm:$0xff] }
 0x517   :  { %v3477_v56 = vpop.eup %3476  ;;  %3502 = vrcp.f32 %v4532_v43 }
 0x518   :  { %1478 = vrot.lane.b32.xlu1 %v1462_v4, %s3746_s30  ;;  %v1455_v11 = vmul.f32 %v3477_v56, %v4484_v50  ;;  %v3479_v18 = vpop.eup %3478  ;;  %3504 = vrcp.f32 %v4524_v60 }
 0x519   :  { %v3481_v45 = vpop.eup %3480  ;;  %v1456_v33 = vmul.f32 %v3479_v18, %v4465_v10  ;;  %v5285_v18 = vld [vmem:[#allocation8_spill] sm:$0xff] }
 0x51a   :  { %v1472_v31 = vpack.c.bf16 %v1455_v11, %v1454_v58  ;;  %v3483_v34 = vpop.eup %3482  ;;  %v1441_v0 = vmul.f32 %v3481_v45, %v4403_v52  ;;  %v5284_v58 = vld [vmem:[#allocation13_spill] sm:$0xff]  ;;  %v5286_v45 = vld [vmem:[#allocation12_spill] sm:$0xff] }
 0x51b   :  { %v1473_v22 = vpack.c.bf16 %v1457_v47, %v1456_v33  ;;  %v1440_v50 = vmul.f32 %v3483_v34, %v4401_v9  ;;  %v3151_v9 = vpop.f32.mrf.mxu0  ;;  %v3485_v1 = vpop.eup %3484 }
 0x51c   :  { %1480 = vrot.lane.b32.xlu1 %v1463_v23, %s3746_s30  ;;  %1494 = vrot.lane.b32.xlu0 %v1472_v31, %s3746_s30  ;;  %v3487_v29 = vpop.eup %3486  ;;  %v1443_v38 = vmul.f32 %v3485_v1, %v4438_v2  ;;  %v5291_v1 = vld [vmem:[#allocation14_spill] sm:$0xff] }
 0x51d   :  { %v1465_v62 = vpack.c.bf16 %v1441_v0, %v1440_v50  ;;  %v797_v5 = vpop.f32.mrf.mxu0  ;;  %v3489_v39 = vpop.eup %3488  ;;  %v1442_v59 = vmul.f32 %v3487_v29, %v4423_v51 }
 0x51e   :  { %v3491_v48 = vpop.eup %3490  ;;  %v1427_v41 = vmul.f32 %v3489_v39, %v4353_v36 }
 0x51f   :  { %v3152_v40 = vpop.f32.mrf.mxu0  ;;  %v3493_v37 = vpop.eup %3492  ;;  %v1466_v32 = vpack.c.bf16 %v1443_v38, %v1442_v59  ;;  %v1445_v26 = vmul.f32 %v3491_v48, %v4430_v20  ;;  %v576_v20 = vsel %vm553_vm1, %v4015_v8, 0 }
 0x520   :  { %1482 = vrot.lane.b32.xlu1 %v1464_v42, %s3746_s30  ;;  %1496 = vrot.lane.b32.xlu0 %v1473_v22, %s3746_s30  ;;  %v4590_v52 = vpack.c.bf16 %v3152_v40, %v3151_v9  ;;  %v3495_v49 = vpop.eup %3494  ;;  %v1426_v43 = vmul.f32 %v3493_v37, %v4323_v61  ;;  %v573_v22 = vsel %vm553_vm1, %v5283_v57, 0 }
 0x521   :  { %v800_v10 = vpop.f32.mrf.mxu0  ;;  %v1444_v51 = vmul.f32 %v3495_v49, %v4420_v19  ;;  %v3497_v60 = vpop.eup %3496 }
 0x522   :  { %v4596_v12 = vpack.c.bf16 %v800_v10, %v797_v5  ;;  %v1458_v16 = vpack.c.bf16 %v1427_v41, %v1426_v43  ;;  %v3499_v36 = vpop.eup %3498  ;;  %v1429_v19 = vmul.f32 %v3497_v60, %v4347_v44  ;;  %v5288_v5 = vld [vmem:[#allocation5_spill] sm:$0xff] }
 0x523   :  { %v1467_v6 = vpack.c.bf16 %v1445_v26, %v1444_v51  ;;  %v3501_v14 = vpop.eup %3500  ;;  %v1447_v11 = vmul.f32 %v3499_v36, %v5284_v58 }
 0x524   :  { %1484 = vrot.lane.b32.xlu1 %v1465_v62, %s3746_s30  ;;  %1599 = vrot.lane.b32.xlu0 %v4089_v3, %s3748_s2  ;;  %v3503_v61 = vpop.eup %3502  ;;  %v1428_v23 = vmul.f32 %v3501_v14, %v5285_v18  ;;  %v5287_v62 = vld [vmem:[#allocation10_spill] sm:$0xff] }
 0x525   :  { %v3505_v54 = vpop.eup %3504 }
 0x526   :  { %v1459_v31 = vpack.c.bf16 %v1429_v19, %v1428_v23  ;;  %v1431_v9 = vmul.f32 %v3505_v54, %v5287_v62 }
 0x528   :  { %1601 = vrot.lane.b32.xlu1 %v4087_v63, %s3748_s2  ;;  %1603 = vrot.lane.b32.xlu0 %v4568_v13, %s3748_s2 }
 0x52c   :  { %1605 = vrot.lane.b32.xlu1 %v4093_v7, %s3748_s2  ;;  %1607 = vrot.lane.b32.xlu0 %v4089_v3, %s3746_s30 }
 0x530   :  { %1609 = vrot.lane.b32.xlu1 %v4087_v63, %s3746_s30  ;;  %1611 = vrot.lane.b32.xlu0 %v4568_v13, %s3746_s30 }
 0x534   :  { %1613 = vrot.lane.b32.xlu1 %v4093_v7, %s3746_s30  ;;  %1615 = vrot.lane.b32.xlu0 %v4089_v3, %s3747_s21 }
 0x538   :  { %1617 = vrot.lane.b32.xlu1 %v4087_v63, %s3747_s21  ;;  %1619 = vrot.lane.b32.xlu0 %v4568_v13, %s3747_s21 }
 0x53c   :  { %1621 = vrot.lane.b32.xlu1 %v4093_v7, %s3747_s21  ;;  %1633 = vrot.lane.b32.xlu0 %v4590_v52, %s3748_s2 }
 0x53e   :  { %v1369_v35 = vpop.xlane.xlu0 %1368 }
 0x53f   :  { %3506 = vrcp.f32 %v1369_v35  ;;  %v5289_v35 = vld [vmem:[#allocation16_spill] sm:$0xff] }
 0x540   :  { %1657 = vrot.lane.b32.xlu1 %v4590_v52, %s3747_s21  ;;  %1631 = vrot.lane.b32.xlu0 %v4596_v12, %s3748_s2  ;;  %3508 = vrcp.f32 %v4520_v21 }
 0x542   :  { %v1318_v24 = vpop.xlane.xlu0 %1317 }
 0x544   :  { %1655 = vrot.lane.b32.xlu1 %v4596_v12, %s3747_s21 }
 0x546   :  { %v873_v25 = vpop.permute.xlu0 %872 }
 0x547   :  { %2957 = vmatprep.subr.bf16.mxu0 %v873_v25  ;;  %v5290_v25 = vld [vmem:[#allocation9_spill] sm:$0xff] }
 0x548   :  { %2958 = vmatpush3.bf16.msra.mxu0 %v4211_v55  ;;  %1653 = vrot.lane.b32.xlu1 %v4606_v17, %s3747_s21  ;;  %v1366_v55 = vpop.xlane.xlu1 %1365 }
 0x549   :  { %3281 = vmatprep.subr.msk.bf16.mxu0 %vm553_vm1, %v4015_v8  ;;  %3510 = vrcp.f32 %v1366_v55  ;;  %v1446_v8 = vmul.f32 %v3503_v61, %v5286_v45 }
 0x54a   :  { %3512 = vrcp.f32 %v1318_v24 }
 0x54b   :  { %v1468_v34 = vpack.c.bf16 %v1447_v11, %v1446_v8 }
 0x54c   :  { %1629 = vrot.lane.b32.xlu1 %v4606_v17, %s3748_s2  ;;  %v1321_v46 = vpop.xlane.xlu1 %1320  ;;  %v3507_v33 = vpop.eup %3506 }
 0x54d   :  { %3514 = vrcp.f32 %v1321_v46  ;;  %v3509_v42 = vpop.eup %3508  ;;  %v1449_v24 = vmul.f32 %v3507_v33, %v5289_v35 }
 0x54e   :  { %v1430_v55 = vmul.f32 %v3509_v42, %v5290_v25 }
 0x550   :  { %v1460_v38 = vpack.c.bf16 %v1431_v9, %v1430_v55 }
 0x556   :  { %v3511_v0 = vpop.eup %3510 }
 0x557   :  { %v1448_v29 = vmul.f32 %v3511_v0, %v5291_v1  ;;  %v3513_v39 = vpop.eup %3512 }
 0x559   :  { %v1469_v59 = vpack.c.bf16 %v1449_v24, %v1448_v29 }
 0x55a   :  { %v3515_v49 = vpop.eup %3514 }
 0x582   :  { %v1493_v15 = vpop.permute.xlu0 %1492 }
 0x583   :  { %v1520_v21 = vsel %vm1105_vm2, %v1467_v6, %v1493_v15  ;;  %v5294_v15 = vld [vmem:[#allocation15_spill] sm:$0xff] }
 0x586   :  { %v1491_v53 = vpop.permute.xlu1 %1490 }
 0x587   :  { %v1516_v2 = vsel %vm1105_vm2, %v1466_v32, %v1491_v53  ;;  %v570_v32 = vsel %vm553_vm1, %v5288_v5, 0  ;;  %v5292_v53 = vld [vmem:[#allocation17_spill] sm:$0xff] }
 0x588   :  { %1562 = vmatprep.mubr.bf16.mxu0 %v1516_v2  ;;  %v1432_v26 = vmul.f32 %v3513_v39, %v5292_v53  ;;  %v5293_v2 = vld [vmem:[#allocation6_spill] sm:$0xff] }
 0x58a   :  { %v1479_v28 = vpop.permute.xlu1 %1478 }
 0x58b   :  { %v1500_v27 = vsel %vm1105_vm2, %v1458_v16, %v1479_v28  ;;  %v1433_v16 = vmul.f32 %v3515_v49, %v5294_v15 }
 0x58c   :  { %1563 = vmatmul.mubr.bf16.vlgmr.msra.gmra.mxu0 %v1500_v27  ;;  %v567_v27 = vsel %vm553_vm1, %v5293_v2, 0 }
 0x58d   :  { %3194 = vmatpush3.bf16.xpose.msra.mxu0 %v576_v20  ;;  %1570 = vmatprep.mubr.bf16.mxu0 %v1520_v21  ;;  %v1461_v60 = vpack.c.bf16 %v1433_v16, %v1432_v26 }
 0x58e   :  { %3282 = vmatprep.subr.msk.bf16.mxu0 %vm553_vm1, %v5283_v57  ;;  %v1495_v4 = vpop.permute.xlu0 %1494  ;;  %v1481_v56 = vpop.permute.xlu1 %1480 }
 0x58f   :  { %v1504_v44 = vsel %vm1105_vm2, %v1459_v31, %v1481_v56  ;;  %v1524_v50 = vsel %vm1105_vm2, %v1468_v34, %v1495_v4 }
 0x592   :  { %v1497_v30 = vpop.permute.xlu0 %1496  ;;  %v1483_v47 = vpop.permute.xlu1 %1482 }
 0x593   :  { %v1508_v37 = vsel %vm1105_vm2, %v1460_v38, %v1483_v47  ;;  %v1528_v41 = vsel %vm1105_vm2, %v1469_v59, %v1497_v30 }
 0x594   :  { %1571 = vmatmul.mubr.bf16.gmra.mxu0 %v1504_v44 }
 0x595   :  { %3196 = vmatpush3.bf16.xpose.msra.mxu0 %v573_v22  ;;  %1578 = vmatprep.mubr.bf16.mxu0 %v1524_v50 }
 0x596   :  { %3283 = vmatprep.subr.msk.bf16.mxu0 %vm553_vm1, %v5288_v5  ;;  %v1600_v40 = vpop.permute.xlu0 %1599  ;;  %v1485_v10 = vpop.permute.xlu1 %1484 }
 0x597   :  { %v1512_v36 = vsel %vm1105_vm2, %v1461_v60, %v1485_v10 }
 0x59a   :  { %v1604_v46 = vpop.permute.xlu0 %1603  ;;  %v1602_v48 = vpop.permute.xlu1 %1601 }
 0x59c   :  { %1579 = vmatmul.mubr.bf16.gmra.mxu0 %v1508_v37 }
 0x59d   :  { %3198 = vmatpush3.bf16.xpose.msra.mxu0 %v570_v32  ;;  %1586 = vmatprep.mubr.bf16.mxu0 %v1528_v41 }
 0x59e   :  { %3284 = vmatprep.subr.msk.bf16.mxu0 %vm553_vm1, %v5293_v2  ;;  %v1608_v43 = vpop.permute.xlu0 %1607  ;;  %v1606_v51 = vpop.permute.xlu1 %1605 }
 0x5a2   :  { %v1612_v28 = vpop.permute.xlu0 %1611  ;;  %v1610_v6 = vpop.permute.xlu1 %1609 }
 0x5a4   :  { %1587 = vmatmul.mubr.bf16.gmra.mxu0 %v1512_v36 }
 0x5a5   :  { %3200 = vmatpush3.bf16.xpose.msra.mxu0 %v567_v27  ;;  %3201 = vmatprep.mubr.msk.bf16.mxu0 %vm553_vm1, %v4089_v3 }
 0x5a6   :  { %v1616_v14 = vpop.permute.xlu0 %1615  ;;  %v1614_v20 = vpop.permute.xlu1 %1613 }
 0x5aa   :  { %v1618_v21 = vpop.permute.xlu1 %1617  ;;  %v1620_v61 = vpop.permute.xlu0 %1619 }
 0x5ac   :  { %3202 = vmatmul.mubr.msk.bf16.vlgmr.msra.gmra.mxu0 %vm553_vm1, %v4087_v63 }
 0x5ad   :  { %3205 = vmatprep.mubr.msk.bf16.mxu0 %vm553_vm1, %v4568_v13 }
 0x5ae   :  { %v1622_v19 = vpop.permute.xlu1 %1621  ;;  %v1634_v57 = vpop.permute.xlu0 %1633 }
 0x5b2   :  { %v1658_v4 = vpop.permute.xlu1 %1657  ;;  %v1632_v56 = vpop.permute.xlu0 %1631 }
 0x5b3   :  { %3003 = vmatprep.subr.bf16.mxu1 %v1658_v4 }
 0x5b4   :  { %3206 = vmatmul.mubr.msk.bf16.gmra.mxu0 %vm553_vm1, %v4093_v7  ;;  %3004 = vmatpush3.bf16.msra.mxu1 %v1634_v57 }
 0x5b5   :  { %3209 = vmatprep.mubr.msk.bf16.mxu0 %vm553_vm1, %v1600_v40 }
 0x5b6   :  { %v1656_v3 = vpop.permute.xlu1 %1655 }
 0x5b7   :  { %3005 = vmatprep.subr.bf16.mxu1 %v1656_v3 }
 0x5b8   :  { %3006 = vmatpush3.bf16.msra.mxu1 %v1632_v56 }
 0x5ba   :  { %v1654_v58 = vpop.permute.xlu1 %1653 }
 0x5bb   :  { %3007 = vmatprep.subr.bf16.mxu1 %v1654_v58 }
 0x5bc   :  { %3210 = vmatmul.mubr.msk.bf16.gmra.mxu0 %vm553_vm1, %v1602_v48 }
 0x5bd   :  { %3213 = vmatprep.mubr.msk.bf16.mxu0 %vm553_vm1, %v1604_v46 }
 0x5be   :  { %v1630_v63 = vpop.permute.xlu1 %1629 }
 0x5bf   :  { %3008 = vmatpush3.bf16.msra.mxu1 %v1630_v63 }
 0x5c4   :  { %3214 = vmatmul.mubr.msk.bf16.gmra.mxu0 %vm553_vm1, %v1606_v51 }
 0x5c5   :  { %3217 = vmatprep.mubr.msk.bf16.mxu0 %vm553_vm1, %v1608_v43 }
 0x5cc   :  { %3218 = vmatmul.mubr.msk.bf16.gmra.mxu0 %vm553_vm1, %v1610_v6 }
 0x5cd   :  { %3221 = vmatprep.mubr.msk.bf16.mxu0 %vm553_vm1, %v1612_v28 }
 0x5d4   :  { %3222 = vmatmul.mubr.msk.bf16.gmra.mxu0 %vm553_vm1, %v1614_v20 }
 0x5d5   :  { %3225 = vmatprep.mubr.msk.bf16.mxu0 %vm553_vm1, %v1616_v14 }
 0x5dc   :  { %3226 = vmatmul.mubr.msk.bf16.gmra.mxu0 %vm553_vm1, %v1618_v21 }
 0x5dd   :  { %3229 = vmatprep.mubr.msk.bf16.mxu0 %vm553_vm1, %v1620_v61 }
 0x5e4   :  { %3230 = vmatmul.mubr.msk.bf16.gmra.mxu0 %vm553_vm1, %v1622_v19 }
 0x64c   :  { %v2959_v7 = vpop.f32.mrf.mxu0 }
 0x64e   :  { %v2960_v13 = vpop.f32.mrf.mxu0 }
 0x64f   :  { %v4685_v11 = vadd.f32 %v2960_v13, %v2959_v7 }
 0x650   :  { %v2962_v18 = vpop.f32.mrf.mxu0 }
 0x652   :  { %v2963_v23 = vpop.f32.mrf.mxu0 }
 0x653   :  { %v4687_v45 = vadd.f32 %v2963_v23, %v2962_v18 }
 0x654   :  { %v2965_v8 = vpop.f32.mrf.mxu0 }
 0x656   :  { %v2966_v54 = vpop.f32.mrf.mxu0 }
 0x657   :  { %v4691_v30 = vadd.f32 %v2966_v54, %v2965_v8 }
 0x658   :  { %v2968_v47 = vpop.f32.mrf.mxu0 }
 0x65a   :  { %v2969_v34 = vpop.f32.mrf.mxu0 }
 0x65b   :  { %v4693_v33 = vadd.f32 %v2969_v34, %v2968_v47 }
 0x65c   :  { %v2971_v44 = vpop.f32.mrf.mxu0 }
 0x65e   :  { %v2972_v22 = vpop.f32.mrf.mxu0 }
 0x65f   :  { %v4697_v50 = vadd.f32 %v2972_v22, %v2971_v44 }
 0x660   :  { %v2974_v0 = vpop.f32.mrf.mxu0 }
 0x662   :  { %v2975_v62 = vpop.f32.mrf.mxu0 }
 0x663   :  { %v4699_v9 = vadd.f32 %v2975_v62, %v2974_v0 }
 0x664   :  { %v2977_v5 = vpop.f32.mrf.mxu0 }
 0x666   :  { %v2978_v10 = vpop.f32.mrf.mxu0 }
 0x667   :  { %v4703_v35 = vadd.f32 %v2978_v10, %v2977_v5 }
 0x668   :  { %v2980_v24 = vpop.f32.mrf.mxu0 }
 0x66a   :  { %v2981_v25 = vpop.f32.mrf.mxu0 }
 0x66b   :  { %v4705_v55 = vadd.f32 %v2981_v25, %v2980_v24 }
 0x66c   :  { %v4707_v1 = vpop.f32.mrf.mxu0 }
 0x66d   :  { %v1878_v38 = vsel %vm1105_vm2, %v4707_v1, -inf }
 0x66e   :  { %v4713_v39 = vpop.f32.mrf.mxu0  ;;  %1879 = vmax.xlane.f32.xlu1 %v1878_v38 }
 0x66f   :  { %v1872_v59 = vsel %vm1105_vm2, %v4713_v39, -inf }
 0x670   :  { %v4715_v46 = vpop.f32.mrf.mxu0 }
 0x671   :  { %v1881_v48 = vsel %vm1105_vm2, %v4715_v46, -inf }
 0x672   :  { %v4721_v37 = vpop.f32.mrf.mxu0  ;;  %1882 = vmax.xlane.f32.xlu0 %v1881_v48  ;;  %1873 = vmax.xlane.f32.xlu1 %v1872_v59 }
 0x673   :  { %v1875_v32 = vsel %vm1105_vm2, %v4721_v37, -inf }
 0x674   :  { %v4723_v49 = vpop.f32.mrf.mxu0 }
 0x675   :  { %v1890_v41 = vsel %vm1105_vm2, %v4723_v49, -inf }
 0x676   :  { %v4729_v53 = vpop.f32.mrf.mxu0  ;;  %1876 = vmax.xlane.f32.xlu0 %v1875_v32  ;;  %1891 = vmax.xlane.f32.xlu1 %v1890_v41 }
 0x677   :  { %v1884_v43 = vsel %vm1105_vm2, %v4729_v53, -inf }
 0x678   :  { %v4731_v26 = vpop.f32.mrf.mxu0 }
 0x679   :  { %v1893_v2 = vsel %vm1105_vm2, %v4731_v26, -inf }
 0x67a   :  { %v4737_v51 = vpop.f32.mrf.mxu0  ;;  %1894 = vmax.xlane.f32.xlu0 %v1893_v2  ;;  %1885 = vmax.xlane.f32.xlu1 %v1884_v43 }
 0x67b   :  { %v1887_v16 = vsel %vm1105_vm2, %v4737_v51, -inf }
 0x67c   :  { %v4739_v15 = vpop.f32.mrf.mxu0 }
 0x67d   :  { %v1902_v60 = vsel %vm1105_vm2, %v4739_v15, -inf }
 0x67e   :  { %v4745_v28 = vpop.f32.mrf.mxu0  ;;  %1888 = vmax.xlane.f32.xlu0 %v1887_v16  ;;  %1903 = vmax.xlane.f32.xlu1 %v1902_v60 }
 0x67f   :  { %v1896_v36 = vsel %vm1105_vm2, %v4745_v28, -inf }
 0x680   :  { %v4747_v6 = vpop.f32.mrf.mxu0 }
 0x681   :  { %v1905_v20 = vsel %vm1105_vm2, %v4747_v6, -inf }
 0x682   :  { %v4751_v27 = vpop.f32.mrf.mxu0  ;;  %1897 = vmax.xlane.f32.xlu0 %v1896_v36 }
 0x683   :  { %v1899_v57 = vsel %vm1105_vm2, %v4751_v27, -inf }
 0x684   :  { %v4753_v14 = vpop.f32.mrf.mxu0 }
 0x685   :  { %v1914_v21 = vsel %vm1105_vm2, %v4753_v14, -inf }
 0x686   :  { %v4759_v61 = vpop.f32.mrf.mxu0  ;;  %1906 = vmax.xlane.f32.xlu0 %v1905_v20  ;;  %1915 = vmax.xlane.f32.xlu1 %v1914_v21 }
 0x687   :  { %v1908_v4 = vsel %vm1105_vm2, %v4759_v61, -inf }
 0x688   :  { %v4761_v19 = vpop.f32.mrf.mxu0 }
 0x689   :  { %v1917_v58 = vsel %vm1105_vm2, %v4761_v19, -inf }
 0x68a   :  { %v4767_v3 = vpop.f32.mrf.mxu0  ;;  %1900 = vmax.xlane.f32.xlu0 %v1899_v57  ;;  %1909 = vmax.xlane.f32.xlu1 %v1908_v4 }
 0x68b   :  { %v1911_v18 = vsel %vm1105_vm2, %v4767_v3, -inf }
 0x68c   :  { %v4769_v56 = vpop.f32.mrf.mxu0 }
 0x68d   :  { %v1926_v63 = vsel %vm1105_vm2, %v4769_v56, -inf }
 0x68e   :  { %v4775_v7 = vpop.f32.mrf.mxu0  ;;  %1918 = vmax.xlane.f32.xlu0 %v1917_v58  ;;  %1927 = vmax.xlane.f32.xlu1 %v1926_v63  ;;  %v5295_v63 = vld [vmem:[#allocation11_spill] sm:$0xff] }
 0x68f   :  { %v1920_v23 = vsel %vm1105_vm2, %v4775_v7, -inf }
 0x690   :  { %v4777_v13 = vpop.f32.mrf.mxu0 }
 0x691   :  { %v1929_v47 = vsel %vm1105_vm2, %v4777_v13, -inf }
 0x692   :  { %v4783_v8 = vpop.f32.mrf.mxu0  ;;  %1912 = vmax.xlane.f32.xlu0 %v1911_v18  ;;  %1921 = vmax.xlane.f32.xlu1 %v1920_v23 }
 0x693   :  { %v1923_v0 = vsel %vm1105_vm2, %v4783_v8, -inf }
 0x694   :  { %v4785_v54 = vpop.f32.mrf.mxu0 }
 0x695   :  { %v1938_v34 = vsel %vm1105_vm2, %v4785_v54, -inf }
 0x696   :  { %v4791_v44 = vpop.f32.mrf.mxu0  ;;  %1930 = vmax.xlane.f32.xlu0 %v1929_v47  ;;  %1939 = vmax.xlane.f32.xlu1 %v1938_v34 }
 0x697   :  { %v1932_v62 = vsel %vm1105_vm2, %v4791_v44, -inf }
 0x698   :  { %v4793_v22 = vpop.f32.mrf.mxu0 }
 0x699   :  { %v1941_v24 = vsel %vm1105_vm2, %v4793_v22, -inf }
 0x69a   :  { %v4799_v5 = vpop.f32.mrf.mxu0  ;;  %1924 = vmax.xlane.f32.xlu0 %v1923_v0  ;;  %1933 = vmax.xlane.f32.xlu1 %v1932_v62 }
 0x69b   :  { %v1935_v59 = vsel %vm1105_vm2, %v4799_v5, -inf }
 0x69c   :  { %v4801_v10 = vpop.f32.mrf.mxu0 }
 0x69d   :  { %v1950_v25 = vsel %vm1105_vm2, %v4801_v10, -inf }
 0x69e   :  { %v4807_v38 = vpop.f32.mrf.mxu0  ;;  %1942 = vmax.xlane.f32.xlu0 %v1941_v24  ;;  %1951 = vmax.xlane.f32.xlu1 %v1950_v25 }
 0x69f   :  { %v1944_v43 = vsel %vm1105_vm2, %v4807_v38, -inf }
 0x6a0   :  { %v4809_v48 = vpop.f32.mrf.mxu0 }
 0x6a1   :  { %v1953_v36 = vsel %vm1105_vm2, %v4809_v48, -inf }
 0x6a2   :  { %v4813_v32 = vpop.f32.mrf.mxu0  ;;  %1936 = vmax.xlane.f32.xlu0 %v1935_v59 }
 0x6a3   :  { %v1947_v41 = vsel %vm1105_vm2, %v4813_v32, -inf }
 0x6a4   :  { %v4817_v2 = vpop.f32.mrf.mxu0  ;;  %1948 = vmax.xlane.f32.xlu1 %v1947_v41 }
 0x6a5   :  { %v1962_v60 = vsel %vm1105_vm2, %v4817_v2, -inf }
 0x6a6   :  { %v4821_v16 = vpop.f32.mrf.mxu0  ;;  %1945 = vmax.xlane.f32.xlu0 %v1944_v43 }
 0x6a7   :  { %v1956_v21 = vsel %vm1105_vm2, %v4821_v16, -inf }
 0x6a8   :  { %1963 = vmax.xlane.f32.xlu1 %v1962_v60  ;;  %v4827_v20 = vpop.f32.mrf.mxu0 }
 0x6a9   :  { %v1965_v57 = vsel %vm1105_vm2, %v4827_v20, -inf }
 0x6aa   :  { %1954 = vmax.xlane.f32.xlu0 %v1953_v36  ;;  %v4833_v4 = vpop.f32.mrf.mxu0 }
 0x6ab   :  { %v1959_v58 = vsel %vm1105_vm2, %v4833_v4, -inf }
 0x6ac   :  { %1957 = vmax.xlane.f32.xlu1 %v1956_v21 }
 0x6ae   :  { %1966 = vmax.xlane.f32.xlu0 %v1965_v57 }
 0x6b2   :  { %1960 = vmax.xlane.f32.xlu0 %v1959_v58 }
 0x6bd   :  { %1627 = vrot.lane.b32.xlu1 %v5295_v63, %s3748_s2 }
 0x6c1   :  { %1645 = vrot.lane.b32.xlu1 %v4590_v52, %s3746_s30 }
 0x6c8   :  { %1651 = vrot.lane.b32.xlu0 %v5295_v63, %s3747_s21 }
 0x6f7   :  { %v1880_v18 = vpop.xlane.xlu1 %1879 }
 0x6f8   :  { %v1970_v23 = vsub.f32 %v4707_v1, %v1880_v18 }
 0x6fa   :  { %v2004_v47 = vmul.f32 1.442695, %v1970_v23 }
 0x6fb   :  { %v1883_v34 = vpop.xlane.xlu0 %1882  ;;  %v1874_v0 = vpop.xlane.xlu1 %1873 }
 0x6fc   :  { %3516 = vpow2.f32 %v2004_v47  ;;  %v1971_v62 = vsub.f32 %v4715_v46, %v1883_v34  ;;  %v1968_v24 = vsub.f32 %v4713_v39, %v1874_v0 }
 0x6fe   :  { %v2006_v25 = vmul.f32 1.442695, %v1971_v62  ;;  %v2000_v59 = vmul.f32 1.442695, %v1968_v24 }
 0x6ff   :  { %v1877_v41 = vpop.xlane.xlu0 %1876  ;;  %v4846_v43 = vpop.xlane.xlu1 %1891 }
 0x700   :  { %3518 = vpow2.f32 %v2006_v25  ;;  %v1969_v60 = vsub.f32 %v4721_v37, %v1877_v41 }
 0x701   :  { %3520 = vpow2.f32 %v2000_v59 }
 0x702   :  { %v2002_v36 = vmul.f32 1.442695, %v1969_v60 }
 0x703   :  { %v4849_v21 = vpop.xlane.xlu0 %1894  ;;  %v1886_v1 = vpop.xlane.xlu1 %1885 }
 0x704   :  { %3522 = vpow2.f32 %v2002_v36  ;;  %v1972_v57 = vsub.f32 %v4729_v53, %v1886_v1 }
 0x706   :  { %v2008_v58 = vmul.f32 1.442695, %v1972_v57 }
 0x707   :  { %v1889_v46 = vpop.xlane.xlu0 %1888  ;;  %v1904_v18 = vpop.xlane.xlu1 %1903 }
 0x708   :  { %v1973_v39 = vsub.f32 %v4737_v51, %v1889_v46  ;;  %v1978_v23 = vsub.f32 %v4739_v15, %v1904_v18  ;;  %3524 = vpow2.f32 %v2008_v58 }
 0x709   :  { %v4854_v47 = vpop.eup %3516 }
 0x70a   :  { %v2010_v34 = vmul.f32 1.442695, %v1973_v39  ;;  %v2070_v37 = vsel %vm1105_vm2, %v4854_v47, 0.0  ;;  %v2020_v0 = vmul.f32 1.442695, %v1978_v23 }
 0x70b   :  { %v1898_v62 = vpop.xlane.xlu0 %1897  ;;  %2071 = vadd.xlane.f32.xlu0 %v2070_v37 }
 0x70c   :  { %3526 = vpow2.f32 %v2010_v34  ;;  %v1976_v53 = vsub.f32 %v4745_v28, %v1898_v62 }
 0x70d   :  { %v4859_v24 = vpop.eup %3518  ;;  %3528 = vpow2.f32 %v2020_v0 }
 0x70e   :  { %v4861_v25 = vpop.eup %3520  ;;  %v2073_v51 = vsel %vm1105_vm2, %v4859_v24, 0.0  ;;  %v2016_v15 = vmul.f32 1.442695, %v1976_v53 }
 0x70f   :  { %v1907_v59 = vpop.xlane.xlu0 %1906  ;;  %2074 = vadd.xlane.f32.xlu0 %v2073_v51  ;;  %v2064_v41 = vsel %vm1105_vm2, %v4861_v25, 0.0  ;;  %v1916_v60 = vpop.xlane.xlu1 %1915 }
 0x710   :  { %v1979_v36 = vsub.f32 %v4747_v6, %v1907_v59  ;;  %2065 = vadd.xlane.f32.xlu1 %v2064_v41  ;;  %v1982_v28 = vsub.f32 %v4753_v14, %v1916_v60  ;;  %3530 = vpow2.f32 %v2016_v15 }
 0x711   :  { %v4869_v1 = vpop.eup %3522 }
 0x712   :  { %v2022_v57 = vmul.f32 1.442695, %v1979_v36  ;;  %v2067_v58 = vsel %vm1105_vm2, %v4869_v1, 0.0  ;;  %v2028_v46 = vmul.f32 1.442695, %v1982_v28 }
 0x713   :  { %v1901_v18 = vpop.xlane.xlu0 %1900  ;;  %2068 = vadd.xlane.f32.xlu0 %v2067_v58  ;;  %v1910_v39 = vpop.xlane.xlu1 %1909 }
 0x714   :  { %3532 = vpow2.f32 %v2022_v57  ;;  %v1977_v23 = vsub.f32 %v4751_v27, %v1901_v18  ;;  %v1980_v34 = vsub.f32 %v4759_v61, %v1910_v39 }
 0x715   :  { %v4875_v6 = vpop.eup %3524  ;;  %3534 = vpow2.f32 %v2028_v46 }
 0x716   :  { %v2018_v37 = vmul.f32 1.442695, %v1977_v23  ;;  %v2024_v14 = vmul.f32 1.442695, %v1980_v34  ;;  %v2076_v62 = vsel %vm1105_vm2, %v4875_v6, 0.0 }
 0x717   :  { %v1919_v0 = vpop.xlane.xlu0 %1918  ;;  %v1928_v53 = vpop.xlane.xlu1 %1927  ;;  %2077 = vadd.xlane.f32.xlu1 %v2076_v62 }
 0x718   :  { %3536 = vpow2.f32 %v2018_v37  ;;  %v1983_v51 = vsub.f32 %v4761_v19, %v1919_v0  ;;  %v1986_v15 = vsub.f32 %v4769_v56, %v1928_v53 }
 0x719   :  { %v4881_v59 = vpop.eup %3526  ;;  %3538 = vpow2.f32 %v2024_v14 }
 0x71a   :  { %v2030_v27 = vmul.f32 1.442695, %v1983_v51  ;;  %v2079_v61 = vsel %vm1105_vm2, %v4881_v59, 0.0  ;;  %v2036_v41 = vmul.f32 1.442695, %v1986_v15  ;;  %v4885_v28 = vpop.eup %3528 }
 0x71b   :  { %v1913_v60 = vpop.xlane.xlu0 %1912  ;;  %v1922_v36 = vpop.xlane.xlu1 %1921  ;;  %2080 = vadd.xlane.f32.xlu1 %v2079_v61  ;;  %v2094_v18 = vsel %vm1105_vm2, %v4885_v28, 0.0 }
 0x71c   :  { %3540 = vpow2.f32 %v2030_v27  ;;  %v1981_v57 = vsub.f32 %v4767_v3, %v1913_v60  ;;  %v1984_v19 = vsub.f32 %v4775_v7, %v1922_v36 }
 0x71d   :  { %3542 = vpow2.f32 %v2036_v41  ;;  %v4893_v23 = vpop.eup %3530 }
 0x71e   :  { %v2026_v58 = vmul.f32 1.442695, %v1981_v57  ;;  %v2032_v56 = vmul.f32 1.442695, %v1984_v19  ;;  %v2088_v0 = vsel %vm1105_vm2, %v4893_v23, 0.0 }
 0x71f   :  { %v1931_v46 = vpop.xlane.xlu0 %1930  ;;  %v4891_v39 = vpop.xlane.xlu1 %1939  ;;  %2095 = vadd.xlane.f32.xlu1 %v2094_v18 }
 0x720   :  { %3544 = vpow2.f32 %v2026_v58  ;;  %v1987_v34 = vsub.f32 %v4777_v13, %v1931_v46 }
 0x721   :  { %v4896_v37 = vpop.eup %3532  ;;  %3546 = vpow2.f32 %v2032_v56 }
 0x722   :  { %v2038_v3 = vmul.f32 1.442695, %v1987_v34  ;;  %v2097_v7 = vsel %vm1105_vm2, %v4896_v37, 0.0  ;;  %v4902_v53 = vpop.eup %3534 }
 0x723   :  { %v1925_v14 = vpop.xlane.xlu0 %1924  ;;  %2098 = vadd.xlane.f32.xlu0 %v2097_v7  ;;  %v1934_v62 = vpop.xlane.xlu1 %1933  ;;  %2089 = vadd.xlane.f32.xlu1 %v2088_v0  ;;  %v2106_v36 = vsel %vm1105_vm2, %v4902_v53, 0.0 }
 0x724   :  { %v1985_v51 = vsub.f32 %v4783_v8, %v1925_v14  ;;  %v1988_v13 = vsub.f32 %v4791_v44, %v1934_v62  ;;  %3548 = vpow2.f32 %v2038_v3 }
 0x725   :  { %v4906_v15 = vpop.eup %3536 }
 0x726   :  { %v2034_v27 = vmul.f32 1.442695, %v1985_v51  ;;  %v2040_v61 = vmul.f32 1.442695, %v1988_v13  ;;  %v2091_v41 = vsel %vm1105_vm2, %v4906_v15, 0.0  ;;  %v4914_v19 = vpop.eup %3538 }
 0x727   :  { %v4910_v60 = vpop.xlane.xlu0 %1942  ;;  %2092 = vadd.xlane.f32.xlu0 %v2091_v41  ;;  %v1952_v57 = vpop.xlane.xlu1 %1951  ;;  %2107 = vadd.xlane.f32.xlu1 %v2106_v36  ;;  %v2100_v18 = vsel %vm1105_vm2, %v4914_v19, 0.0 }
 0x728   :  { %v1994_v8 = vsub.f32 %v4801_v10, %v1952_v57  ;;  %3550 = vpow2.f32 %v2040_v61 }
 0x729   :  { %v4917_v44 = vpop.eup %3540  ;;  %3552 = vpow2.f32 %v2034_v27 }
 0x72a   :  { %v2052_v58 = vmul.f32 1.442695, %v1994_v8  ;;  %v2109_v56 = vsel %vm1105_vm2, %v4917_v44, 0.0  ;;  %v4923_v34 = vpop.eup %3542 }
 0x72b   :  { %v1937_v46 = vpop.xlane.xlu0 %1936  ;;  %2110 = vadd.xlane.f32.xlu0 %v2109_v56  ;;  %2101 = vadd.xlane.f32.xlu1 %v2100_v18  ;;  %v2118_v13 = vsel %vm1105_vm2, %v4923_v34, 0.0 }
 0x72c   :  { %v1989_v3 = vsub.f32 %v4799_v5, %v1937_v46  ;;  %3554 = vpow2.f32 %v2052_v58 }
 0x72d   :  { %v4926_v7 = vpop.eup %3544  ;;  %v1949_v10 = vpop.xlane.xlu1 %1948 }
 0x72e   :  { %v2042_v14 = vmul.f32 1.442695, %v1989_v3  ;;  %v2103_v0 = vsel %vm1105_vm2, %v4926_v7, 0.0  ;;  %v4930_v62 = vpop.eup %3546  ;;  %v1993_v5 = vsub.f32 %v4813_v32, %v1949_v10 }
 0x72f   :  { %v1946_v51 = vpop.xlane.xlu0 %1945  ;;  %2104 = vadd.xlane.f32.xlu0 %v2103_v0  ;;  %2119 = vadd.xlane.f32.xlu1 %v2118_v13  ;;  %v2112_v57 = vsel %vm1105_vm2, %v4930_v62, 0.0 }
 0x730   :  { %3556 = vpow2.f32 %v2042_v14  ;;  %v1992_v27 = vsub.f32 %v4807_v38, %v1946_v51  ;;  %v2050_v18 = vmul.f32 1.442695, %v1993_v5 }
 0x731   :  { %v1964_v61 = vpop.xlane.xlu1 %1963  ;;  %v4939_v8 = vpop.eup %3548 }
 0x732   :  { %v2048_v41 = vmul.f32 1.442695, %v1992_v27  ;;  %v1998_v36 = vsub.f32 %v4817_v2, %v1964_v61  ;;  %v2121_v2 = vsel %vm1105_vm2, %v4939_v8, 0.0 }
 0x733   :  { %v1955_v58 = vpop.xlane.xlu0 %1954  ;;  %2113 = vadd.xlane.f32.xlu0 %v2112_v57 }
 0x734   :  { %3558 = vpow2.f32 %v2048_v41  ;;  %v2060_v56 = vmul.f32 1.442695, %v1998_v36  ;;  %v1995_v46 = vsub.f32 %v4809_v48, %v1955_v58 }
 0x735   :  { %v1958_v38 = vpop.xlane.xlu1 %1957  ;;  %v4942_v3 = vpop.eup %3550 }
 0x736   :  { %3560 = vpow2.f32 %v2060_v56  ;;  %v2054_v32 = vmul.f32 1.442695, %v1995_v46  ;;  %v1996_v10 = vsub.f32 %v4821_v16, %v1958_v38  ;;  %v4947_v14 = vpop.eup %3552  ;;  %v2124_v51 = vsel %vm1105_vm2, %v4942_v3, 0.0 }
 0x737   :  { %v1967_v0 = vpop.xlane.xlu0 %1966  ;;  %2122 = vadd.xlane.f32.xlu0 %v2121_v2  ;;  %2125 = vadd.xlane.f32.xlu1 %v2124_v51  ;;  %v2115_v5 = vsel %vm1105_vm2, %v4947_v14, 0.0 }
 0x738   :  { %3562 = vpow2.f32 %v2054_v32  ;;  %v2056_v48 = vmul.f32 1.442695, %v1996_v10  ;;  %v1999_v13 = vsub.f32 %v4827_v20, %v1967_v0 }
 0x739   :  { %3564 = vpow2.f32 %v2050_v18  ;;  %v4952_v27 = vpop.eup %3554  ;;  %v1628_v61 = vpop.permute.xlu1 %1627 }
 0x73a   :  { %3566 = vpow2.f32 %v2056_v48  ;;  %v2062_v16 = vmul.f32 1.442695, %v1999_v13  ;;  %v2142_v36 = vsel %vm1105_vm2, %v4952_v27, 0.0 }
 0x73b   :  { %v1961_v41 = vpop.xlane.xlu0 %1960  ;;  %2116 = vadd.xlane.f32.xlu0 %v2115_v5  ;;  %2143 = vadd.xlane.f32.xlu1 %v2142_v36  ;;  %v1990_v36 = vsub.f32 %v4785_v54, %v4891_v39 }
 0x73c   :  { %v1997_v57 = vsub.f32 %v4833_v4, %v1961_v41  ;;  %3568 = vpow2.f32 %v2062_v16 }
 0x73d   :  { %v4959_v58 = vpop.eup %3556  ;;  %v1646_v38 = vpop.permute.xlu1 %1645 }
 0x73e   :  { %v2058_v20 = vmul.f32 1.442695, %v1997_v57  ;;  %v2127_v56 = vsel %vm1105_vm2, %v4959_v58, 0.0  ;;  %v1975_v57 = vsub.f32 %v4731_v26, %v4849_v21 }
 0x73f   :  { %v1652_v46 = vpop.permute.xlu0 %1651  ;;  %2128 = vadd.xlane.f32.xlu0 %v2127_v56 }
 0x740   :  { %3009 = vmatprep.subr.bf16.mxu1 %v1652_v46  ;;  %3570 = vpow2.f32 %v2058_v20  ;;  %v2044_v20 = vmul.f32 1.442695, %v1990_v36  ;;  %v2014_v56 = vmul.f32 1.442695, %v1975_v57  ;;  %v1991_v46 = vsub.f32 %v4793_v22, %v4910_v60 }
 0x741   :  { %v4963_v18 = vpop.eup %3558  ;;  %3010 = vmatpush3.bf16.msra.mxu1 %v1628_v61 }
 0x742   :  { %3011 = vmatprep.subr.bf16.mxu1 %v1646_v38  ;;  %v2136_v4 = vsel %vm1105_vm2, %v4963_v18, 0.0  ;;  %3572 = vpow2.f32 %v2044_v20  ;;  %v1974_v38 = vsub.f32 %v4723_v49, %v4846_v43 }
 0x743   :  { %v4967_v32 = vpop.eup %3560  ;;  %2137 = vadd.xlane.f32.xlu1 %v2136_v4  ;;  %3574 = vpow2.f32 %v2014_v56  ;;  %v2046_v4 = vmul.f32 1.442695, %v1991_v46 }
 0x744   :  { %v2154_v51 = vsel %vm1105_vm2, %v4967_v32, 0.0 }
 0x745   :  { %v4969_v10 = vpop.eup %3562  ;;  %3012 = vmatpush3.bf16.msra.mxu1 %v4590_v52  ;;  %3576 = vpow2.f32 %v2046_v4 }
 0x746   :  { %v4972_v2 = vpop.eup %3564  ;;  %v2145_v0 = vsel %vm1105_vm2, %v4969_v10, 0.0 }
 0x747   :  { %v4978_v48 = vpop.eup %3566  ;;  %2146 = vadd.xlane.f32.xlu0 %v2145_v0  ;;  %2155 = vadd.xlane.f32.xlu1 %v2154_v51  ;;  %v2139_v13 = vsel %vm1105_vm2, %v4972_v2, 0.0  ;;  %v2012_v0 = vmul.f32 1.442695, %v1974_v38 }
 0x748   :  { %v2148_v16 = vsel %vm1105_vm2, %v4978_v48, 0.0 }
 0x749   :  { %v4984_v5 = vpop.eup %3568  ;;  %3578 = vpow2.f32 %v2012_v0 }
 0x74a   :  { %v2157_v52 = vsel %vm1105_vm2, %v4984_v5, 0.0 }
 0x74b   :  { %2140 = vadd.xlane.f32.xlu0 %v2139_v13  ;;  %2149 = vadd.xlane.f32.xlu1 %v2148_v16 }
 0x74d   :  { %v4988_v61 = vpop.eup %3570 }
 0x74e   :  { %v2151_v41 = vsel %vm1105_vm2, %v4988_v61, 0.0 }
 0x74f   :  { %2158 = vadd.xlane.f32.xlu0 %v2157_v52  ;;  %v5004_v54 = vpop.eup %3572 }
 0x750   :  { %v2130_v39 = vsel %vm1105_vm2, %v5004_v54, 0.0  ;;  %v5008_v26 = vpop.eup %3574 }
 0x751   :  { %v2085_v21 = vsel %vm1105_vm2, %v5008_v26, 0.0 }
 0x752   :  { %v5012_v22 = vpop.eup %3576 }
 0x753   :  { %2152 = vadd.xlane.f32.xlu0 %v2151_v41  ;;  %v2133_v49 = vsel %vm1105_vm2, %v5012_v22, 0.0 }
 0x756   :  { %v5016_v43 = vpop.eup %3578 }
 0x757   :  { %v2082_v60 = vsel %vm1105_vm2, %v5016_v43, 0.0 }
 0x75c   :  { %1641 = vrot.lane.b32.xlu1 %v4606_v17, %s3746_s30 }
 0x769   :  { %1643 = vrot.lane.b32.xlu0 %v4596_v12, %s3746_s30 }
 0x780   :  { %2131 = vadd.xlane.f32.xlu1 %v2130_v39 }
 0x784   :  { %2086 = vadd.xlane.f32.xlu1 %v2085_v21 }
 0x788   :  { %2134 = vadd.xlane.f32.xlu0 %v2133_v49 }
 0x78c   :  { %2083 = vadd.xlane.f32.xlu0 %v2082_v60 }
 0x794   :  { %v2072_v51 = vpop.xlane.xlu0 %2071 }
 0x795   :  { %3580 = vrcp.f32 %v2072_v51 }
 0x798   :  { %v2075_v13 = vpop.xlane.xlu0 %2074 }
 0x799   :  { %3582 = vrcp.f32 %v2075_v13  ;;  %v2066_v16 = vpop.xlane.xlu1 %2065 }
 0x79a   :  { %3584 = vrcp.f32 %v2066_v16 }
 0x79c   :  { %v2069_v52 = vpop.xlane.xlu0 %2068 }
 0x79d   :  { %3586 = vrcp.f32 %v2069_v52 }
 0x7a0   :  { %v2078_v41 = vpop.xlane.xlu1 %2077 }
 0x7a1   :  { %3588 = vrcp.f32 %v2078_v41 }
 0x7a2   :  { %1639 = vrot.lane.b32.xlu0 %v5295_v63, %s3746_s30  ;;  %v3581_v36 = vpop.eup %3580 }
 0x7a3   :  { %v5023_v56 = vmul.f32 %v3581_v36, %v4854_v47 }
 0x7a4   :  { %v2081_v57 = vpop.xlane.xlu1 %2080 }
 0x7a5   :  { %3590 = vrcp.f32 %v2081_v57 }
 0x7a6   :  { %v3583_v20 = vpop.eup %3582 }
 0x7a7   :  { %v5026_v46 = vmul.f32 %v3583_v20, %v4859_v24  ;;  %v3585_v38 = vpop.eup %3584 }
 0x7a8   :  { %v2096_v4 = vpop.xlane.xlu1 %2095  ;;  %v5031_v21 = vmul.f32 %v3585_v38, %v4861_v25 }
 0x7aa   :  { %v3587_v39 = vpop.eup %3586 }
 0x7ab   :  { %v5034_v49 = vmul.f32 %v3587_v39, %v4869_v1 }
 0x7ac   :  { %v2099_v60 = vpop.xlane.xlu0 %2098  ;;  %v2090_v51 = vpop.xlane.xlu1 %2089 }
 0x7ad   :  { %v2224_v47 = vpack.c.bf16 %v5034_v49, %v5031_v21  ;;  %v5296_v21 = vpack.c.bf16 %v5026_v46, %v5023_v56 }
 0x7ae   :  { %v3589_v24 = vpop.eup %3588 }
 0x7af   :  { %v5041_v36 = vmul.f32 %v3589_v24, %v4875_v6 }
 0x7b0   :  { %v2093_v13 = vpop.xlane.xlu0 %2092  ;;  %v5038_v16 = vpop.xlane.xlu1 %2107 }
 0x7b2   :  { %v3591_v52 = vpop.eup %3590 }
 0x7b3   :  { %v5044_v25 = vmul.f32 %v3591_v52, %v4881_v59 }
 0x7b4   :  { %v2111_v41 = vpop.xlane.xlu0 %2110  ;;  %v2102_v57 = vpop.xlane.xlu1 %2101 }
 0x7b5   :  { %v5297_v56 = vpack.c.bf16 %v5044_v25, %v5041_v36  ;;  %v5299_v36 = vpack.c.bf16 %v4693_v33, %v4691_v30 }
 0x7b8   :  { %v2105_v20 = vpop.xlane.xlu0 %2104  ;;  %v2120_v38 = vpop.xlane.xlu1 %2119 }
 0x7b9   :  { %3592 = vrcp.f32 %v2120_v38 }
 0x7bc   :  { %v2114_v39 = vpop.xlane.xlu0 %2113 }
 0x7c0   :  { %v2123_v29 = vpop.xlane.xlu0 %2122  ;;  %v2126_v40 = vpop.xlane.xlu1 %2125 }
 0x7c1   :  { %3594 = vrcp.f32 %v2123_v29 }
 0x7c2   :  { %3596 = vrcp.f32 %v2114_v39 }
 0x7c4   :  { %v2117_v42 = vpop.xlane.xlu0 %2116  ;;  %v2144_v6 = vpop.xlane.xlu1 %2143 }
 0x7c5   :  { %3598 = vrcp.f32 %v2117_v42 }
 0x7c6   :  { %3600 = vrcp.f32 %v2126_v40  ;;  %v3593_v59 = vpop.eup %3592 }
 0x7c7   :  { %v5049_v1 = vmul.f32 %v3593_v59, %v4923_v34 }
 0x7c8   :  { %v2129_v24 = vpop.xlane.xlu0 %2128 }
 0x7c9   :  { %3602 = vrcp.f32 %v2129_v24 }
 0x7ca   :  { %3604 = vrcp.f32 %v2144_v6 }
 0x7cc   :  { %v2138_v52 = vpop.xlane.xlu1 %2137 }
 0x7ce   :  { %v3595_v31 = vpop.eup %3594 }
 0x7cf   :  { %v5052_v0 = vmul.f32 %v3595_v31, %v4939_v8  ;;  %v3597_v38 = vpop.eup %3596 }
 0x7d0   :  { %v2147_v29 = vpop.xlane.xlu0 %2146  ;;  %v2156_v39 = vpop.xlane.xlu1 %2155  ;;  %v5057_v24 = vmul.f32 %v3597_v38, %v4930_v62 }
 0x7d1   :  { %3606 = vrcp.f32 %v2147_v29  ;;  %v2233_v42 = vpack.c.bf16 %v5052_v0, %v5049_v1 }
 0x7d2   :  { %v3599_v40 = vpop.eup %3598  ;;  %3608 = vrcp.f32 %v2138_v52 }
 0x7d3   :  { %v5060_v6 = vmul.f32 %v3599_v40, %v4947_v14  ;;  %v3601_v34 = vpop.eup %3600  ;;  %3610 = vrcp.f32 %v2093_v13 }
 0x7d4   :  { %v2141_v59 = vpop.xlane.xlu0 %2140  ;;  %v5065_v29 = vmul.f32 %v3601_v34, %v4942_v3  ;;  %v2150_v62 = vpop.xlane.xlu1 %2149 }
 0x7d5   :  { %3612 = vrcp.f32 %v2141_v59  ;;  %v2232_v31 = vpack.c.bf16 %v5060_v6, %v5057_v24 }
 0x7d6   :  { %v3603_v8 = vpop.eup %3602  ;;  %3614 = vrcp.f32 %v2090_v51 }
 0x7d7   :  { %v5068_v52 = vmul.f32 %v3603_v8, %v4959_v58  ;;  %3616 = vrcp.f32 %v2096_v4  ;;  %v3605_v13 = vpop.eup %3604 }
 0x7d8   :  { %v2159_v38 = vpop.xlane.xlu0 %2158  ;;  %3618 = vrcp.f32 %v2099_v60  ;;  %v2218_v3 = vmul.f32 %v3605_v13, %v4952_v27 }
 0x7d9   :  { %v2234_v14 = vpack.c.bf16 %v5068_v52, %v5065_v29  ;;  %3620 = vrcp.f32 %v2105_v20  ;;  %v1642_v20 = vpop.permute.xlu1 %1641 }
 0x7da   :  { %3622 = vrcp.f32 %v2150_v62 }
 0x7db   :  { %3624 = vrcp.f32 %v2159_v38 }
 0x7dc   :  { %v2153_v40 = vpop.xlane.xlu0 %2152 }
 0x7dd   :  { %3626 = vrcp.f32 %v2153_v40 }
 0x7de   :  { %v3607_v51 = vpop.eup %3606  ;;  %3628 = vrcp.f32 %v2102_v57 }
 0x7df   :  { %3630 = vrcp.f32 %v2156_v39  ;;  %v2219_v58 = vmul.f32 %v3607_v51, %v4969_v10  ;;  %v3609_v4 = vpop.eup %3608 }
 0x7e0   :  { %v1644_v34 = vpop.permute.xlu0 %1643  ;;  %v3611_v59 = vpop.eup %3610  ;;  %3632 = vrcp.f32 %v2111_v41  ;;  %v2216_v57 = vmul.f32 %v3609_v4, %v4963_v18 }
 0x7e1   :  { %3013 = vmatprep.subr.bf16.mxu1 %v1644_v34  ;;  %v2237_v60 = vpack.c.bf16 %v2219_v58, %v2218_v3  ;;  %3634 = vrcp.f32 %v5038_v16  ;;  %v2201_v41 = vmul.f32 %v3611_v59, %v4906_v15 }
 0x7e2   :  { %v3613_v8 = vpop.eup %3612  ;;  %3014 = vmatpush3.bf16.msra.mxu1 %v4596_v12 }
 0x7e3   :  { %2258 = vrot.lane.b32.xlu0 %v2237_v60, %s3746_s30  ;;  %3015 = vmatprep.subr.bf16.mxu1 %v1642_v20  ;;  %v2217_v27 = vmul.f32 %v3613_v8, %v4972_v2  ;;  %v3615_v10 = vpop.eup %3614 }
 0x7e4   :  { %v3617_v39 = vpop.eup %3616  ;;  %v2200_v12 = vmul.f32 %v3615_v10, %v4893_v23 }
 0x7e5   :  { %v2236_v62 = vpack.c.bf16 %v2217_v27, %v2216_v57  ;;  %v3619_v38 = vpop.eup %3618  ;;  %v2202_v58 = vmul.f32 %v3617_v39, %v4885_v28 }
 0x7e6   :  { %3016 = vmatpush3.bf16.msra.mxu1 %v4606_v17  ;;  %v3621_v13 = vpop.eup %3620  ;;  %v2228_v51 = vpack.c.bf16 %v2201_v41, %v2200_v12  ;;  %v2203_v18 = vmul.f32 %v3619_v38, %v4896_v37 }
 0x7e7   :  { %2256 = vrot.lane.b32.xlu1 %v2236_v62, %s3746_s30  ;;  %v3623_v16 = vpop.eup %3622  ;;  %v2205_v23 = vmul.f32 %v3621_v13, %v4926_v7  ;;  %v3385_v13 = vld [vmem:[%s5250_s8] sm:$0xff]  }
 0x7e8   :  { %v3625_v40 = vpop.eup %3624  ;;  %v2220_v15 = vmul.f32 %v3623_v16, %v4978_v48  ;;  %v2229_v34 = vpack.c.bf16 %v2203_v18, %v2202_v58  ;;  %v5298_v58 = vpack.c.bf16 %v4687_v45, %v4685_v11  ;;  %v3386_v11 = vld [vmem:[%s5252_s10 + $0x8] sm:$0xff]   ;;  %v3387_v45 = vld [vmem:[%s5252_s10] sm:$0xff]  }
 0x7e9   :  { %v2223_v60 = vmul.f32 %v3625_v40, %v4984_v5  ;;  %3253 = vmatprep.subr.bf16.mxu0 %v3386_v11 }
 0x7ea   :  { %v3627_v3 = vpop.eup %3626  ;;  %3254 = vmatpush3.bf16.msra.mxu0 %v3386_v11 }
 0x7eb   :  { %v3629_v2 = vpop.eup %3628  ;;  %2244 = vrot.lane.b32.xlu1 %v2228_v51, %s3746_s30  ;;  %v2221_v17 = vmul.f32 %v3627_v3, %v4988_v61  ;;  %3255 = vmatprep.subr.bf16.mxu0 %v3387_v45 }
 0x7ec   :  { %v3631_v4 = vpop.eup %3630  ;;  %v2204_v37 = vmul.f32 %v3629_v2, %v4914_v19  ;;  %v3384_v19 = vld [vmem:[%s5250_s8 + $0x8] sm:$0xff]  }
 0x7ed   :  { %v2238_v59 = vpack.c.bf16 %v2221_v17, %v2220_v15  ;;  %v3633_v8 = vpop.eup %3632  ;;  %v2222_v28 = vmul.f32 %v3631_v4, %v4967_v32 }
 0x7ee   :  { %v3635_v20 = vpop.eup %3634  ;;  %v2230_v48 = vpack.c.bf16 %v2205_v23, %v2204_v37  ;;  %v2207_v61 = vmul.f32 %v3633_v8, %v4917_v44  ;;  %3256 = vmatpush3.bf16.msra.mxu0 %v3387_v45 }
 0x7ef   :  { %2246 = vrot.lane.b32.xlu1 %v2229_v34, %s3746_s30  ;;  %2260 = vrot.lane.b32.xlu0 %v2238_v59, %s3746_s30  ;;  %v2239_v57 = vpack.c.bf16 %v2223_v60, %v2222_v28  ;;  %v2206_v7 = vmul.f32 %v3635_v20, %v4902_v53 }
 0x7f1   :  { %v2231_v5 = vpack.c.bf16 %v2207_v61, %v2206_v7 }
 0x7f3   :  { %2248 = vrot.lane.b32.xlu1 %v2230_v48, %s3746_s30  ;;  %2262 = vrot.lane.b32.xlu0 %v2239_v57, %s3746_s30 }
 0x7f7   :  { %2250 = vrot.lane.b32.xlu1 %v2231_v5, %s3746_s30 }
 0x809   :  { %v2132_v44 = vpop.xlane.xlu1 %2131 }
 0x80d   :  { %v2087_v39 = vpop.xlane.xlu1 %2086 }
 0x811   :  { %v2135_v27 = vpop.xlane.xlu0 %2134 }
 0x812   :  { %3636 = vrcp.f32 %v2135_v27 }
 0x813   :  { %3638 = vrcp.f32 %v2132_v44 }
 0x815   :  { %v2084_v10 = vpop.xlane.xlu0 %2083 }
 0x816   :  { %3640 = vrcp.f32 %v2084_v10 }
 0x817   :  { %3642 = vrcp.f32 %v2087_v39 }
 0x819   :  { %v1640_v32 = vpop.permute.xlu0 %1639 }
 0x81a   :  { %3017 = vmatprep.subr.bf16.mxu1 %v1640_v32 }
 0x81b   :  { %3018 = vmatpush3.bf16.msra.mxu1 %v5295_v63 }
 0x81c   :  { %3233 = vmatprep.subr.bf16.mxu1 %v3384_v19 }
 0x81f   :  { %v3637_v12 = vpop.eup %3636 }
 0x820   :  { %v2215_v1 = vmul.f32 %v3637_v12, %v5012_v22 }
 0x855   :  { %v2259_v41 = vpop.permute.xlu0 %2258 }
 0x856   :  { %v2286_v24 = vsel %vm1105_vm2, %v2233_v42, %v2259_v41 }
 0x859   :  { %v2257_v62 = vpop.permute.xlu1 %2256 }
 0x85a   :  { %v2282_v53 = vsel %vm1105_vm2, %v2232_v31, %v2257_v62 }
 0x85b   :  { %2328 = vmatprep.mubr.bf16.mxu1 %v2282_v53 }
 0x85d   :  { %v2245_v38 = vpop.permute.xlu1 %2244 }
 0x85e   :  { %v2266_v63 = vsel %vm1105_vm2, %v2224_v47, %v2245_v38  ;;  %v3639_v47 = vpop.eup %3638 }
 0x85f   :  { %2329 = vmatmul.mubr.bf16.vlgmr.msra.gmra.mxu1 %v2266_v63  ;;  %v2214_v16 = vmul.f32 %v3639_v47, %v5004_v54  ;;  %v3641_v51 = vpop.eup %3640 }
 0x860   :  { %2336 = vmatprep.mubr.bf16.mxu1 %v2286_v24  ;;  %3234 = vmatpush3.bf16.msra.mxu1 %v3384_v19  ;;  %v3643_v3 = vpop.eup %3642  ;;  %v2198_v52 = vmul.f32 %v3641_v51, %v5016_v43  ;;  %v5300_v43 = vpack.c.bf16 %v4699_v9, %v4697_v50  ;;  %v5164_v19 = vld [vmem:[%s5251_s9] ss:$0 sm:$0xff]  ;;  %s2775_s9 = sshll.u32 %s3749_s12, 4  ;;  %s2776_s9 = int_to_ptr.vmem [resolvable:$true] %s2775_s9 }
 0x861   :  { %3235 = vmatprep.subr.bf16.mxu1 %v3385_v13  ;;  %v2247_v6 = vpop.permute.xlu1 %2246  ;;  %v2261_v31 = vpop.permute.xlu0 %2260  ;;  %v2235_v18 = vpack.c.bf16 %v2215_v1, %v2214_v16  ;;  %v2199_v22 = vmul.f32 %v3643_v3, %v5008_v26  ;;  %v5301_v26 = vpack.c.bf16 %v4705_v55, %v4703_v35  ;;  %s3724_s17 = scalar_lea.vmem %s2776_s9, 2048  ;;  %p3729_p1 = scmp.lt.s32.totalorder %s2776_s9, %s2776_s9 }
 0x862   :  { %v2270_v49 = vsel %vm1105_vm2, %v5296_v21, %v2247_v6  ;;  %v2290_v0 = vsel %vm1105_vm2, %v2234_v14, %v2261_v31  ;;  %p3725_p0 = scmp.ne.s32.totalorder %s2776_s9, %s3724_s17  ;;  %p3730_p2 = scmp.lt.s32.totalorder %s3724_s17, %s3724_s17 }
 0x863   :  { %v2227_v2 = vpack.c.bf16 %v2199_v22, %v2198_v52 }
 0x864   :  { %3236 = vmatpush3.bf16.msra.mxu1 %v3385_v13  ;;  %p3731_p3 = por %p3730_p2, %p3729_p1 }
 0x865   :  { %v2249_v42 = vpop.permute.xlu1 %2248  ;;  %v2263_v40 = vpop.permute.xlu0 %2262  ;;  %3273 = vmatprep.subr.bf16.mxu1 %v3386_v11 }
 0x866   :  { %v2274_v46 = vsel %vm1105_vm2, %v5297_v56, %v2249_v42  ;;  %v2294_v29 = vsel %vm1105_vm2, %v2235_v18, %v2263_v40  ;;  %p3732_p4 = pnand %p3731_p3, %p3725_p0 }
 0x867   :  { %2337 = vmatmul.mubr.bf16.gmra.mxu1 %v2270_v49 }
 0x868   :  { %2344 = vmatprep.mubr.bf16.mxu1 %v2290_v0 }
 0x869   :  { %v2251_v14 = vpop.permute.xlu1 %2250 }
 0x86a   :  { %v2278_v54 = vsel %vm1105_vm2, %v2227_v2, %v2251_v14 }
 0x86f   :  { %2345 = vmatmul.mubr.bf16.gmra.mxu1 %v2274_v46 }
 0x870   :  { %2352 = vmatprep.mubr.bf16.mxu1 %v2294_v29 }
 0x877   :  { %2353 = vmatmul.mubr.bf16.gmra.mxu1 %v2278_v54 }
 0x878   :  { %3237 = vmatprep.mubr.msk.bf16.mxu1 %vm553_vm1, %v5298_v58 }
 0x87f   :  { %3238 = vmatmul.mubr.msk.bf16.vlgmr.msra.gmra.mxu1 %vm553_vm1, %v5299_v36 }
 0x880   :  { %3241 = vmatprep.mubr.msk.bf16.mxu1 %vm553_vm1, %v5300_v43  ;;  %3275 = vmatpush3.bf16.msra.mxu1 %v3386_v11 }
 0x881   :  { %3274 = vmatprep.subr.bf16.mxu1 %v3387_v45 }
 0x884   :  { %3276 = vmatpush3.bf16.msra.mxu1 %v3387_v45 }
 0x887   :  { %3242 = vmatmul.mubr.msk.bf16.gmra.mxu1 %vm553_vm1, %v5301_v26 }
 0x91f   :  { %v3019_v30 = vpop.f32.mrf.mxu1 }
 0x921   :  { %v3020_v33 = vpop.f32.mrf.mxu1 }
 0x922   :  { %v3021_v35 = vadd.f32 %v3020_v33, %v3019_v30 }
 0x923   :  { %v3022_v50 = vpop.f32.mrf.mxu1 }
 0x925   :  { %v3023_v9 = vpop.f32.mrf.mxu1 }
 0x926   :  { %v3024_v55 = vadd.f32 %v3023_v9, %v3022_v50 }
 0x927   :  { %v3025_v25 = vpop.f32.mrf.mxu1 }
 0x928   :  { %v2365_v15 = vpack.c.bf16 %v3024_v55, %v3021_v35 }
 0x929   :  { %v3026_v17 = vpop.f32.mrf.mxu1 }
 0x92a   :  { %3245 = vmatprep.mubr.msk.bf16.mxu1 %vm553_vm1, %v2365_v15  ;;  %v3027_v59 = vadd.f32 %v3026_v17, %v3025_v25 }
 0x92b   :  { %v3028_v4 = vpop.f32.mrf.mxu1 }
 0x92d   :  { %v3029_v34 = vpop.f32.mrf.mxu1 }
 0x92e   :  { %v3030_v23 = vadd.f32 %v3029_v34, %v3028_v4 }
 0x92f   :  { %v3031_v60 = vpop.f32.mrf.mxu1 }
 0x930   :  { %v2366_v8 = vpack.c.bf16 %v3030_v23, %v3027_v59 }
 0x931   :  { %v3032_v37 = vpop.f32.mrf.mxu1 }
 0x932   :  { %3246 = vmatmul.mubr.msk.bf16.gmra.mxu1 %vm553_vm1, %v2366_v8  ;;  %v3033_v48 = vadd.f32 %v3032_v37, %v3031_v60 }
 0x933   :  { %v3034_v28 = vpop.f32.mrf.mxu1 }
 0x935   :  { %v3035_v20 = vpop.f32.mrf.mxu1 }
 0x936   :  { %v3036_v57 = vadd.f32 %v3035_v20, %v3034_v28 }
 0x937   :  { %v3037_v61 = vpop.f32.mrf.mxu1 }
 0x938   :  { %v2367_v7 = vpack.c.bf16 %v3036_v57, %v3033_v48 }
 0x939   :  { %v3038_v5 = vpop.f32.mrf.mxu1 }
 0x93a   :  { %3249 = vmatprep.mubr.msk.bf16.mxu1 %vm553_vm1, %v2367_v7  ;;  %v3039_v32 = vadd.f32 %v3038_v5, %v3037_v61 }
 0x93b   :  { %v3040_v27 = vpop.f32.mrf.mxu1 }
 0x93d   :  { %v3041_v10 = vpop.f32.mrf.mxu1 }
 0x93e   :  { %v3042_v44 = vadd.f32 %v3041_v10, %v3040_v27 }
 0x93f   :  { %v3239_v39 = vpop.f32.mrf.mxu1 }
 0x940   :  { %v2368_v62 = vpack.c.bf16 %v3042_v44, %v3039_v32  ;;  %v2459_v53 = vadd.f32 %v3239_v39, %v5164_v19 }
 0x941   :  { %v2450_v41 = vpop.f32.mrf.mxu1 }
 0x942   :  { %v2515_v38 = vsub.f32 0.0, %v2459_v53  ;;  %v2451_v13 = vadd.f32 %v5164_v19, %v2450_v41  ;;  %3250 = vmatmul.mubr.msk.bf16.gmra.mxu1 %vm553_vm1, %v2368_v62 }
 0x943   :  { %v3240_v63 = vpop.f32.mrf.mxu1 }
 0x944   :  { %v2513_v24 = vsub.f32 0.0, %v2451_v13  ;;  %v2462_v6 = vadd.f32 %v3240_v63, %v5164_v19  ;;  %v2533_v31 = vmul.f32 1.442695, %v2515_v38 }
 0x945   :  { %v2453_v12 = vpop.f32.mrf.mxu1 }
 0x946   :  { %v2529_v21 = vmul.f32 1.442695, %v2513_v24  ;;  %v2516_v49 = vsub.f32 0.0, %v2462_v6  ;;  %v2454_v0 = vadd.f32 %v5164_v19, %v2453_v12 }
 0x947   :  { %v3243_v47 = vpop.f32.mrf.mxu1 }
 0x948   :  { %3644 = vpow2.f32 %v2529_v21  ;;  %v2535_v1 = vmul.f32 1.442695, %v2516_v49  ;;  %v2514_v42 = vsub.f32 0.0, %v2454_v0  ;;  %v2475_v16 = vadd.f32 %v3243_v47, %v5164_v19 }
 0x949   :  { %3646 = vpow2.f32 %v2533_v31  ;;  %v2466_v40 = vpop.f32.mrf.mxu1 }
 0x94a   :  { %3648 = vpow2.f32 %v2535_v1  ;;  %v2531_v51 = vmul.f32 1.442695, %v2514_v42  ;;  %v2519_v18 = vsub.f32 0.0, %v2475_v16  ;;  %v2467_v56 = vadd.f32 %v5164_v19, %v2466_v40 }
 0x94b   :  { %v3244_v46 = vpop.f32.mrf.mxu1 }
 0x94c   :  { %3650 = vpow2.f32 %v2531_v51  ;;  %v2517_v3 = vsub.f32 0.0, %v2467_v56  ;;  %v2478_v29 = vadd.f32 %v3244_v46, %v5164_v19  ;;  %v2541_v52 = vmul.f32 1.442695, %v2519_v18 }
 0x94d   :  { %v2469_v22 = vpop.f32.mrf.mxu1 }
 0x94e   :  { %v2537_v14 = vmul.f32 1.442695, %v2517_v3  ;;  %v2520_v2 = vsub.f32 0.0, %v2478_v29  ;;  %v2470_v54 = vadd.f32 %v5164_v19, %v2469_v22 }
 0x950   :  { %3652 = vpow2.f32 %v2537_v14  ;;  %v2543_v58 = vmul.f32 1.442695, %v2520_v2  ;;  %v2518_v36 = vsub.f32 0.0, %v2470_v54 }
 0x951   :  { %3654 = vpow2.f32 %v2541_v52 }
 0x952   :  { %3656 = vpow2.f32 %v2543_v58  ;;  %v2539_v43 = vmul.f32 1.442695, %v2518_v36 }
 0x954   :  { %3658 = vpow2.f32 %v2539_v43 }
 0x955   :  { %v3645_v26 = vpop.eup %3644 }
 0x956   :  { %v3647_v11 = vpop.eup %3646  ;;  %v2561_v45 = vadd.f32 1.0, %v3645_v26 }
 0x957   :  { %v3649_v30 = vpop.eup %3648  ;;  %v2563_v9 = vadd.f32 1.0, %v3647_v11 }
 0x958   :  { %v2564_v33 = vadd.f32 1.0, %v3649_v30  ;;  %3660 = vrcp.f32 %v2561_v45 }
 0x959   :  { %v3651_v50 = vpop.eup %3650 }
 0x95a   :  { %v2562_v35 = vadd.f32 1.0, %v3651_v50  ;;  %3662 = vrcp.f32 %v2564_v33 }
 0x95c   :  { %3664 = vrcp.f32 %v2562_v35 }
 0x95d   :  { %v3653_v55 = vpop.eup %3652  ;;  %3666 = vrcp.f32 %v2563_v9 }
 0x95e   :  { %v3655_v25 = vpop.eup %3654  ;;  %v2565_v15 = vadd.f32 1.0, %v3653_v55 }
 0x95f   :  { %v3657_v17 = vpop.eup %3656  ;;  %v2567_v59 = vadd.f32 1.0, %v3655_v25 }
 0x960   :  { %v2568_v4 = vadd.f32 1.0, %v3657_v17  ;;  %3668 = vrcp.f32 %v2565_v15 }
 0x961   :  { %v3659_v34 = vpop.eup %3658 }
 0x962   :  { %v2566_v23 = vadd.f32 1.0, %v3659_v34  ;;  %3670 = vrcp.f32 %v2568_v4 }
 0x964   :  { %3672 = vrcp.f32 %v2566_v23 }
 0x965   :  { %3674 = vrcp.f32 %v2567_v59  ;;  %v3661_v60 = vpop.eup %3660 }
 0x967   :  { %v3663_v8 = vpop.eup %3662 }
 0x969   :  { %v3665_v37 = vpop.eup %3664 }
 0x96a   :  { %v3667_v28 = vpop.eup %3666  ;;  %v2593_v20 = vpack.c.bf16 %v3665_v37, %v3661_v60 }
 0x96b   :  { %v2594_v48 = vpack.c.bf16 %v3663_v8, %v3667_v28 }
 0x96c   :  { %3257 = vmatprep.mubr.msk.bf16.mxu0 %vm553_vm1, %v2593_v20 }
 0x96d   :  { %3258 = vmatmul.mubr.msk.bf16.vlgmr.msra.gmra.mxu0 %vm553_vm1, %v2594_v48  ;;  %v3669_v57 = vpop.eup %3668 }
 0x96f   :  { %v3671_v61 = vpop.eup %3670 }
 0x971   :  { %v3673_v7 = vpop.eup %3672 }
 0x972   :  { %v3675_v5 = vpop.eup %3674  ;;  %v2595_v27 = vpack.c.bf16 %v3673_v7, %v3669_v57 }
 0x973   :  { %v2596_v10 = vpack.c.bf16 %v3671_v61, %v3675_v5  ;;  %v3708_v61 = vld [vmem:[%s5242_s0 + $0x10] sm:$0xff] }
 0x974   :  { %3261 = vmatprep.mubr.msk.bf16.mxu0 %vm553_vm1, %v2595_v27 }
 0x975   :  { %3262 = vmatmul.mubr.msk.bf16.gmra.mxu0 %vm553_vm1, %v2596_v10 }
 0x9f2   :  { %v3247_v32 = vpop.f32.mrf.mxu1 }
 0x9f3   :  { %v2491_v44 = vadd.f32 %v3247_v32, %v5164_v19  ;;  %v3709_v32 = vld [vmem:[%s5242_s0] sm:$0xff] }
 0x9f4   :  { %v2482_v39 = vpop.f32.mrf.mxu1 }
 0x9f5   :  { %v2523_v62 = vsub.f32 0.0, %v2491_v44  ;;  %v2483_v53 = vadd.f32 %v5164_v19, %v2482_v39 }
 0x9f6   :  { %v3248_v41 = vpop.f32.mrf.mxu1 }
 0x9f7   :  { %v2549_v38 = vmul.f32 1.442695, %v2523_v62  ;;  %v2521_v13 = vsub.f32 0.0, %v2483_v53  ;;  %v2494_v63 = vadd.f32 %v3248_v41, %v5164_v19  ;;  %v3710_v62 = vld [vmem:[%s5242_s0 + $0x18] sm:$0xff] }
 0x9f8   :  { %v2485_v24 = vpop.f32.mrf.mxu1 }
 0x9f9   :  { %3676 = vpow2.f32 %v2549_v38  ;;  %v2545_v6 = vmul.f32 1.442695, %v2521_v13  ;;  %v2524_v31 = vsub.f32 0.0, %v2494_v63  ;;  %v2486_v12 = vadd.f32 %v5164_v19, %v2485_v24  ;;  %v3711_v38 = vld [vmem:[%s5242_s0 + $0x8] sm:$0xff]  ;;  %v3712_v24 = vld [vmem:[%s5242_s0 + $0x30] sm:$0xff] }
 0x9fb   :  { %3678 = vpow2.f32 %v2545_v6  ;;  %v2551_v21 = vmul.f32 1.442695, %v2524_v31  ;;  %v2522_v49 = vsub.f32 0.0, %v2486_v12  ;;  %v3713_v12 = vld [vmem:[%s5242_s0 + $0x20] sm:$0xff] }
 0x9fd   :  { %3680 = vpow2.f32 %v2551_v21  ;;  %v2547_v0 = vmul.f32 1.442695, %v2522_v49 }
 0x9ff   :  { %3682 = vpow2.f32 %v2547_v0  ;;  %v3714_v0 = vld [vmem:[%s5242_s0 + $0x38] sm:$0xff] }
 0xa02   :  { %v3251_v47 = vpop.f32.mrf.mxu1 }
 0xa03   :  { %v2507_v1 = vadd.f32 %v3251_v47, %v5164_v19 }
 0xa04   :  { %v2498_v42 = vpop.f32.mrf.mxu1 }
 0xa05   :  { %v2527_v16 = vsub.f32 0.0, %v2507_v1  ;;  %v2499_v40 = vadd.f32 %v5164_v19, %v2498_v42  ;;  %v3715_v42 = vld [vmem:[%s5242_s0 + $0x28] sm:$0xff] }
 0xa06   :  { %v3677_v51 = vpop.eup %3676  ;;  %v3252_v18 = vpop.f32.mrf.mxu1 }
 0xa07   :  { %v2571_v56 = vadd.f32 1.0, %v3677_v51  ;;  %v2557_v46 = vmul.f32 1.442695, %v2527_v16  ;;  %v2525_v3 = vsub.f32 0.0, %v2499_v40  ;;  %v2510_v29 = vadd.f32 %v3252_v18, %v5164_v19  ;;  %v3716_v51 = vld [vmem:[%s5242_s0 + $0x50] sm:$0xff] }
 0xa08   :  { %v3679_v52 = vpop.eup %3678  ;;  %v2501_v22 = vpop.f32.mrf.mxu1 }
 0xa09   :  { %3684 = vrcp.f32 %v2571_v56  ;;  %v2569_v14 = vadd.f32 1.0, %v3679_v52  ;;  %v2553_v2 = vmul.f32 1.442695, %v2525_v3  ;;  %v2528_v54 = vsub.f32 0.0, %v2510_v29  ;;  %v3718_v52 = vld [vmem:[%s5242_s0 + $0x58] sm:$0xff] }
 0xa0a   :  { %v3681_v58 = vpop.eup %3680  ;;  %3686 = vpow2.f32 %v2557_v46  ;;  %v2502_v36 = vadd.f32 %v5164_v19, %v2501_v22  ;;  %v3717_v46 = vld [vmem:[%s5242_s0 + $0x40] sm:$0xff] }
 0xa0b   :  { %3688 = vrcp.f32 %v2569_v14  ;;  %v2572_v43 = vadd.f32 1.0, %v3681_v58  ;;  %v2559_v26 = vmul.f32 1.442695, %v2528_v54 }
 0xa0c   :  { %v3683_v11 = vpop.eup %3682  ;;  %3690 = vpow2.f32 %v2553_v2  ;;  %v2526_v45 = vsub.f32 0.0, %v2502_v36  ;;  %v3719_v2 = vld [vmem:[%s5242_s0 + $0x48] sm:$0xff]  ;;  %v3720_v36 = vld [vmem:[%s5242_s0 + $0x70] sm:$0xff] }
 0xa0d   :  { %3692 = vrcp.f32 %v2572_v43  ;;  %v2570_v30 = vadd.f32 1.0, %v3683_v11  ;;  %v3721_v11 = vld [vmem:[%s5242_s0 + $0x60] sm:$0xff] }
 0xa0e   :  { %3694 = vpow2.f32 %v2559_v26  ;;  %v2555_v33 = vmul.f32 1.442695, %v2526_v45 }
 0xa0f   :  { %3696 = vrcp.f32 %v2570_v30 }
 0xa10   :  { %3698 = vpow2.f32 %v2555_v33  ;;  %v3722_v33 = vld [vmem:[%s5242_s0 + $0x78] sm:$0xff] }
 0xa16   :  { %v3685_v50 = vpop.eup %3684 }
 0xa17   :  { %v3687_v9 = vpop.eup %3686 }
 0xa18   :  { %v3689_v35 = vpop.eup %3688  ;;  %v2575_v59 = vadd.f32 1.0, %v3687_v9 }
 0xa19   :  { %v3691_v55 = vpop.eup %3690 }
 0xa1a   :  { %v3693_v25 = vpop.eup %3692  ;;  %v2573_v15 = vadd.f32 1.0, %v3691_v55 }
 0xa1b   :  { %v3695_v17 = vpop.eup %3694  ;;  %v2598_v8 = vpack.c.bf16 %v3693_v25, %v3685_v50 }
 0xa1c   :  { %v3697_v19 = vpop.eup %3696  ;;  %v2576_v4 = vadd.f32 1.0, %v3695_v17  ;;  %3700 = vrcp.f32 %v2573_v15 }
 0xa1d   :  { %v3699_v34 = vpop.eup %3698  ;;  %v2597_v23 = vpack.c.bf16 %v3697_v19, %v3689_v35  ;;  %v3723_v35 = vld [vmem:[%s5242_s0 + $0x68] sm:$0xff] }
 0xa1e   :  { %v2574_v60 = vadd.f32 1.0, %v3699_v34  ;;  %3702 = vrcp.f32 %v2576_v4 }
 0xa1f   :  { %3265 = vmatprep.mubr.msk.bf16.mxu0 %vm553_vm1, %v2597_v23 }
 0xa20   :  { %3704 = vrcp.f32 %v2574_v60  ;;  %3266 = vmatmul.mubr.msk.bf16.gmra.mxu0 %vm553_vm1, %v2598_v8 }
 0xa21   :  { %3706 = vrcp.f32 %v2575_v59 }
 0xa29   :  { %v3701_v37 = vpop.eup %3700 }
 0xa2b   :  { %v3703_v28 = vpop.eup %3702 }
 0xa2d   :  { %v3705_v20 = vpop.eup %3704  ;;  %v3259_v48 = vpop.f32.mrf.mxu0 }
 0xa2e   :  { %v3707_v57 = vpop.eup %3706  ;;  %v2740_v7 = vmul.f32 %v3708_v61, %v3259_v48  ;;  %v2599_v5 = vpack.c.bf16 %v3705_v20, %v3701_v37 }
 0xa2f   :  { %v2675_v27 = vpop.f32.mrf.mxu0  ;;  %v2600_v10 = vpack.c.bf16 %v3703_v28, %v3707_v57 }
 0xa30   :  { %2756 = vst [vmem:[#allocation2 + $0x10] sm:$0xff] %v2740_v7  ;;  %v2738_v44 = vmul.f32 %v3709_v32, %v2675_v27  ;;  %3269 = vmatprep.mubr.msk.bf16.mxu1 %vm553_vm1, %v2599_v5 }
 0xa31   :  { %3270 = vmatmul.mubr.msk.bf16.vlgmr.msra.gmra.mxu1 %vm553_vm1, %v2600_v10  ;;  %v3260_v39 = vpop.f32.mrf.mxu0 }
 0xa32   :  { %2754 = vst [vmem:[#allocation2] sm:$0xff] %v2738_v44  ;;  %v2741_v53 = vmul.f32 %v3710_v62, %v3260_v39 }
 0xa33   :  { %v2678_v41 = vpop.f32.mrf.mxu0 }
 0xa34   :  { %2757 = vst [vmem:[#allocation2 + $0x18] sm:$0xff] %v2741_v53  ;;  %v2739_v13 = vmul.f32 %v3711_v38, %v2678_v41 }
 0xa35   :  { %v3263_v63 = vpop.f32.mrf.mxu0 }
 0xa36   :  { %2755 = vst [vmem:[#allocation2 + $0x8] sm:$0xff] %v2739_v13  ;;  %v2744_v6 = vmul.f32 %v3712_v24, %v3263_v63 }
 0xa37   :  { %v2691_v31 = vpop.f32.mrf.mxu0 }
 0xa38   :  { %2760 = vst [vmem:[#allocation2 + $0x30] sm:$0xff] %v2744_v6  ;;  %v2742_v21 = vmul.f32 %v3713_v12, %v2691_v31 }
 0xa39   :  { %v3264_v49 = vpop.f32.mrf.mxu0 }
 0xa3a   :  { %2758 = vst [vmem:[#allocation2 + $0x20] sm:$0xff] %v2742_v21  ;;  %v2745_v47 = vmul.f32 %v3714_v0, %v3264_v49 }
 0xa3b   :  { %v2694_v1 = vpop.f32.mrf.mxu0 }
 0xa3c   :  { %2761 = vst [vmem:[#allocation2 + $0x38] sm:$0xff] %v2745_v47  ;;  %v2743_v16 = vmul.f32 %v3715_v42, %v2694_v1 }
 0xa3e   :  { %2759 = vst [vmem:[#allocation2 + $0x28] sm:$0xff] %v2743_v16 }
 0xae0   :  { %v3267_v40 = vpop.f32.mrf.mxu0 }
 0xae1   :  { %v2748_v18 = vmul.f32 %v3716_v51, %v3267_v40 }
 0xae2   :  { %v2707_v56 = vpop.f32.mrf.mxu0 }
 0xae3   :  { %2764 = vst [vmem:[#allocation2 + $0x50] sm:$0xff] %v2748_v18  ;;  %v2746_v3 = vmul.f32 %v3717_v46, %v2707_v56 }
 0xae4   :  { %v3268_v29 = vpop.f32.mrf.mxu0 }
 0xae5   :  { %2762 = vst [vmem:[#allocation2 + $0x40] sm:$0xff] %v2746_v3  ;;  %v2749_v22 = vmul.f32 %v3718_v52, %v3268_v29 }
 0xae6   :  { %v2710_v14 = vpop.f32.mrf.mxu0 }
 0xae7   :  { %2765 = vst [vmem:[#allocation2 + $0x58] sm:$0xff] %v2749_v22  ;;  %v2747_v54 = vmul.f32 %v3719_v2, %v2710_v14 }
 0xae9   :  { %2763 = vst [vmem:[#allocation2 + $0x48] sm:$0xff] %v2747_v54 }
 0xaf1   :  { %v3271_v58 = vpop.f32.mrf.mxu1 }
 0xaf2   :  { %v2752_v43 = vmul.f32 %v3720_v36, %v3271_v58 }
 0xaf3   :  { %v2723_v26 = vpop.f32.mrf.mxu1 }
 0xaf4   :  { %2768 = vst [vmem:[#allocation2 + $0x70] sm:$0xff] %v2752_v43  ;;  %v2750_v45 = vmul.f32 %v3721_v11, %v2723_v26 }
 0xaf5   :  { %v3272_v30 = vpop.f32.mrf.mxu1 }
 0xaf6   :  { %2766 = vst [vmem:[#allocation2 + $0x60] sm:$0xff] %v2750_v45  ;;  %v2753_v50 = vmul.f32 %v3722_v33, %v3272_v30 }
 0xaf7   :  { %v2726_v9 = vpop.f32.mrf.mxu1 }
 0xaf8   :  { %2769 = vst [vmem:[#allocation2 + $0x78] sm:$0xff] %v2753_v50  ;;  %v2751_v55 = vmul.f32 %v3723_v35, %v2726_v9 }
 0xafa   :  { %2767 = vst [vmem:[#allocation2 + $0x68] sm:$0xff] %v2751_v55 }
 0xafb   :  { %3735 = shalt.err (!%p3732_p4)
}
 0xafc   :  { %s3750_s1 = smov 128   ;;  %s3751_s18 = smov 8  }
 0xafd   :  { %2781 = dma.vmem_to_hbm [thread:$0]  %s2776_s9, 2048, %s5253_s11, [#allocation3], %s3750_s1, %s3750_s1, %s3751_s18  }
 0xafe   :  { %3744 = dma.done.wait [#allocation3], 2048  }
 0xaff   :  { %3745 = vsyncadd [#allocation3], 4294965248 }
 0xb00   :  { %2785 = vsyncpa [#allocation3], 1 }

</bundles_post_ra>
